<compile_context>
chip_gen: v5e
topology: v5e:2x2
jax: 0.10.0
libtpu: 0.0.40
codegen_flags: <defaults>
</compile_context>

<pallas_src>
import jax
import jax.numpy as jnp
import numpy as np
from jax import lax
from jax.experimental import pallas as pl
from jax.experimental.pallas import tpu as pltpu


# --------------------------- fused Pallas kernel ----------------------------

def _lstm_cell(gates, c_prev, H):
    """One LSTM cell update from pre-activation gates (B, 4H); torch order i,f,g,o."""
    sig = jax.nn.sigmoid(gates)            # one full-width EUP pass
    th = jnp.tanh(gates)                   # one full-width EUP pass
    i_g = sig[:, 0:H]
    f_g = sig[:, H:2 * H]
    g_g = th[:, 2 * H:3 * H]
    o_g = sig[:, 3 * H:4 * H]
    c = f_g * c_prev + i_g * g_g
    h = o_g * jnp.tanh(c)
    return h, c


def _fused_ae_kernel(x_ref,
                     wih1_ref, whh1_ref, b1_ref,
                     wih2_ref, whh2_ref, b2_ref,
                     wih3_ref, whh3_ref, b3_ref,
                     wih4_ref, whh4_ref, b4_ref,
                     wout_ref, bout_ref,
                     out_ref):
    f32 = jnp.float32
    B, T, _ = x_ref.shape
    H = whh1_ref.shape[0]
    G = 4 * H
    Dout = wout_ref.shape[1]

    x = x_ref[...].astype(f32)                                       # (B, T, D)

    # ------------------------------ encoder ---------------------------------
    whh1 = whh1_ref[...]
    # hoisted: x @ W_ih over the full sequence, bias folded in once.
    gx1 = lax.dot_general(x, wih1_ref[...], (((2,), (0,)), ((), ())),
                          preferred_element_type=f32) + b1_ref[...]  # (B, T, 4H)

    wih2 = wih2_ref[...]
    whh2 = whh2_ref[...]
    b2 = jnp.broadcast_to(b2_ref[...], (B, G))                       # hoisted

    zeros_bh = jnp.zeros((B, H), f32)
    h1, c1 = zeros_bh, zeros_bh
    h2, c2 = zeros_bh, zeros_bh
    # Fully unrolled; layer-2 step t depends only on layer-1 step t, so the
    # scheduler overlaps the two recurrences inside this single basic block.
    for t in range(T):
        g1 = gx1[:, t, :] + jnp.dot(h1, whh1, preferred_element_type=f32)
        h1, c1 = _lstm_cell(g1, c1, H)
        x2 = jnp.maximum(h1, 0.0)                                    # encoder ReLU
        g2 = (jnp.dot(x2, wih2, preferred_element_type=f32)
              + jnp.dot(h2, whh2, preferred_element_type=f32) + b2)
        h2, c2 = _lstm_cell(g2, c2, H)

    hidden_n = h2                                                    # (B, H) latent

    # ---------------------- decoder input (repeat/reshape) ------------------
    # torch: hidden.unsqueeze(0).repeat(1, T, 1).reshape(B, T, H)
    #   => dec_in[b, t] = hidden[(b*T + t) % B]   (interleaving reproduced exactly)
    # Hoist the dec-LSTM1 input projection: hp3 = hidden @ W_ih3 + b3, then the
    # per-step "repeat" is just a static row selection (cheap VPU selects).
    whh3 = whh3_ref[...]
    hp3 = (jnp.dot(hidden_n, wih3_ref[...], preferred_element_type=f32)
           + b3_ref[...])                                            # (B, 4H)
    hp3_rows = [jnp.broadcast_to(hp3[j:j + 1, :], (B, G)) for j in range(B)]
    row_id = lax.broadcasted_iota(jnp.int32, (B, G), 0)              # batch index b

    wih4 = wih4_ref[...]
    whh4 = whh4_ref[...]
    b4 = jnp.broadcast_to(b4_ref[...], (B, G))                       # hoisted

    wout = wout_ref[...]
    bout = jnp.broadcast_to(bout_ref[...], (B, Dout))                # hoisted

    # ------------------------------ decoder ---------------------------------
    h3, c3 = zeros_bh, zeros_bh
    h4, c4 = zeros_bh, zeros_bh
    for t in range(T):
        src = (row_id * T + t) % B                                   # (B, G) static pattern
        gx3_t = hp3_rows[0]
        for j in range(1, B):
            gx3_t = jnp.where(src == j, hp3_rows[j], gx3_t)
        g3 = gx3_t + jnp.dot(h3, whh3, preferred_element_type=f32)
        h3, c3 = _lstm_cell(g3, c3, H)
        x4 = jnp.maximum(h3, 0.0)                                    # decoder ReLU
        g4 = (jnp.dot(x4, wih4, preferred_element_type=f32)
              + jnp.dot(h4, whh4, preferred_element_type=f32) + b4)
        h4, c4 = _lstm_cell(g4, c4, H)
        o_t = jnp.dot(h4, wout, preferred_element_type=f32) + bout   # (B, Dout)
        out_ref[:, t, :] = o_t.astype(out_ref.dtype)


# --------------------------- wrapper -----------------------------------------

def lstm_autoencoder_forward(params, x):
    B, T, D = x.shape
    vmem = pl.BlockSpec(memory_space=pltpu.MemorySpace.VMEM)
    args = (
        x,
        params["enc_lstm1"]["wih_t"], params["enc_lstm1"]["whh_t"], params["enc_lstm1"]["b"],
        params["enc_lstm2"]["wih_t"], params["enc_lstm2"]["whh_t"], params["enc_lstm2"]["b"],
        params["dec_lstm1"]["wih_t"], params["dec_lstm1"]["whh_t"], params["dec_lstm1"]["b"],
        params["dec_lstm2"]["wih_t"], params["dec_lstm2"]["whh_t"], params["dec_lstm2"]["b"],
        params["out_w_t"], params["out_b"],
    )
    return pl.pallas_call(
        _fused_ae_kernel,
        out_shape=jax.ShapeDtypeStruct((B, T, D), jnp.float32),
        in_specs=[vmem] * len(args),
        out_specs=vmem,
    )(*args)


# --------------------------- parameter init ---------------------------------

def _kaiming_uniform(key, shape, fan_in, gain):
    bound = gain * np.sqrt(3.0 / fan_in)
    return jax.random.uniform(key, shape, jnp.float32, -bound, bound)


def init_lstm_params(key, input_size, hidden_size):
    # PyTorch: weight_ih (4H, in), weight_hh (4H, H) kaiming_uniform(tanh, fan_in);
    #          bias_ih = bias_hh = 0.01  -> combined bias 0.02.
    k1, k2 = jax.random.split(key)
    gain = 5.0 / 3.0  # tanh gain
    w_ih = _kaiming_uniform(k1, (4 * hidden_size, input_size), input_size, gain)
    w_hh = _kaiming_uniform(k2, (4 * hidden_size, hidden_size), hidden_size, gain)
    b = jnp.full((1, 4 * hidden_size), 0.02, jnp.float32)
    return dict(wih_t=w_ih.T, whh_t=w_hh.T, b=b)


def init_autoencoder_params(key, seq_len, dynamic_input_size, hidden_size):
    ks = jax.random.split(key, 6)
    params = {
        "enc_lstm1": init_lstm_params(ks[0], dynamic_input_size, hidden_size),
        "enc_lstm2": init_lstm_params(ks[1], hidden_size, hidden_size),
        "dec_lstm1": init_lstm_params(ks[2], hidden_size, hidden_size),
        "dec_lstm2": init_lstm_params(ks[3], hidden_size, hidden_size),
    }
    # decoder output_layer: Linear(hidden_size, dynamic_input_size)
    w_out = _kaiming_uniform(ks[4], (dynamic_input_size, hidden_size),
                             hidden_size, np.sqrt(2.0))
    params["out_w_t"] = w_out.T                                    # (H, D_in)
    params["out_b"] = jnp.full((1, dynamic_input_size), 0.01, jnp.float32)
    return params


# --------------------------- pure-JAX reference -----------------------------

def _lstm_ref(x, wih_t, whh_t, b, H):
    B = x.shape[0]

    def step(carry, xt):
        h, c = carry
        gates = xt @ wih_t + h @ whh_t + b[0]
        i = jax.nn.sigmoid(gates[:, :H])
        f = jax.nn.sigmoid(gates[:, H:2 * H])
        g = jnp.tanh(gates[:, 2 * H:3 * H])
        o = jax.nn.sigmoid(gates[:, 3 * H:])
        c = f * c + i * g
        h = o * jnp.tanh(c)
        return (h, c), h

    init = (jnp.zeros((B, H), jnp.float32), jnp.zeros((B, H), jnp.float32))
    (hT, _), ys = lax.scan(step, init, jnp.transpose(x, (1, 0, 2)))
    return jnp.transpose(ys, (1, 0, 2)), hT


def ref_forward(params, x):
    B, T, _ = x.shape
    H = params["enc_lstm1"]["whh_t"].shape[0]
    p = params["enc_lstm1"]
    y1, _ = _lstm_ref(x, p["wih_t"], p["whh_t"], p["b"], H)
    y1 = jnp.maximum(y1, 0.0)
    p = params["enc_lstm2"]
    _, hidden = _lstm_ref(y1, p["wih_t"], p["whh_t"], p["b"], H)
    dec_in = jnp.tile(hidden, (T, 1)).reshape(B, T, H)   # torch repeat/reshape
    p = params["dec_lstm1"]
    d1, _ = _lstm_ref(dec_in, p["wih_t"], p["whh_t"], p["b"], H)
    d1 = jnp.maximum(d1, 0.0)
    p = params["dec_lstm2"]
    d2, _ = _lstm_ref(d1, p["wih_t"], p["whh_t"], p["b"], H)
    return d2 @ params["out_w_t"] + params["out_b"]


# --------------------------- main --------------------------------------------

if __name__ == "__main__":
    # Small shapes consistent with the module's forward:
    B, T, D_IN, H = 2, 8, 4, 32          # batch, seq_len, dynamic_input_size, hidden
    key = jax.random.PRNGKey(0)
    k_param, k_x = jax.random.split(key)

    params = init_autoencoder_params(k_param, T, D_IN, H)
    x = jax.random.normal(k_x, (B, T, D_IN), jnp.float32)

    fwd = jax.jit(lstm_autoencoder_forward)
    out = jax.block_until_ready(fwd(params, x))

    assert out.shape == (B, T, D_IN), out.shape
    assert bool(jnp.all(jnp.isfinite(out)))

    # correctness vs. pure-JAX reference
    ref = ref_forward(params, x)
    assert bool(jnp.allclose(out, ref, rtol=1e-2, atol=1e-3)), (
        float(jnp.max(jnp.abs(out - ref))))

    print("KERNEL_OK")
</pallas_src>

<mosaic_0001>
module attributes {stable_mosaic.version = 11 : i64} {
  func.func @_fused_ae_kernel(%arg0: memref<2x8x4xf32, #tpu.memory_space<vmem>>, %arg1: memref<4x128xf32, #tpu.memory_space<vmem>>, %arg2: memref<32x128xf32, #tpu.memory_space<vmem>>, %arg3: memref<1x128xf32, #tpu.memory_space<vmem>>, %arg4: memref<32x128xf32, #tpu.memory_space<vmem>>, %arg5: memref<32x128xf32, #tpu.memory_space<vmem>>, %arg6: memref<1x128xf32, #tpu.memory_space<vmem>>, %arg7: memref<32x128xf32, #tpu.memory_space<vmem>>, %arg8: memref<32x128xf32, #tpu.memory_space<vmem>>, %arg9: memref<1x128xf32, #tpu.memory_space<vmem>>, %arg10: memref<32x128xf32, #tpu.memory_space<vmem>>, %arg11: memref<32x128xf32, #tpu.memory_space<vmem>>, %arg12: memref<1x128xf32, #tpu.memory_space<vmem>>, %arg13: memref<32x4xf32, #tpu.memory_space<vmem>>, %arg14: memref<1x4xf32, #tpu.memory_space<vmem>>, %arg15: memref<2x8x4xf32, #tpu.memory_space<vmem>>) attributes {dimension_semantics = [], scalar_prefetch = 0 : i64, scratch_operands = 0 : i64, tpu.core_type = #tpu.core_type<tc>} {
    %c0 = arith.constant 0 : index
    %c0_0 = arith.constant 0 : index
    %c0_1 = arith.constant 0 : index
    %0 = vector.load %arg0[%c0, %c0_0, %c0_1] : memref<2x8x4xf32, #tpu.memory_space<vmem>>, vector<2x8x4xf32>
    %c0_2 = arith.constant 0 : index
    %c0_3 = arith.constant 0 : index
    %1 = vector.load %arg2[%c0_2, %c0_3] : memref<32x128xf32, #tpu.memory_space<vmem>>, vector<32x128xf32>
    %c0_4 = arith.constant 0 : index
    %c0_5 = arith.constant 0 : index
    %2 = vector.load %arg1[%c0_4, %c0_5] : memref<4x128xf32, #tpu.memory_space<vmem>>, vector<4x128xf32>
    %cst = arith.constant dense<0.000000e+00> : vector<2x8x128xf32>
    %3 = tpu.matmul %0, %2, %cst {dimension_numbers = #tpu.dot_dimension_numbers<[2], [0], [0, 1], [1], [0, 0, 0, 1, 1, 1], [], []>} : vector<2x8x4xf32>, vector<4x128xf32>, vector<2x8x128xf32> -> vector<2x8x128xf32>
    %c0_6 = arith.constant 0 : index
    %c0_7 = arith.constant 0 : index
    %4 = vector.load %arg3[%c0_6, %c0_7] : memref<1x128xf32, #tpu.memory_space<vmem>>, vector<1x128xf32>
    %5 = vector.shape_cast %4 : vector<1x128xf32> to vector<1x1x128xf32>
    %6 = vector.broadcast %5 : vector<1x1x128xf32> to vector<2x8x128xf32>
    %7 = arith.addf %3, %6 : vector<2x8x128xf32>
    %c0_8 = arith.constant 0 : index
    %c0_9 = arith.constant 0 : index
    %8 = vector.load %arg4[%c0_8, %c0_9] : memref<32x128xf32, #tpu.memory_space<vmem>>, vector<32x128xf32>
    %c0_10 = arith.constant 0 : index
    %c0_11 = arith.constant 0 : index
    %9 = vector.load %arg5[%c0_10, %c0_11] : memref<32x128xf32, #tpu.memory_space<vmem>>, vector<32x128xf32>
    %c0_12 = arith.constant 0 : index
    %c0_13 = arith.constant 0 : index
    %10 = vector.load %arg6[%c0_12, %c0_13] : memref<1x128xf32, #tpu.memory_space<vmem>>, vector<1x128xf32>
    %11 = vector.shape_cast %10 : vector<1x128xf32> to vector<1x128xf32>
    %12 = vector.broadcast %11 : vector<1x128xf32> to vector<2x128xf32>
    %cst_14 = arith.constant 0.000000e+00 : f32
    %13 = vector.broadcast %cst_14 : f32 to vector<2x32xf32>
    %14 = vector.extract_strided_slice %7 {offsets = [0, 0, 0], sizes = [2, 1, 128], strides = [1, 1, 1]} : vector<2x8x128xf32> to vector<2x1x128xf32>
    %15 = vector.shape_cast %14 : vector<2x1x128xf32> to vector<2x128xf32>
    %cst_15 = arith.constant dense<0.000000e+00> : vector<2x128xf32>
    %16 = tpu.matmul %13, %1, %cst_15 {dimension_numbers = #tpu.dot_dimension_numbers<[1], [0], [0], [1], [0, 0, 1, 1], [], []>} : vector<2x32xf32>, vector<32x128xf32>, vector<2x128xf32> -> vector<2x128xf32>
    %17 = arith.addf %15, %16 : vector<2x128xf32>
    %18 = arith.negf %17 : vector<2x128xf32>
    %19 = math.exp %18 : vector<2x128xf32>
    %cst_16 = arith.constant 1.000000e+00 : f32
    %20 = vector.broadcast %cst_16 : f32 to vector<2x128xf32>
    %21 = arith.addf %20, %19 : vector<2x128xf32>
    %22 = arith.divf %20, %21 : vector<2x128xf32>
    %23 = math.tanh %17 : vector<2x128xf32>
    %24 = vector.extract_strided_slice %22 {offsets = [0, 0], sizes = [2, 32], strides = [1, 1]} : vector<2x128xf32> to vector<2x32xf32>
    %25 = vector.extract_strided_slice %22 {offsets = [0, 32], sizes = [2, 32], strides = [1, 1]} : vector<2x128xf32> to vector<2x32xf32>
    %26 = vector.extract_strided_slice %23 {offsets = [0, 64], sizes = [2, 32], strides = [1, 1]} : vector<2x128xf32> to vector<2x32xf32>
    %27 = vector.extract_strided_slice %22 {offsets = [0, 96], sizes = [2, 32], strides = [1, 1]} : vector<2x128xf32> to vector<2x32xf32>
    %28 = arith.mulf %25, %13 : vector<2x32xf32>
    %29 = arith.mulf %24, %26 : vector<2x32xf32>
    %30 = arith.addf %28, %29 : vector<2x32xf32>
    %31 = math.tanh %30 : vector<2x32xf32>
    %32 = arith.mulf %27, %31 : vector<2x32xf32>
    %cst_17 = arith.constant 0.000000e+00 : f32
    %33 = vector.broadcast %cst_17 : f32 to vector<2x32xf32>
    %34 = arith.maximumf %32, %33 : vector<2x32xf32>
    %cst_18 = arith.constant dense<0.000000e+00> : vector<2x128xf32>
    %35 = tpu.matmul %34, %8, %cst_18 {dimension_numbers = #tpu.dot_dimension_numbers<[1], [0], [0], [1], [0, 0, 1, 1], [], []>} : vector<2x32xf32>, vector<32x128xf32>, vector<2x128xf32> -> vector<2x128xf32>
    %cst_19 = arith.constant dense<0.000000e+00> : vector<2x128xf32>
    %36 = tpu.matmul %13, %9, %cst_19 {dimension_numbers = #tpu.dot_dimension_numbers<[1], [0], [0], [1], [0, 0, 1, 1], [], []>} : vector<2x32xf32>, vector<32x128xf32>, vector<2x128xf32> -> vector<2x128xf32>
    %37 = arith.addf %35, %36 : vector<2x128xf32>
    %38 = arith.addf %37, %12 : vector<2x128xf32>
    %39 = arith.negf %38 : vector<2x128xf32>
    %40 = math.exp %39 : vector<2x128xf32>
    %cst_20 = arith.constant 1.000000e+00 : f32
    %41 = vector.broadcast %cst_20 : f32 to vector<2x128xf32>
    %42 = arith.addf %41, %40 : vector<2x128xf32>
    %43 = arith.divf %41, %42 : vector<2x128xf32>
    %44 = math.tanh %38 : vector<2x128xf32>
    %45 = vector.extract_strided_slice %43 {offsets = [0, 0], sizes = [2, 32], strides = [1, 1]} : vector<2x128xf32> to vector<2x32xf32>
    %46 = vector.extract_strided_slice %43 {offsets = [0, 32], sizes = [2, 32], strides = [1, 1]} : vector<2x128xf32> to vector<2x32xf32>
    %47 = vector.extract_strided_slice %44 {offsets = [0, 64], sizes = [2, 32], strides = [1, 1]} : vector<2x128xf32> to vector<2x32xf32>
    %48 = vector.extract_strided_slice %43 {offsets = [0, 96], sizes = [2, 32], strides = [1, 1]} : vector<2x128xf32> to vector<2x32xf32>
    %49 = arith.mulf %46, %13 : vector<2x32xf32>
    %50 = arith.mulf %45, %47 : vector<2x32xf32>
    %51 = arith.addf %49, %50 : vector<2x32xf32>
    %52 = math.tanh %51 : vector<2x32xf32>
    %53 = arith.mulf %48, %52 : vector<2x32xf32>
    %54 = vector.extract_strided_slice %7 {offsets = [0, 1, 0], sizes = [2, 1, 128], strides = [1, 1, 1]} : vector<2x8x128xf32> to vector<2x1x128xf32>
    %55 = vector.shape_cast %54 : vector<2x1x128xf32> to vector<2x128xf32>
    %cst_21 = arith.constant dense<0.000000e+00> : vector<2x128xf32>
    %56 = tpu.matmul %32, %1, %cst_21 {dimension_numbers = #tpu.dot_dimension_numbers<[1], [0], [0], [1], [0, 0, 1, 1], [], []>} : vector<2x32xf32>, vector<32x128xf32>, vector<2x128xf32> -> vector<2x128xf32>
    %57 = arith.addf %55, %56 : vector<2x128xf32>
    %58 = arith.negf %57 : vector<2x128xf32>
    %59 = math.exp %58 : vector<2x128xf32>
    %cst_22 = arith.constant 1.000000e+00 : f32
    %60 = vector.broadcast %cst_22 : f32 to vector<2x128xf32>
    %61 = arith.addf %60, %59 : vector<2x128xf32>
    %62 = arith.divf %60, %61 : vector<2x128xf32>
    %63 = math.tanh %57 : vector<2x128xf32>
    %64 = vector.extract_strided_slice %62 {offsets = [0, 0], sizes = [2, 32], strides = [1, 1]} : vector<2x128xf32> to vector<2x32xf32>
    %65 = vector.extract_strided_slice %62 {offsets = [0, 32], sizes = [2, 32], strides = [1, 1]} : vector<2x128xf32> to vector<2x32xf32>
    %66 = vector.extract_strided_slice %63 {offsets = [0, 64], sizes = [2, 32], strides = [1, 1]} : vector<2x128xf32> to vector<2x32xf32>
    %67 = vector.extract_strided_slice %62 {offsets = [0, 96], sizes = [2, 32], strides = [1, 1]} : vector<2x128xf32> to vector<2x32xf32>
    %68 = arith.mulf %65, %30 : vector<2x32xf32>
    %69 = arith.mulf %64, %66 : vector<2x32xf32>
    %70 = arith.addf %68, %69 : vector<2x32xf32>
    %71 = math.tanh %70 : vector<2x32xf32>
    %72 = arith.mulf %67, %71 : vector<2x32xf32>
    %cst_23 = arith.constant 0.000000e+00 : f32
    %73 = vector.broadcast %cst_23 : f32 to vector<2x32xf32>
    %74 = arith.maximumf %72, %73 : vector<2x32xf32>
    %cst_24 = arith.constant dense<0.000000e+00> : vector<2x128xf32>
    %75 = tpu.matmul %74, %8, %cst_24 {dimension_numbers = #tpu.dot_dimension_numbers<[1], [0], [0], [1], [0, 0, 1, 1], [], []>} : vector<2x32xf32>, vector<32x128xf32>, vector<2x128xf32> -> vector<2x128xf32>
    %cst_25 = arith.constant dense<0.000000e+00> : vector<2x128xf32>
    %76 = tpu.matmul %53, %9, %cst_25 {dimension_numbers = #tpu.dot_dimension_numbers<[1], [0], [0], [1], [0, 0, 1, 1], [], []>} : vector<2x32xf32>, vector<32x128xf32>, vector<2x128xf32> -> vector<2x128xf32>
    %77 = arith.addf %75, %76 : vector<2x128xf32>
    %78 = arith.addf %77, %12 : vector<2x128xf32>
    %79 = arith.negf %78 : vector<2x128xf32>
    %80 = math.exp %79 : vector<2x128xf32>
    %cst_26 = arith.constant 1.000000e+00 : f32
    %81 = vector.broadcast %cst_26 : f32 to vector<2x128xf32>
    %82 = arith.addf %81, %80 : vector<2x128xf32>
    %83 = arith.divf %81, %82 : vector<2x128xf32>
    %84 = math.tanh %78 : vector<2x128xf32>
    %85 = vector.extract_strided_slice %83 {offsets = [0, 0], sizes = [2, 32], strides = [1, 1]} : vector<2x128xf32> to vector<2x32xf32>
    %86 = vector.extract_strided_slice %83 {offsets = [0, 32], sizes = [2, 32], strides = [1, 1]} : vector<2x128xf32> to vector<2x32xf32>
    %87 = vector.extract_strided_slice %84 {offsets = [0, 64], sizes = [2, 32], strides = [1, 1]} : vector<2x128xf32> to vector<2x32xf32>
    %88 = vector.extract_strided_slice %83 {offsets = [0, 96], sizes = [2, 32], strides = [1, 1]} : vector<2x128xf32> to vector<2x32xf32>
    %89 = arith.mulf %86, %51 : vector<2x32xf32>
    %90 = arith.mulf %85, %87 : vector<2x32xf32>
    %91 = arith.addf %89, %90 : vector<2x32xf32>
    %92 = math.tanh %91 : vector<2x32xf32>
    %93 = arith.mulf %88, %92 : vector<2x32xf32>
    %94 = vector.extract_strided_slice %7 {offsets = [0, 2, 0], sizes = [2, 1, 128], strides = [1, 1, 1]} : vector<2x8x128xf32> to vector<2x1x128xf32>
    %95 = vector.shape_cast %94 : vector<2x1x128xf32> to vector<2x128xf32>
    %cst_27 = arith.constant dense<0.000000e+00> : vector<2x128xf32>
    %96 = tpu.matmul %72, %1, %cst_27 {dimension_numbers = #tpu.dot_dimension_numbers<[1], [0], [0], [1], [0, 0, 1, 1], [], []>} : vector<2x32xf32>, vector<32x128xf32>, vector<2x128xf32> -> vector<2x128xf32>
    %97 = arith.addf %95, %96 : vector<2x128xf32>
    %98 = arith.negf %97 : vector<2x128xf32>
    %99 = math.exp %98 : vector<2x128xf32>
    %cst_28 = arith.constant 1.000000e+00 : f32
    %100 = vector.broadcast %cst_28 : f32 to vector<2x128xf32>
    %101 = arith.addf %100, %99 : vector<2x128xf32>
    %102 = arith.divf %100, %101 : vector<2x128xf32>
    %103 = math.tanh %97 : vector<2x128xf32>
    %104 = vector.extract_strided_slice %102 {offsets = [0, 0], sizes = [2, 32], strides = [1, 1]} : vector<2x128xf32> to vector<2x32xf32>
    %105 = vector.extract_strided_slice %102 {offsets = [0, 32], sizes = [2, 32], strides = [1, 1]} : vector<2x128xf32> to vector<2x32xf32>
    %106 = vector.extract_strided_slice %103 {offsets = [0, 64], sizes = [2, 32], strides = [1, 1]} : vector<2x128xf32> to vector<2x32xf32>
    %107 = vector.extract_strided_slice %102 {offsets = [0, 96], sizes = [2, 32], strides = [1, 1]} : vector<2x128xf32> to vector<2x32xf32>
    %108 = arith.mulf %105, %70 : vector<2x32xf32>
    %109 = arith.mulf %104, %106 : vector<2x32xf32>
    %110 = arith.addf %108, %109 : vector<2x32xf32>
    %111 = math.tanh %110 : vector<2x32xf32>
    %112 = arith.mulf %107, %111 : vector<2x32xf32>
    %cst_29 = arith.constant 0.000000e+00 : f32
    %113 = vector.broadcast %cst_29 : f32 to vector<2x32xf32>
    %114 = arith.maximumf %112, %113 : vector<2x32xf32>
    %cst_30 = arith.constant dense<0.000000e+00> : vector<2x128xf32>
    %115 = tpu.matmul %114, %8, %cst_30 {dimension_numbers = #tpu.dot_dimension_numbers<[1], [0], [0], [1], [0, 0, 1, 1], [], []>} : vector<2x32xf32>, vector<32x128xf32>, vector<2x128xf32> -> vector<2x128xf32>
    %cst_31 = arith.constant dense<0.000000e+00> : vector<2x128xf32>
    %116 = tpu.matmul %93, %9, %cst_31 {dimension_numbers = #tpu.dot_dimension_numbers<[1], [0], [0], [1], [0, 0, 1, 1], [], []>} : vector<2x32xf32>, vector<32x128xf32>, vector<2x128xf32> -> vector<2x128xf32>
    %117 = arith.addf %115, %116 : vector<2x128xf32>
    %118 = arith.addf %117, %12 : vector<2x128xf32>
    %119 = arith.negf %118 : vector<2x128xf32>
    %120 = math.exp %119 : vector<2x128xf32>
    %cst_32 = arith.constant 1.000000e+00 : f32
    %121 = vector.broadcast %cst_32 : f32 to vector<2x128xf32>
    %122 = arith.addf %121, %120 : vector<2x128xf32>
    %123 = arith.divf %121, %122 : vector<2x128xf32>
    %124 = math.tanh %118 : vector<2x128xf32>
    %125 = vector.extract_strided_slice %123 {offsets = [0, 0], sizes = [2, 32], strides = [1, 1]} : vector<2x128xf32> to vector<2x32xf32>
    %126 = vector.extract_strided_slice %123 {offsets = [0, 32], sizes = [2, 32], strides = [1, 1]} : vector<2x128xf32> to vector<2x32xf32>
    %127 = vector.extract_strided_slice %124 {offsets = [0, 64], sizes = [2, 32], strides = [1, 1]} : vector<2x128xf32> to vector<2x32xf32>
    %128 = vector.extract_strided_slice %123 {offsets = [0, 96], sizes = [2, 32], strides = [1, 1]} : vector<2x128xf32> to vector<2x32xf32>
    %129 = arith.mulf %126, %91 : vector<2x32xf32>
    %130 = arith.mulf %125, %127 : vector<2x32xf32>
    %131 = arith.addf %129, %130 : vector<2x32xf32>
    %132 = math.tanh %131 : vector<2x32xf32>
    %133 = arith.mulf %128, %132 : vector<2x32xf32>
    %134 = vector.extract_strided_slice %7 {offsets = [0, 3, 0], sizes = [2, 1, 128], strides = [1, 1, 1]} : vector<2x8x128xf32> to vector<2x1x128xf32>
    %135 = vector.shape_cast %134 : vector<2x1x128xf32> to vector<2x128xf32>
    %cst_33 = arith.constant dense<0.000000e+00> : vector<2x128xf32>
    %136 = tpu.matmul %112, %1, %cst_33 {dimension_numbers = #tpu.dot_dimension_numbers<[1], [0], [0], [1], [0, 0, 1, 1], [], []>} : vector<2x32xf32>, vector<32x128xf32>, vector<2x128xf32> -> vector<2x128xf32>
    %137 = arith.addf %135, %136 : vector<2x128xf32>
    %138 = arith.negf %137 : vector<2x128xf32>
    %139 = math.exp %138 : vector<2x128xf32>
    %cst_34 = arith.constant 1.000000e+00 : f32
    %140 = vector.broadcast %cst_34 : f32 to vector<2x128xf32>
    %141 = arith.addf %140, %139 : vector<2x128xf32>
    %142 = arith.divf %140, %141 : vector<2x128xf32>
    %143 = math.tanh %137 : vector<2x128xf32>
    %144 = vector.extract_strided_slice %142 {offsets = [0, 0], sizes = [2, 32], strides = [1, 1]} : vector<2x128xf32> to vector<2x32xf32>
    %145 = vector.extract_strided_slice %142 {offsets = [0, 32], sizes = [2, 32], strides = [1, 1]} : vector<2x128xf32> to vector<2x32xf32>
    %146 = vector.extract_strided_slice %143 {offsets = [0, 64], sizes = [2, 32], strides = [1, 1]} : vector<2x128xf32> to vector<2x32xf32>
    %147 = vector.extract_strided_slice %142 {offsets = [0, 96], sizes = [2, 32], strides = [1, 1]} : vector<2x128xf32> to vector<2x32xf32>
    %148 = arith.mulf %145, %110 : vector<2x32xf32>
    %149 = arith.mulf %144, %146 : vector<2x32xf32>
    %150 = arith.addf %148, %149 : vector<2x32xf32>
    %151 = math.tanh %150 : vector<2x32xf32>
    %152 = arith.mulf %147, %151 : vector<2x32xf32>
    %cst_35 = arith.constant 0.000000e+00 : f32
    %153 = vector.broadcast %cst_35 : f32 to vector<2x32xf32>
    %154 = arith.maximumf %152, %153 : vector<2x32xf32>
    %cst_36 = arith.constant dense<0.000000e+00> : vector<2x128xf32>
    %155 = tpu.matmul %154, %8, %cst_36 {dimension_numbers = #tpu.dot_dimension_numbers<[1], [0], [0], [1], [0, 0, 1, 1], [], []>} : vector<2x32xf32>, vector<32x128xf32>, vector<2x128xf32> -> vector<2x128xf32>
    %cst_37 = arith.constant dense<0.000000e+00> : vector<2x128xf32>
    %156 = tpu.matmul %133, %9, %cst_37 {dimension_numbers = #tpu.dot_dimension_numbers<[1], [0], [0], [1], [0, 0, 1, 1], [], []>} : vector<2x32xf32>, vector<32x128xf32>, vector<2x128xf32> -> vector<2x128xf32>
    %157 = arith.addf %155, %156 : vector<2x128xf32>
    %158 = arith.addf %157, %12 : vector<2x128xf32>
    %159 = arith.negf %158 : vector<2x128xf32>
    %160 = math.exp %159 : vector<2x128xf32>
    %cst_38 = arith.constant 1.000000e+00 : f32
    %161 = vector.broadcast %cst_38 : f32 to vector<2x128xf32>
    %162 = arith.addf %161, %160 : vector<2x128xf32>
    %163 = arith.divf %161, %162 : vector<2x128xf32>
    %164 = math.tanh %158 : vector<2x128xf32>
    %165 = vector.extract_strided_slice %163 {offsets = [0, 0], sizes = [2, 32], strides = [1, 1]} : vector<2x128xf32> to vector<2x32xf32>
    %166 = vector.extract_strided_slice %163 {offsets = [0, 32], sizes = [2, 32], strides = [1, 1]} : vector<2x128xf32> to vector<2x32xf32>
    %167 = vector.extract_strided_slice %164 {offsets = [0, 64], sizes = [2, 32], strides = [1, 1]} : vector<2x128xf32> to vector<2x32xf32>
    %168 = vector.extract_strided_slice %163 {offsets = [0, 96], sizes = [2, 32], strides = [1, 1]} : vector<2x128xf32> to vector<2x32xf32>
    %169 = arith.mulf %166, %131 : vector<2x32xf32>
    %170 = arith.mulf %165, %167 : vector<2x32xf32>
    %171 = arith.addf %169, %170 : vector<2x32xf32>
    %172 = math.tanh %171 : vector<2x32xf32>
    %173 = arith.mulf %168, %172 : vector<2x32xf32>
    %174 = vector.extract_strided_slice %7 {offsets = [0, 4, 0], sizes = [2, 1, 128], strides = [1, 1, 1]} : vector<2x8x128xf32> to vector<2x1x128xf32>
    %175 = vector.shape_cast %174 : vector<2x1x128xf32> to vector<2x128xf32>
    %cst_39 = arith.constant dense<0.000000e+00> : vector<2x128xf32>
    %176 = tpu.matmul %152, %1, %cst_39 {dimension_numbers = #tpu.dot_dimension_numbers<[1], [0], [0], [1], [0, 0, 1, 1], [], []>} : vector<2x32xf32>, vector<32x128xf32>, vector<2x128xf32> -> vector<2x128xf32>
    %177 = arith.addf %175, %176 : vector<2x128xf32>
    %178 = arith.negf %177 : vector<2x128xf32>
    %179 = math.exp %178 : vector<2x128xf32>
    %cst_40 = arith.constant 1.000000e+00 : f32
    %180 = vector.broadcast %cst_40 : f32 to vector<2x128xf32>
    %181 = arith.addf %180, %179 : vector<2x128xf32>
    %182 = arith.divf %180, %181 : vector<2x128xf32>
    %183 = math.tanh %177 : vector<2x128xf32>
    %184 = vector.extract_strided_slice %182 {offsets = [0, 0], sizes = [2, 32], strides = [1, 1]} : vector<2x128xf32> to vector<2x32xf32>
    %185 = vector.extract_strided_slice %182 {offsets = [0, 32], sizes = [2, 32], strides = [1, 1]} : vector<2x128xf32> to vector<2x32xf32>
    %186 = vector.extract_strided_slice %183 {offsets = [0, 64], sizes = [2, 32], strides = [1, 1]} : vector<2x128xf32> to vector<2x32xf32>
    %187 = vector.extract_strided_slice %182 {offsets = [0, 96], sizes = [2, 32], strides = [1, 1]} : vector<2x128xf32> to vector<2x32xf32>
    %188 = arith.mulf %185, %150 : vector<2x32xf32>
    %189 = arith.mulf %184, %186 : vector<2x32xf32>
    %190 = arith.addf %188, %189 : vector<2x32xf32>
    %191 = math.tanh %190 : vector<2x32xf32>
    %192 = arith.mulf %187, %191 : vector<2x32xf32>
    %cst_41 = arith.constant 0.000000e+00 : f32
    %193 = vector.broadcast %cst_41 : f32 to vector<2x32xf32>
    %194 = arith.maximumf %192, %193 : vector<2x32xf32>
    %cst_42 = arith.constant dense<0.000000e+00> : vector<2x128xf32>
    %195 = tpu.matmul %194, %8, %cst_42 {dimension_numbers = #tpu.dot_dimension_numbers<[1], [0], [0], [1], [0, 0, 1, 1], [], []>} : vector<2x32xf32>, vector<32x128xf32>, vector<2x128xf32> -> vector<2x128xf32>
    %cst_43 = arith.constant dense<0.000000e+00> : vector<2x128xf32>
    %196 = tpu.matmul %173, %9, %cst_43 {dimension_numbers = #tpu.dot_dimension_numbers<[1], [0], [0], [1], [0, 0, 1, 1], [], []>} : vector<2x32xf32>, vector<32x128xf32>, vector<2x128xf32> -> vector<2x128xf32>
    %197 = arith.addf %195, %196 : vector<2x128xf32>
    %198 = arith.addf %197, %12 : vector<2x128xf32>
    %199 = arith.negf %198 : vector<2x128xf32>
    %200 = math.exp %199 : vector<2x128xf32>
    %cst_44 = arith.constant 1.000000e+00 : f32
    %201 = vector.broadcast %cst_44 : f32 to vector<2x128xf32>
    %202 = arith.addf %201, %200 : vector<2x128xf32>
    %203 = arith.divf %201, %202 : vector<2x128xf32>
    %204 = math.tanh %198 : vector<2x128xf32>
    %205 = vector.extract_strided_slice %203 {offsets = [0, 0], sizes = [2, 32], strides = [1, 1]} : vector<2x128xf32> to vector<2x32xf32>
    %206 = vector.extract_strided_slice %203 {offsets = [0, 32], sizes = [2, 32], strides = [1, 1]} : vector<2x128xf32> to vector<2x32xf32>
    %207 = vector.extract_strided_slice %204 {offsets = [0, 64], sizes = [2, 32], strides = [1, 1]} : vector<2x128xf32> to vector<2x32xf32>
    %208 = vector.extract_strided_slice %203 {offsets = [0, 96], sizes = [2, 32], strides = [1, 1]} : vector<2x128xf32> to vector<2x32xf32>
    %209 = arith.mulf %206, %171 : vector<2x32xf32>
    %210 = arith.mulf %205, %207 : vector<2x32xf32>
    %211 = arith.addf %209, %210 : vector<2x32xf32>
    %212 = math.tanh %211 : vector<2x32xf32>
    %213 = arith.mulf %208, %212 : vector<2x32xf32>
    %214 = vector.extract_strided_slice %7 {offsets = [0, 5, 0], sizes = [2, 1, 128], strides = [1, 1, 1]} : vector<2x8x128xf32> to vector<2x1x128xf32>
    %215 = vector.shape_cast %214 : vector<2x1x128xf32> to vector<2x128xf32>
    %cst_45 = arith.constant dense<0.000000e+00> : vector<2x128xf32>
    %216 = tpu.matmul %192, %1, %cst_45 {dimension_numbers = #tpu.dot_dimension_numbers<[1], [0], [0], [1], [0, 0, 1, 1], [], []>} : vector<2x32xf32>, vector<32x128xf32>, vector<2x128xf32> -> vector<2x128xf32>
    %217 = arith.addf %215, %216 : vector<2x128xf32>
    %218 = arith.negf %217 : vector<2x128xf32>
    %219 = math.exp %218 : vector<2x128xf32>
    %cst_46 = arith.constant 1.000000e+00 : f32
    %220 = vector.broadcast %cst_46 : f32 to vector<2x128xf32>
    %221 = arith.addf %220, %219 : vector<2x128xf32>
    %222 = arith.divf %220, %221 : vector<2x128xf32>
    %223 = math.tanh %217 : vector<2x128xf32>
    %224 = vector.extract_strided_slice %222 {offsets = [0, 0], sizes = [2, 32], strides = [1, 1]} : vector<2x128xf32> to vector<2x32xf32>
    %225 = vector.extract_strided_slice %222 {offsets = [0, 32], sizes = [2, 32], strides = [1, 1]} : vector<2x128xf32> to vector<2x32xf32>
    %226 = vector.extract_strided_slice %223 {offsets = [0, 64], sizes = [2, 32], strides = [1, 1]} : vector<2x128xf32> to vector<2x32xf32>
    %227 = vector.extract_strided_slice %222 {offsets = [0, 96], sizes = [2, 32], strides = [1, 1]} : vector<2x128xf32> to vector<2x32xf32>
    %228 = arith.mulf %225, %190 : vector<2x32xf32>
    %229 = arith.mulf %224, %226 : vector<2x32xf32>
    %230 = arith.addf %228, %229 : vector<2x32xf32>
    %231 = math.tanh %230 : vector<2x32xf32>
    %232 = arith.mulf %227, %231 : vector<2x32xf32>
    %cst_47 = arith.constant 0.000000e+00 : f32
    %233 = vector.broadcast %cst_47 : f32 to vector<2x32xf32>
    %234 = arith.maximumf %232, %233 : vector<2x32xf32>
    %cst_48 = arith.constant dense<0.000000e+00> : vector<2x128xf32>
    %235 = tpu.matmul %234, %8, %cst_48 {dimension_numbers = #tpu.dot_dimension_numbers<[1], [0], [0], [1], [0, 0, 1, 1], [], []>} : vector<2x32xf32>, vector<32x128xf32>, vector<2x128xf32> -> vector<2x128xf32>
    %cst_49 = arith.constant dense<0.000000e+00> : vector<2x128xf32>
    %236 = tpu.matmul %213, %9, %cst_49 {dimension_numbers = #tpu.dot_dimension_numbers<[1], [0], [0], [1], [0, 0, 1, 1], [], []>} : vector<2x32xf32>, vector<32x128xf32>, vector<2x128xf32> -> vector<2x128xf32>
    %237 = arith.addf %235, %236 : vector<2x128xf32>
    %238 = arith.addf %237, %12 : vector<2x128xf32>
    %239 = arith.negf %238 : vector<2x128xf32>
    %240 = math.exp %239 : vector<2x128xf32>
    %cst_50 = arith.constant 1.000000e+00 : f32
    %241 = vector.broadcast %cst_50 : f32 to vector<2x128xf32>
    %242 = arith.addf %241, %240 : vector<2x128xf32>
    %243 = arith.divf %241, %242 : vector<2x128xf32>
    %244 = math.tanh %238 : vector<2x128xf32>
    %245 = vector.extract_strided_slice %243 {offsets = [0, 0], sizes = [2, 32], strides = [1, 1]} : vector<2x128xf32> to vector<2x32xf32>
    %246 = vector.extract_strided_slice %243 {offsets = [0, 32], sizes = [2, 32], strides = [1, 1]} : vector<2x128xf32> to vector<2x32xf32>
    %247 = vector.extract_strided_slice %244 {offsets = [0, 64], sizes = [2, 32], strides = [1, 1]} : vector<2x128xf32> to vector<2x32xf32>
    %248 = vector.extract_strided_slice %243 {offsets = [0, 96], sizes = [2, 32], strides = [1, 1]} : vector<2x128xf32> to vector<2x32xf32>
    %249 = arith.mulf %246, %211 : vector<2x32xf32>
    %250 = arith.mulf %245, %247 : vector<2x32xf32>
    %251 = arith.addf %249, %250 : vector<2x32xf32>
    %252 = math.tanh %251 : vector<2x32xf32>
    %253 = arith.mulf %248, %252 : vector<2x32xf32>
    %254 = vector.extract_strided_slice %7 {offsets = [0, 6, 0], sizes = [2, 1, 128], strides = [1, 1, 1]} : vector<2x8x128xf32> to vector<2x1x128xf32>
    %255 = vector.shape_cast %254 : vector<2x1x128xf32> to vector<2x128xf32>
    %cst_51 = arith.constant dense<0.000000e+00> : vector<2x128xf32>
    %256 = tpu.matmul %232, %1, %cst_51 {dimension_numbers = #tpu.dot_dimension_numbers<[1], [0], [0], [1], [0, 0, 1, 1], [], []>} : vector<2x32xf32>, vector<32x128xf32>, vector<2x128xf32> -> vector<2x128xf32>
    %257 = arith.addf %255, %256 : vector<2x128xf32>
    %258 = arith.negf %257 : vector<2x128xf32>
    %259 = math.exp %258 : vector<2x128xf32>
    %cst_52 = arith.constant 1.000000e+00 : f32
    %260 = vector.broadcast %cst_52 : f32 to vector<2x128xf32>
    %261 = arith.addf %260, %259 : vector<2x128xf32>
    %262 = arith.divf %260, %261 : vector<2x128xf32>
    %263 = math.tanh %257 : vector<2x128xf32>
    %264 = vector.extract_strided_slice %262 {offsets = [0, 0], sizes = [2, 32], strides = [1, 1]} : vector<2x128xf32> to vector<2x32xf32>
    %265 = vector.extract_strided_slice %262 {offsets = [0, 32], sizes = [2, 32], strides = [1, 1]} : vector<2x128xf32> to vector<2x32xf32>
    %266 = vector.extract_strided_slice %263 {offsets = [0, 64], sizes = [2, 32], strides = [1, 1]} : vector<2x128xf32> to vector<2x32xf32>
    %267 = vector.extract_strided_slice %262 {offsets = [0, 96], sizes = [2, 32], strides = [1, 1]} : vector<2x128xf32> to vector<2x32xf32>
    %268 = arith.mulf %265, %230 : vector<2x32xf32>
    %269 = arith.mulf %264, %266 : vector<2x32xf32>
    %270 = arith.addf %268, %269 : vector<2x32xf32>
    %271 = math.tanh %270 : vector<2x32xf32>
    %272 = arith.mulf %267, %271 : vector<2x32xf32>
    %cst_53 = arith.constant 0.000000e+00 : f32
    %273 = vector.broadcast %cst_53 : f32 to vector<2x32xf32>
    %274 = arith.maximumf %272, %273 : vector<2x32xf32>
    %cst_54 = arith.constant dense<0.000000e+00> : vector<2x128xf32>
    %275 = tpu.matmul %274, %8, %cst_54 {dimension_numbers = #tpu.dot_dimension_numbers<[1], [0], [0], [1], [0, 0, 1, 1], [], []>} : vector<2x32xf32>, vector<32x128xf32>, vector<2x128xf32> -> vector<2x128xf32>
    %cst_55 = arith.constant dense<0.000000e+00> : vector<2x128xf32>
    %276 = tpu.matmul %253, %9, %cst_55 {dimension_numbers = #tpu.dot_dimension_numbers<[1], [0], [0], [1], [0, 0, 1, 1], [], []>} : vector<2x32xf32>, vector<32x128xf32>, vector<2x128xf32> -> vector<2x128xf32>
    %277 = arith.addf %275, %276 : vector<2x128xf32>
    %278 = arith.addf %277, %12 : vector<2x128xf32>
    %279 = arith.negf %278 : vector<2x128xf32>
    %280 = math.exp %279 : vector<2x128xf32>
    %cst_56 = arith.constant 1.000000e+00 : f32
    %281 = vector.broadcast %cst_56 : f32 to vector<2x128xf32>
    %282 = arith.addf %281, %280 : vector<2x128xf32>
    %283 = arith.divf %281, %282 : vector<2x128xf32>
    %284 = math.tanh %278 : vector<2x128xf32>
    %285 = vector.extract_strided_slice %283 {offsets = [0, 0], sizes = [2, 32], strides = [1, 1]} : vector<2x128xf32> to vector<2x32xf32>
    %286 = vector.extract_strided_slice %283 {offsets = [0, 32], sizes = [2, 32], strides = [1, 1]} : vector<2x128xf32> to vector<2x32xf32>
    %287 = vector.extract_strided_slice %284 {offsets = [0, 64], sizes = [2, 32], strides = [1, 1]} : vector<2x128xf32> to vector<2x32xf32>
    %288 = vector.extract_strided_slice %283 {offsets = [0, 96], sizes = [2, 32], strides = [1, 1]} : vector<2x128xf32> to vector<2x32xf32>
    %289 = arith.mulf %286, %251 : vector<2x32xf32>
    %290 = arith.mulf %285, %287 : vector<2x32xf32>
    %291 = arith.addf %289, %290 : vector<2x32xf32>
    %292 = math.tanh %291 : vector<2x32xf32>
    %293 = arith.mulf %288, %292 : vector<2x32xf32>
    %294 = vector.extract_strided_slice %7 {offsets = [0, 7, 0], sizes = [2, 1, 128], strides = [1, 1, 1]} : vector<2x8x128xf32> to vector<2x1x128xf32>
    %295 = vector.shape_cast %294 : vector<2x1x128xf32> to vector<2x128xf32>
    %cst_57 = arith.constant dense<0.000000e+00> : vector<2x128xf32>
    %296 = tpu.matmul %272, %1, %cst_57 {dimension_numbers = #tpu.dot_dimension_numbers<[1], [0], [0], [1], [0, 0, 1, 1], [], []>} : vector<2x32xf32>, vector<32x128xf32>, vector<2x128xf32> -> vector<2x128xf32>
    %297 = arith.addf %295, %296 : vector<2x128xf32>
    %298 = arith.negf %297 : vector<2x128xf32>
    %299 = math.exp %298 : vector<2x128xf32>
    %cst_58 = arith.constant 1.000000e+00 : f32
    %300 = vector.broadcast %cst_58 : f32 to vector<2x128xf32>
    %301 = arith.addf %300, %299 : vector<2x128xf32>
    %302 = arith.divf %300, %301 : vector<2x128xf32>
    %303 = math.tanh %297 : vector<2x128xf32>
    %304 = vector.extract_strided_slice %302 {offsets = [0, 0], sizes = [2, 32], strides = [1, 1]} : vector<2x128xf32> to vector<2x32xf32>
    %305 = vector.extract_strided_slice %302 {offsets = [0, 32], sizes = [2, 32], strides = [1, 1]} : vector<2x128xf32> to vector<2x32xf32>
    %306 = vector.extract_strided_slice %303 {offsets = [0, 64], sizes = [2, 32], strides = [1, 1]} : vector<2x128xf32> to vector<2x32xf32>
    %307 = vector.extract_strided_slice %302 {offsets = [0, 96], sizes = [2, 32], strides = [1, 1]} : vector<2x128xf32> to vector<2x32xf32>
    %308 = arith.mulf %305, %270 : vector<2x32xf32>
    %309 = arith.mulf %304, %306 : vector<2x32xf32>
    %310 = arith.addf %308, %309 : vector<2x32xf32>
    %311 = math.tanh %310 : vector<2x32xf32>
    %312 = arith.mulf %307, %311 : vector<2x32xf32>
    %cst_59 = arith.constant 0.000000e+00 : f32
    %313 = vector.broadcast %cst_59 : f32 to vector<2x32xf32>
    %314 = arith.maximumf %312, %313 : vector<2x32xf32>
    %cst_60 = arith.constant dense<0.000000e+00> : vector<2x128xf32>
    %315 = tpu.matmul %314, %8, %cst_60 {dimension_numbers = #tpu.dot_dimension_numbers<[1], [0], [0], [1], [0, 0, 1, 1], [], []>} : vector<2x32xf32>, vector<32x128xf32>, vector<2x128xf32> -> vector<2x128xf32>
    %cst_61 = arith.constant dense<0.000000e+00> : vector<2x128xf32>
    %316 = tpu.matmul %293, %9, %cst_61 {dimension_numbers = #tpu.dot_dimension_numbers<[1], [0], [0], [1], [0, 0, 1, 1], [], []>} : vector<2x32xf32>, vector<32x128xf32>, vector<2x128xf32> -> vector<2x128xf32>
    %317 = arith.addf %315, %316 : vector<2x128xf32>
    %318 = arith.addf %317, %12 : vector<2x128xf32>
    %319 = arith.negf %318 : vector<2x128xf32>
    %320 = math.exp %319 : vector<2x128xf32>
    %cst_62 = arith.constant 1.000000e+00 : f32
    %321 = vector.broadcast %cst_62 : f32 to vector<2x128xf32>
    %322 = arith.addf %321, %320 : vector<2x128xf32>
    %323 = arith.divf %321, %322 : vector<2x128xf32>
    %324 = math.tanh %318 : vector<2x128xf32>
    %325 = vector.extract_strided_slice %323 {offsets = [0, 0], sizes = [2, 32], strides = [1, 1]} : vector<2x128xf32> to vector<2x32xf32>
    %326 = vector.extract_strided_slice %323 {offsets = [0, 32], sizes = [2, 32], strides = [1, 1]} : vector<2x128xf32> to vector<2x32xf32>
    %327 = vector.extract_strided_slice %324 {offsets = [0, 64], sizes = [2, 32], strides = [1, 1]} : vector<2x128xf32> to vector<2x32xf32>
    %328 = vector.extract_strided_slice %323 {offsets = [0, 96], sizes = [2, 32], strides = [1, 1]} : vector<2x128xf32> to vector<2x32xf32>
    %329 = arith.mulf %326, %291 : vector<2x32xf32>
    %330 = arith.mulf %325, %327 : vector<2x32xf32>
    %331 = arith.addf %329, %330 : vector<2x32xf32>
    %332 = math.tanh %331 : vector<2x32xf32>
    %333 = arith.mulf %328, %332 : vector<2x32xf32>
    %c0_63 = arith.constant 0 : index
    %c0_64 = arith.constant 0 : index
    %334 = vector.load %arg8[%c0_63, %c0_64] : memref<32x128xf32, #tpu.memory_space<vmem>>, vector<32x128xf32>
    %c0_65 = arith.constant 0 : index
    %c0_66 = arith.constant 0 : index
    %335 = vector.load %arg7[%c0_65, %c0_66] : memref<32x128xf32, #tpu.memory_space<vmem>>, vector<32x128xf32>
    %cst_67 = arith.constant dense<0.000000e+00> : vector<2x128xf32>
    %336 = tpu.matmul %333, %335, %cst_67 {dimension_numbers = #tpu.dot_dimension_numbers<[1], [0], [0], [1], [0, 0, 1, 1], [], []>} : vector<2x32xf32>, vector<32x128xf32>, vector<2x128xf32> -> vector<2x128xf32>
    %c0_68 = arith.constant 0 : index
    %c0_69 = arith.constant 0 : index
    %337 = vector.load %arg9[%c0_68, %c0_69] : memref<1x128xf32, #tpu.memory_space<vmem>>, vector<1x128xf32>
    %338 = vector.broadcast %337 : vector<1x128xf32> to vector<2x128xf32>
    %339 = arith.addf %336, %338 : vector<2x128xf32>
    %340 = vector.extract_strided_slice %339 {offsets = [0, 0], sizes = [1, 128], strides = [1, 1]} : vector<2x128xf32> to vector<1x128xf32>
    %341 = vector.shape_cast %340 : vector<1x128xf32> to vector<1x128xf32>
    %342 = vector.broadcast %341 : vector<1x128xf32> to vector<2x128xf32>
    %343 = vector.extract_strided_slice %339 {offsets = [1, 0], sizes = [1, 128], strides = [1, 1]} : vector<2x128xf32> to vector<1x128xf32>
    %344 = vector.shape_cast %343 : vector<1x128xf32> to vector<1x128xf32>
    %345 = vector.broadcast %344 : vector<1x128xf32> to vector<2x128xf32>
    %346 = tpu.iota {dimensions = array<i32: 0>} : vector<2x128xi32>
    %c0_70 = arith.constant 0 : index
    %c0_71 = arith.constant 0 : index
    %347 = vector.load %arg10[%c0_70, %c0_71] : memref<32x128xf32, #tpu.memory_space<vmem>>, vector<32x128xf32>
    %c0_72 = arith.constant 0 : index
    %c0_73 = arith.constant 0 : index
    %348 = vector.load %arg11[%c0_72, %c0_73] : memref<32x128xf32, #tpu.memory_space<vmem>>, vector<32x128xf32>
    %c0_74 = arith.constant 0 : index
    %c0_75 = arith.constant 0 : index
    %349 = vector.load %arg12[%c0_74, %c0_75] : memref<1x128xf32, #tpu.memory_space<vmem>>, vector<1x128xf32>
    %350 = vector.shape_cast %349 : vector<1x128xf32> to vector<1x128xf32>
    %351 = vector.broadcast %350 : vector<1x128xf32> to vector<2x128xf32>
    %c0_76 = arith.constant 0 : index
    %c0_77 = arith.constant 0 : index
    %352 = vector.load %arg13[%c0_76, %c0_77] : memref<32x4xf32, #tpu.memory_space<vmem>>, vector<32x4xf32>
    %c0_78 = arith.constant 0 : index
    %c0_79 = arith.constant 0 : index
    %353 = vector.load %arg14[%c0_78, %c0_79] : memref<1x4xf32, #tpu.memory_space<vmem>>, vector<1x4xf32>
    %354 = vector.shape_cast %353 : vector<1x4xf32> to vector<1x4xf32>
    %355 = vector.broadcast %354 : vector<1x4xf32> to vector<2x4xf32>
    %c8_i32 = arith.constant 8 : i32
    %356 = vector.broadcast %c8_i32 : i32 to vector<2x128xi32>
    %357 = arith.muli %346, %356 : vector<2x128xi32>
    %c0_i32 = arith.constant 0 : i32
    %358 = vector.broadcast %c0_i32 : i32 to vector<2x128xi32>
    %359 = arith.addi %357, %358 : vector<2x128xi32>
    %c2_i32 = arith.constant 2 : i32
    %c0_i32_80 = arith.constant 0 : i32
    %360 = arith.cmpi eq, %c2_i32, %c0_i32_80 : i32
    %c1_i32 = arith.constant 1 : i32
    %361 = arith.select %360, %c1_i32, %c2_i32 : i32
    %362 = vector.broadcast %361 : i32 to vector<2x128xi32>
    %363 = arith.remsi %359, %362 : vector<2x128xi32>
    %c0_i32_81 = arith.constant 0 : i32
    %364 = vector.broadcast %c0_i32_81 : i32 to vector<2x128xi32>
    %365 = arith.cmpi ne, %363, %364 : vector<2x128xi32>
    %c0_i32_82 = arith.constant 0 : i32
    %366 = vector.broadcast %c0_i32_82 : i32 to vector<2x128xi32>
    %367 = arith.cmpi slt, %363, %366 : vector<2x128xi32>
    %c0_i32_83 = arith.constant 0 : i32
    %368 = arith.cmpi slt, %361, %c0_i32_83 : i32
    %369 = vector.broadcast %368 : i1 to vector<2x128xi1>
    %370 = vector.broadcast %369 : vector<2x128xi1> to vector<2x128xi1>
    %371 = arith.xori %367, %370 : vector<2x128xi1>
    %372 = arith.andi %371, %365 : vector<2x128xi1>
    %373 = vector.broadcast %361 : i32 to vector<2x128xi32>
    %374 = arith.addi %363, %373 : vector<2x128xi32>
    %375 = arith.select %372, %374, %363 : vector<2x128xi1>, vector<2x128xi32>
    %c1_i32_84 = arith.constant 1 : i32
    %376 = vector.broadcast %c1_i32_84 : i32 to vector<2x128xi32>
    %377 = arith.cmpi eq, %375, %376 : vector<2x128xi32>
    %378 = arith.select %377, %345, %342 : vector<2x128xi1>, vector<2x128xf32>
    %cst_85 = arith.constant dense<0.000000e+00> : vector<2x128xf32>
    %379 = tpu.matmul %13, %334, %cst_85 {dimension_numbers = #tpu.dot_dimension_numbers<[1], [0], [0], [1], [0, 0, 1, 1], [], []>} : vector<2x32xf32>, vector<32x128xf32>, vector<2x128xf32> -> vector<2x128xf32>
    %380 = arith.addf %378, %379 : vector<2x128xf32>
    %381 = arith.negf %380 : vector<2x128xf32>
    %382 = math.exp %381 : vector<2x128xf32>
    %cst_86 = arith.constant 1.000000e+00 : f32
    %383 = vector.broadcast %cst_86 : f32 to vector<2x128xf32>
    %384 = arith.addf %383, %382 : vector<2x128xf32>
    %385 = arith.divf %383, %384 : vector<2x128xf32>
    %386 = math.tanh %380 : vector<2x128xf32>
    %387 = vector.extract_strided_slice %385 {offsets = [0, 0], sizes = [2, 32], strides = [1, 1]} : vector<2x128xf32> to vector<2x32xf32>
    %388 = vector.extract_strided_slice %385 {offsets = [0, 32], sizes = [2, 32], strides = [1, 1]} : vector<2x128xf32> to vector<2x32xf32>
    %389 = vector.extract_strided_slice %386 {offsets = [0, 64], sizes = [2, 32], strides = [1, 1]} : vector<2x128xf32> to vector<2x32xf32>
    %390 = vector.extract_strided_slice %385 {offsets = [0, 96], sizes = [2, 32], strides = [1, 1]} : vector<2x128xf32> to vector<2x32xf32>
    %391 = arith.mulf %388, %13 : vector<2x32xf32>
    %392 = arith.mulf %387, %389 : vector<2x32xf32>
    %393 = arith.addf %391, %392 : vector<2x32xf32>
    %394 = math.tanh %393 : vector<2x32xf32>
    %395 = arith.mulf %390, %394 : vector<2x32xf32>
    %cst_87 = arith.constant 0.000000e+00 : f32
    %396 = vector.broadcast %cst_87 : f32 to vector<2x32xf32>
    %397 = arith.maximumf %395, %396 : vector<2x32xf32>
    %cst_88 = arith.constant dense<0.000000e+00> : vector<2x128xf32>
    %398 = tpu.matmul %397, %347, %cst_88 {dimension_numbers = #tpu.dot_dimension_numbers<[1], [0], [0], [1], [0, 0, 1, 1], [], []>} : vector<2x32xf32>, vector<32x128xf32>, vector<2x128xf32> -> vector<2x128xf32>
    %cst_89 = arith.constant dense<0.000000e+00> : vector<2x128xf32>
    %399 = tpu.matmul %13, %348, %cst_89 {dimension_numbers = #tpu.dot_dimension_numbers<[1], [0], [0], [1], [0, 0, 1, 1], [], []>} : vector<2x32xf32>, vector<32x128xf32>, vector<2x128xf32> -> vector<2x128xf32>
    %400 = arith.addf %398, %399 : vector<2x128xf32>
    %401 = arith.addf %400, %351 : vector<2x128xf32>
    %402 = arith.negf %401 : vector<2x128xf32>
    %403 = math.exp %402 : vector<2x128xf32>
    %cst_90 = arith.constant 1.000000e+00 : f32
    %404 = vector.broadcast %cst_90 : f32 to vector<2x128xf32>
    %405 = arith.addf %404, %403 : vector<2x128xf32>
    %406 = arith.divf %404, %405 : vector<2x128xf32>
    %407 = math.tanh %401 : vector<2x128xf32>
    %408 = vector.extract_strided_slice %406 {offsets = [0, 0], sizes = [2, 32], strides = [1, 1]} : vector<2x128xf32> to vector<2x32xf32>
    %409 = vector.extract_strided_slice %406 {offsets = [0, 32], sizes = [2, 32], strides = [1, 1]} : vector<2x128xf32> to vector<2x32xf32>
    %410 = vector.extract_strided_slice %407 {offsets = [0, 64], sizes = [2, 32], strides = [1, 1]} : vector<2x128xf32> to vector<2x32xf32>
    %411 = vector.extract_strided_slice %406 {offsets = [0, 96], sizes = [2, 32], strides = [1, 1]} : vector<2x128xf32> to vector<2x32xf32>
    %412 = arith.mulf %409, %13 : vector<2x32xf32>
    %413 = arith.mulf %408, %410 : vector<2x32xf32>
    %414 = arith.addf %412, %413 : vector<2x32xf32>
    %415 = math.tanh %414 : vector<2x32xf32>
    %416 = arith.mulf %411, %415 : vector<2x32xf32>
    %cst_91 = arith.constant dense<0.000000e+00> : vector<2x4xf32>
    %417 = tpu.matmul %416, %352, %cst_91 {dimension_numbers = #tpu.dot_dimension_numbers<[1], [0], [0], [1], [0, 0, 1, 1], [], []>} : vector<2x32xf32>, vector<32x4xf32>, vector<2x4xf32> -> vector<2x4xf32>
    %418 = arith.addf %417, %355 : vector<2x4xf32>
    %c0_92 = arith.constant 0 : index
    %c0_93 = arith.constant 0 : index
    %c0_94 = arith.constant 0 : index
    %419 = vector.load %arg15[%c0_92, %c0_93, %c0_94] : memref<2x8x4xf32, #tpu.memory_space<vmem>>, vector<2x1x4xf32>
    %420 = vector.shape_cast %419 : vector<2x1x4xf32> to vector<2x4xf32>
    %421 = vector.shape_cast %418 : vector<2x4xf32> to vector<2x1x4xf32>
    tpu.vector_store %arg15[%c0_92, %c0_93, %c0_94], %421 {strides = array<i32>} : memref<2x8x4xf32, #tpu.memory_space<vmem>>, vector<2x1x4xf32>,
    %c8_i32_95 = arith.constant 8 : i32
    %422 = vector.broadcast %c8_i32_95 : i32 to vector<2x128xi32>
    %423 = arith.muli %346, %422 : vector<2x128xi32>
    %c1_i32_96 = arith.constant 1 : i32
    %424 = vector.broadcast %c1_i32_96 : i32 to vector<2x128xi32>
    %425 = arith.addi %423, %424 : vector<2x128xi32>
    %c2_i32_97 = arith.constant 2 : i32
    %c0_i32_98 = arith.constant 0 : i32
    %426 = arith.cmpi eq, %c2_i32_97, %c0_i32_98 : i32
    %c1_i32_99 = arith.constant 1 : i32
    %427 = arith.select %426, %c1_i32_99, %c2_i32_97 : i32
    %428 = vector.broadcast %427 : i32 to vector<2x128xi32>
    %429 = arith.remsi %425, %428 : vector<2x128xi32>
    %c0_i32_100 = arith.constant 0 : i32
    %430 = vector.broadcast %c0_i32_100 : i32 to vector<2x128xi32>
    %431 = arith.cmpi ne, %429, %430 : vector<2x128xi32>
    %c0_i32_101 = arith.constant 0 : i32
    %432 = vector.broadcast %c0_i32_101 : i32 to vector<2x128xi32>
    %433 = arith.cmpi slt, %429, %432 : vector<2x128xi32>
    %c0_i32_102 = arith.constant 0 : i32
    %434 = arith.cmpi slt, %427, %c0_i32_102 : i32
    %435 = vector.broadcast %434 : i1 to vector<2x128xi1>
    %436 = vector.broadcast %435 : vector<2x128xi1> to vector<2x128xi1>
    %437 = arith.xori %433, %436 : vector<2x128xi1>
    %438 = arith.andi %437, %431 : vector<2x128xi1>
    %439 = vector.broadcast %427 : i32 to vector<2x128xi32>
    %440 = arith.addi %429, %439 : vector<2x128xi32>
    %441 = arith.select %438, %440, %429 : vector<2x128xi1>, vector<2x128xi32>
    %c1_i32_103 = arith.constant 1 : i32
    %442 = vector.broadcast %c1_i32_103 : i32 to vector<2x128xi32>
    %443 = arith.cmpi eq, %441, %442 : vector<2x128xi32>
    %444 = arith.select %443, %345, %342 : vector<2x128xi1>, vector<2x128xf32>
    %cst_104 = arith.constant dense<0.000000e+00> : vector<2x128xf32>
    %445 = tpu.matmul %395, %334, %cst_104 {dimension_numbers = #tpu.dot_dimension_numbers<[1], [0], [0], [1], [0, 0, 1, 1], [], []>} : vector<2x32xf32>, vector<32x128xf32>, vector<2x128xf32> -> vector<2x128xf32>
    %446 = arith.addf %444, %445 : vector<2x128xf32>
    %447 = arith.negf %446 : vector<2x128xf32>
    %448 = math.exp %447 : vector<2x128xf32>
    %cst_105 = arith.constant 1.000000e+00 : f32
    %449 = vector.broadcast %cst_105 : f32 to vector<2x128xf32>
    %450 = arith.addf %449, %448 : vector<2x128xf32>
    %451 = arith.divf %449, %450 : vector<2x128xf32>
    %452 = math.tanh %446 : vector<2x128xf32>
    %453 = vector.extract_strided_slice %451 {offsets = [0, 0], sizes = [2, 32], strides = [1, 1]} : vector<2x128xf32> to vector<2x32xf32>
    %454 = vector.extract_strided_slice %451 {offsets = [0, 32], sizes = [2, 32], strides = [1, 1]} : vector<2x128xf32> to vector<2x32xf32>
    %455 = vector.extract_strided_slice %452 {offsets = [0, 64], sizes = [2, 32], strides = [1, 1]} : vector<2x128xf32> to vector<2x32xf32>
    %456 = vector.extract_strided_slice %451 {offsets = [0, 96], sizes = [2, 32], strides = [1, 1]} : vector<2x128xf32> to vector<2x32xf32>
    %457 = arith.mulf %454, %393 : vector<2x32xf32>
    %458 = arith.mulf %453, %455 : vector<2x32xf32>
    %459 = arith.addf %457, %458 : vector<2x32xf32>
    %460 = math.tanh %459 : vector<2x32xf32>
    %461 = arith.mulf %456, %460 : vector<2x32xf32>
    %cst_106 = arith.constant 0.000000e+00 : f32
    %462 = vector.broadcast %cst_106 : f32 to vector<2x32xf32>
    %463 = arith.maximumf %461, %462 : vector<2x32xf32>
    %cst_107 = arith.constant dense<0.000000e+00> : vector<2x128xf32>
    %464 = tpu.matmul %463, %347, %cst_107 {dimension_numbers = #tpu.dot_dimension_numbers<[1], [0], [0], [1], [0, 0, 1, 1], [], []>} : vector<2x32xf32>, vector<32x128xf32>, vector<2x128xf32> -> vector<2x128xf32>
    %cst_108 = arith.constant dense<0.000000e+00> : vector<2x128xf32>
    %465 = tpu.matmul %416, %348, %cst_108 {dimension_numbers = #tpu.dot_dimension_numbers<[1], [0], [0], [1], [0, 0, 1, 1], [], []>} : vector<2x32xf32>, vector<32x128xf32>, vector<2x128xf32> -> vector<2x128xf32>
    %466 = arith.addf %464, %465 : vector<2x128xf32>
    %467 = arith.addf %466, %351 : vector<2x128xf32>
    %468 = arith.negf %467 : vector<2x128xf32>
    %469 = math.exp %468 : vector<2x128xf32>
    %cst_109 = arith.constant 1.000000e+00 : f32
    %470 = vector.broadcast %cst_109 : f32 to vector<2x128xf32>
    %471 = arith.addf %470, %469 : vector<2x128xf32>
    %472 = arith.divf %470, %471 : vector<2x128xf32>
    %473 = math.tanh %467 : vector<2x128xf32>
    %474 = vector.extract_strided_slice %472 {offsets = [0, 0], sizes = [2, 32], strides = [1, 1]} : vector<2x128xf32> to vector<2x32xf32>
    %475 = vector.extract_strided_slice %472 {offsets = [0, 32], sizes = [2, 32], strides = [1, 1]} : vector<2x128xf32> to vector<2x32xf32>
    %476 = vector.extract_strided_slice %473 {offsets = [0, 64], sizes = [2, 32], strides = [1, 1]} : vector<2x128xf32> to vector<2x32xf32>
    %477 = vector.extract_strided_slice %472 {offsets = [0, 96], sizes = [2, 32], strides = [1, 1]} : vector<2x128xf32> to vector<2x32xf32>
    %478 = arith.mulf %475, %414 : vector<2x32xf32>
    %479 = arith.mulf %474, %476 : vector<2x32xf32>
    %480 = arith.addf %478, %479 : vector<2x32xf32>
    %481 = math.tanh %480 : vector<2x32xf32>
    %482 = arith.mulf %477, %481 : vector<2x32xf32>
    %cst_110 = arith.constant dense<0.000000e+00> : vector<2x4xf32>
    %483 = tpu.matmul %482, %352, %cst_110 {dimension_numbers = #tpu.dot_dimension_numbers<[1], [0], [0], [1], [0, 0, 1, 1], [], []>} : vector<2x32xf32>, vector<32x4xf32>, vector<2x4xf32> -> vector<2x4xf32>
    %484 = arith.addf %483, %355 : vector<2x4xf32>
    %c0_111 = arith.constant 0 : index
    %c1 = arith.constant 1 : index
    %c0_112 = arith.constant 0 : index
    %485 = vector.load %arg15[%c0_111, %c1, %c0_112] : memref<2x8x4xf32, #tpu.memory_space<vmem>>, vector<2x1x4xf32>
    %486 = vector.shape_cast %485 : vector<2x1x4xf32> to vector<2x4xf32>
    %487 = vector.shape_cast %484 : vector<2x4xf32> to vector<2x1x4xf32>
    tpu.vector_store %arg15[%c0_111, %c1, %c0_112], %487 {strides = array<i32>} : memref<2x8x4xf32, #tpu.memory_space<vmem>>, vector<2x1x4xf32>,
    %c8_i32_113 = arith.constant 8 : i32
    %488 = vector.broadcast %c8_i32_113 : i32 to vector<2x128xi32>
    %489 = arith.muli %346, %488 : vector<2x128xi32>
    %c2_i32_114 = arith.constant 2 : i32
    %490 = vector.broadcast %c2_i32_114 : i32 to vector<2x128xi32>
    %491 = arith.addi %489, %490 : vector<2x128xi32>
    %c2_i32_115 = arith.constant 2 : i32
    %c0_i32_116 = arith.constant 0 : i32
    %492 = arith.cmpi eq, %c2_i32_115, %c0_i32_116 : i32
    %c1_i32_117 = arith.constant 1 : i32
    %493 = arith.select %492, %c1_i32_117, %c2_i32_115 : i32
    %494 = vector.broadcast %493 : i32 to vector<2x128xi32>
    %495 = arith.remsi %491, %494 : vector<2x128xi32>
    %c0_i32_118 = arith.constant 0 : i32
    %496 = vector.broadcast %c0_i32_118 : i32 to vector<2x128xi32>
    %497 = arith.cmpi ne, %495, %496 : vector<2x128xi32>
    %c0_i32_119 = arith.constant 0 : i32
    %498 = vector.broadcast %c0_i32_119 : i32 to vector<2x128xi32>
    %499 = arith.cmpi slt, %495, %498 : vector<2x128xi32>
    %c0_i32_120 = arith.constant 0 : i32
    %500 = arith.cmpi slt, %493, %c0_i32_120 : i32
    %501 = vector.broadcast %500 : i1 to vector<2x128xi1>
    %502 = vector.broadcast %501 : vector<2x128xi1> to vector<2x128xi1>
    %503 = arith.xori %499, %502 : vector<2x128xi1>
    %504 = arith.andi %503, %497 : vector<2x128xi1>
    %505 = vector.broadcast %493 : i32 to vector<2x128xi32>
    %506 = arith.addi %495, %505 : vector<2x128xi32>
    %507 = arith.select %504, %506, %495 : vector<2x128xi1>, vector<2x128xi32>
    %c1_i32_121 = arith.constant 1 : i32
    %508 = vector.broadcast %c1_i32_121 : i32 to vector<2x128xi32>
    %509 = arith.cmpi eq, %507, %508 : vector<2x128xi32>
    %510 = arith.select %509, %345, %342 : vector<2x128xi1>, vector<2x128xf32>
    %cst_122 = arith.constant dense<0.000000e+00> : vector<2x128xf32>
    %511 = tpu.matmul %461, %334, %cst_122 {dimension_numbers = #tpu.dot_dimension_numbers<[1], [0], [0], [1], [0, 0, 1, 1], [], []>} : vector<2x32xf32>, vector<32x128xf32>, vector<2x128xf32> -> vector<2x128xf32>
    %512 = arith.addf %510, %511 : vector<2x128xf32>
    %513 = arith.negf %512 : vector<2x128xf32>
    %514 = math.exp %513 : vector<2x128xf32>
    %cst_123 = arith.constant 1.000000e+00 : f32
    %515 = vector.broadcast %cst_123 : f32 to vector<2x128xf32>
    %516 = arith.addf %515, %514 : vector<2x128xf32>
    %517 = arith.divf %515, %516 : vector<2x128xf32>
    %518 = math.tanh %512 : vector<2x128xf32>
    %519 = vector.extract_strided_slice %517 {offsets = [0, 0], sizes = [2, 32], strides = [1, 1]} : vector<2x128xf32> to vector<2x32xf32>
    %520 = vector.extract_strided_slice %517 {offsets = [0, 32], sizes = [2, 32], strides = [1, 1]} : vector<2x128xf32> to vector<2x32xf32>
    %521 = vector.extract_strided_slice %518 {offsets = [0, 64], sizes = [2, 32], strides = [1, 1]} : vector<2x128xf32> to vector<2x32xf32>
    %522 = vector.extract_strided_slice %517 {offsets = [0, 96], sizes = [2, 32], strides = [1, 1]} : vector<2x128xf32> to vector<2x32xf32>
    %523 = arith.mulf %520, %459 : vector<2x32xf32>
    %524 = arith.mulf %519, %521 : vector<2x32xf32>
    %525 = arith.addf %523, %524 : vector<2x32xf32>
    %526 = math.tanh %525 : vector<2x32xf32>
    %527 = arith.mulf %522, %526 : vector<2x32xf32>
    %cst_124 = arith.constant 0.000000e+00 : f32
    %528 = vector.broadcast %cst_124 : f32 to vector<2x32xf32>
    %529 = arith.maximumf %527, %528 : vector<2x32xf32>
    %cst_125 = arith.constant dense<0.000000e+00> : vector<2x128xf32>
    %530 = tpu.matmul %529, %347, %cst_125 {dimension_numbers = #tpu.dot_dimension_numbers<[1], [0], [0], [1], [0, 0, 1, 1], [], []>} : vector<2x32xf32>, vector<32x128xf32>, vector<2x128xf32> -> vector<2x128xf32>
    %cst_126 = arith.constant dense<0.000000e+00> : vector<2x128xf32>
    %531 = tpu.matmul %482, %348, %cst_126 {dimension_numbers = #tpu.dot_dimension_numbers<[1], [0], [0], [1], [0, 0, 1, 1], [], []>} : vector<2x32xf32>, vector<32x128xf32>, vector<2x128xf32> -> vector<2x128xf32>
    %532 = arith.addf %530, %531 : vector<2x128xf32>
    %533 = arith.addf %532, %351 : vector<2x128xf32>
    %534 = arith.negf %533 : vector<2x128xf32>
    %535 = math.exp %534 : vector<2x128xf32>
    %cst_127 = arith.constant 1.000000e+00 : f32
    %536 = vector.broadcast %cst_127 : f32 to vector<2x128xf32>
    %537 = arith.addf %536, %535 : vector<2x128xf32>
    %538 = arith.divf %536, %537 : vector<2x128xf32>
    %539 = math.tanh %533 : vector<2x128xf32>
    %540 = vector.extract_strided_slice %538 {offsets = [0, 0], sizes = [2, 32], strides = [1, 1]} : vector<2x128xf32> to vector<2x32xf32>
    %541 = vector.extract_strided_slice %538 {offsets = [0, 32], sizes = [2, 32], strides = [1, 1]} : vector<2x128xf32> to vector<2x32xf32>
    %542 = vector.extract_strided_slice %539 {offsets = [0, 64], sizes = [2, 32], strides = [1, 1]} : vector<2x128xf32> to vector<2x32xf32>
    %543 = vector.extract_strided_slice %538 {offsets = [0, 96], sizes = [2, 32], strides = [1, 1]} : vector<2x128xf32> to vector<2x32xf32>
    %544 = arith.mulf %541, %480 : vector<2x32xf32>
    %545 = arith.mulf %540, %542 : vector<2x32xf32>
    %546 = arith.addf %544, %545 : vector<2x32xf32>
    %547 = math.tanh %546 : vector<2x32xf32>
    %548 = arith.mulf %543, %547 : vector<2x32xf32>
    %cst_128 = arith.constant dense<0.000000e+00> : vector<2x4xf32>
    %549 = tpu.matmul %548, %352, %cst_128 {dimension_numbers = #tpu.dot_dimension_numbers<[1], [0], [0], [1], [0, 0, 1, 1], [], []>} : vector<2x32xf32>, vector<32x4xf32>, vector<2x4xf32> -> vector<2x4xf32>
    %550 = arith.addf %549, %355 : vector<2x4xf32>
    %c0_129 = arith.constant 0 : index
    %c2 = arith.constant 2 : index
    %c0_130 = arith.constant 0 : index
    %551 = vector.load %arg15[%c0_129, %c2, %c0_130] : memref<2x8x4xf32, #tpu.memory_space<vmem>>, vector<2x1x4xf32>
    %552 = vector.shape_cast %551 : vector<2x1x4xf32> to vector<2x4xf32>
    %553 = vector.shape_cast %550 : vector<2x4xf32> to vector<2x1x4xf32>
    tpu.vector_store %arg15[%c0_129, %c2, %c0_130], %553 {strides = array<i32>} : memref<2x8x4xf32, #tpu.memory_space<vmem>>, vector<2x1x4xf32>,
    %c8_i32_131 = arith.constant 8 : i32
    %554 = vector.broadcast %c8_i32_131 : i32 to vector<2x128xi32>
    %555 = arith.muli %346, %554 : vector<2x128xi32>
    %c3_i32 = arith.constant 3 : i32
    %556 = vector.broadcast %c3_i32 : i32 to vector<2x128xi32>
    %557 = arith.addi %555, %556 : vector<2x128xi32>
    %c2_i32_132 = arith.constant 2 : i32
    %c0_i32_133 = arith.constant 0 : i32
    %558 = arith.cmpi eq, %c2_i32_132, %c0_i32_133 : i32
    %c1_i32_134 = arith.constant 1 : i32
    %559 = arith.select %558, %c1_i32_134, %c2_i32_132 : i32
    %560 = vector.broadcast %559 : i32 to vector<2x128xi32>
    %561 = arith.remsi %557, %560 : vector<2x128xi32>
    %c0_i32_135 = arith.constant 0 : i32
    %562 = vector.broadcast %c0_i32_135 : i32 to vector<2x128xi32>
    %563 = arith.cmpi ne, %561, %562 : vector<2x128xi32>
    %c0_i32_136 = arith.constant 0 : i32
    %564 = vector.broadcast %c0_i32_136 : i32 to vector<2x128xi32>
    %565 = arith.cmpi slt, %561, %564 : vector<2x128xi32>
    %c0_i32_137 = arith.constant 0 : i32
    %566 = arith.cmpi slt, %559, %c0_i32_137 : i32
    %567 = vector.broadcast %566 : i1 to vector<2x128xi1>
    %568 = vector.broadcast %567 : vector<2x128xi1> to vector<2x128xi1>
    %569 = arith.xori %565, %568 : vector<2x128xi1>
    %570 = arith.andi %569, %563 : vector<2x128xi1>
    %571 = vector.broadcast %559 : i32 to vector<2x128xi32>
    %572 = arith.addi %561, %571 : vector<2x128xi32>
    %573 = arith.select %570, %572, %561 : vector<2x128xi1>, vector<2x128xi32>
    %c1_i32_138 = arith.constant 1 : i32
    %574 = vector.broadcast %c1_i32_138 : i32 to vector<2x128xi32>
    %575 = arith.cmpi eq, %573, %574 : vector<2x128xi32>
    %576 = arith.select %575, %345, %342 : vector<2x128xi1>, vector<2x128xf32>
    %cst_139 = arith.constant dense<0.000000e+00> : vector<2x128xf32>
    %577 = tpu.matmul %527, %334, %cst_139 {dimension_numbers = #tpu.dot_dimension_numbers<[1], [0], [0], [1], [0, 0, 1, 1], [], []>} : vector<2x32xf32>, vector<32x128xf32>, vector<2x128xf32> -> vector<2x128xf32>
    %578 = arith.addf %576, %577 : vector<2x128xf32>
    %579 = arith.negf %578 : vector<2x128xf32>
    %580 = math.exp %579 : vector<2x128xf32>
    %cst_140 = arith.constant 1.000000e+00 : f32
    %581 = vector.broadcast %cst_140 : f32 to vector<2x128xf32>
    %582 = arith.addf %581, %580 : vector<2x128xf32>
    %583 = arith.divf %581, %582 : vector<2x128xf32>
    %584 = math.tanh %578 : vector<2x128xf32>
    %585 = vector.extract_strided_slice %583 {offsets = [0, 0], sizes = [2, 32], strides = [1, 1]} : vector<2x128xf32> to vector<2x32xf32>
    %586 = vector.extract_strided_slice %583 {offsets = [0, 32], sizes = [2, 32], strides = [1, 1]} : vector<2x128xf32> to vector<2x32xf32>
    %587 = vector.extract_strided_slice %584 {offsets = [0, 64], sizes = [2, 32], strides = [1, 1]} : vector<2x128xf32> to vector<2x32xf32>
    %588 = vector.extract_strided_slice %583 {offsets = [0, 96], sizes = [2, 32], strides = [1, 1]} : vector<2x128xf32> to vector<2x32xf32>
    %589 = arith.mulf %586, %525 : vector<2x32xf32>
    %590 = arith.mulf %585, %587 : vector<2x32xf32>
    %591 = arith.addf %589, %590 : vector<2x32xf32>
    %592 = math.tanh %591 : vector<2x32xf32>
    %593 = arith.mulf %588, %592 : vector<2x32xf32>
    %cst_141 = arith.constant 0.000000e+00 : f32
    %594 = vector.broadcast %cst_141 : f32 to vector<2x32xf32>
    %595 = arith.maximumf %593, %594 : vector<2x32xf32>
    %cst_142 = arith.constant dense<0.000000e+00> : vector<2x128xf32>
    %596 = tpu.matmul %595, %347, %cst_142 {dimension_numbers = #tpu.dot_dimension_numbers<[1], [0], [0], [1], [0, 0, 1, 1], [], []>} : vector<2x32xf32>, vector<32x128xf32>, vector<2x128xf32> -> vector<2x128xf32>
    %cst_143 = arith.constant dense<0.000000e+00> : vector<2x128xf32>
    %597 = tpu.matmul %548, %348, %cst_143 {dimension_numbers = #tpu.dot_dimension_numbers<[1], [0], [0], [1], [0, 0, 1, 1], [], []>} : vector<2x32xf32>, vector<32x128xf32>, vector<2x128xf32> -> vector<2x128xf32>
    %598 = arith.addf %596, %597 : vector<2x128xf32>
    %599 = arith.addf %598, %351 : vector<2x128xf32>
    %600 = arith.negf %599 : vector<2x128xf32>
    %601 = math.exp %600 : vector<2x128xf32>
    %cst_144 = arith.constant 1.000000e+00 : f32
    %602 = vector.broadcast %cst_144 : f32 to vector<2x128xf32>
    %603 = arith.addf %602, %601 : vector<2x128xf32>
    %604 = arith.divf %602, %603 : vector<2x128xf32>
    %605 = math.tanh %599 : vector<2x128xf32>
    %606 = vector.extract_strided_slice %604 {offsets = [0, 0], sizes = [2, 32], strides = [1, 1]} : vector<2x128xf32> to vector<2x32xf32>
    %607 = vector.extract_strided_slice %604 {offsets = [0, 32], sizes = [2, 32], strides = [1, 1]} : vector<2x128xf32> to vector<2x32xf32>
    %608 = vector.extract_strided_slice %605 {offsets = [0, 64], sizes = [2, 32], strides = [1, 1]} : vector<2x128xf32> to vector<2x32xf32>
    %609 = vector.extract_strided_slice %604 {offsets = [0, 96], sizes = [2, 32], strides = [1, 1]} : vector<2x128xf32> to vector<2x32xf32>
    %610 = arith.mulf %607, %546 : vector<2x32xf32>
    %611 = arith.mulf %606, %608 : vector<2x32xf32>
    %612 = arith.addf %610, %611 : vector<2x32xf32>
    %613 = math.tanh %612 : vector<2x32xf32>
    %614 = arith.mulf %609, %613 : vector<2x32xf32>
    %cst_145 = arith.constant dense<0.000000e+00> : vector<2x4xf32>
    %615 = tpu.matmul %614, %352, %cst_145 {dimension_numbers = #tpu.dot_dimension_numbers<[1], [0], [0], [1], [0, 0, 1, 1], [], []>} : vector<2x32xf32>, vector<32x4xf32>, vector<2x4xf32> -> vector<2x4xf32>
    %616 = arith.addf %615, %355 : vector<2x4xf32>
    %c0_146 = arith.constant 0 : index
    %c3 = arith.constant 3 : index
    %c0_147 = arith.constant 0 : index
    %617 = vector.load %arg15[%c0_146, %c3, %c0_147] : memref<2x8x4xf32, #tpu.memory_space<vmem>>, vector<2x1x4xf32>
    %618 = vector.shape_cast %617 : vector<2x1x4xf32> to vector<2x4xf32>
    %619 = vector.shape_cast %616 : vector<2x4xf32> to vector<2x1x4xf32>
    tpu.vector_store %arg15[%c0_146, %c3, %c0_147], %619 {strides = array<i32>} : memref<2x8x4xf32, #tpu.memory_space<vmem>>, vector<2x1x4xf32>,
    %c8_i32_148 = arith.constant 8 : i32
    %620 = vector.broadcast %c8_i32_148 : i32 to vector<2x128xi32>
    %621 = arith.muli %346, %620 : vector<2x128xi32>
    %c4_i32 = arith.constant 4 : i32
    %622 = vector.broadcast %c4_i32 : i32 to vector<2x128xi32>
    %623 = arith.addi %621, %622 : vector<2x128xi32>
    %c2_i32_149 = arith.constant 2 : i32
    %c0_i32_150 = arith.constant 0 : i32
    %624 = arith.cmpi eq, %c2_i32_149, %c0_i32_150 : i32
    %c1_i32_151 = arith.constant 1 : i32
    %625 = arith.select %624, %c1_i32_151, %c2_i32_149 : i32
    %626 = vector.broadcast %625 : i32 to vector<2x128xi32>
    %627 = arith.remsi %623, %626 : vector<2x128xi32>
    %c0_i32_152 = arith.constant 0 : i32
    %628 = vector.broadcast %c0_i32_152 : i32 to vector<2x128xi32>
    %629 = arith.cmpi ne, %627, %628 : vector<2x128xi32>
    %c0_i32_153 = arith.constant 0 : i32
    %630 = vector.broadcast %c0_i32_153 : i32 to vector<2x128xi32>
    %631 = arith.cmpi slt, %627, %630 : vector<2x128xi32>
    %c0_i32_154 = arith.constant 0 : i32
    %632 = arith.cmpi slt, %625, %c0_i32_154 : i32
    %633 = vector.broadcast %632 : i1 to vector<2x128xi1>
    %634 = vector.broadcast %633 : vector<2x128xi1> to vector<2x128xi1>
    %635 = arith.xori %631, %634 : vector<2x128xi1>
    %636 = arith.andi %635, %629 : vector<2x128xi1>
    %637 = vector.broadcast %625 : i32 to vector<2x128xi32>
    %638 = arith.addi %627, %637 : vector<2x128xi32>
    %639 = arith.select %636, %638, %627 : vector<2x128xi1>, vector<2x128xi32>
    %c1_i32_155 = arith.constant 1 : i32
    %640 = vector.broadcast %c1_i32_155 : i32 to vector<2x128xi32>
    %641 = arith.cmpi eq, %639, %640 : vector<2x128xi32>
    %642 = arith.select %641, %345, %342 : vector<2x128xi1>, vector<2x128xf32>
    %cst_156 = arith.constant dense<0.000000e+00> : vector<2x128xf32>
    %643 = tpu.matmul %593, %334, %cst_156 {dimension_numbers = #tpu.dot_dimension_numbers<[1], [0], [0], [1], [0, 0, 1, 1], [], []>} : vector<2x32xf32>, vector<32x128xf32>, vector<2x128xf32> -> vector<2x128xf32>
    %644 = arith.addf %642, %643 : vector<2x128xf32>
    %645 = arith.negf %644 : vector<2x128xf32>
    %646 = math.exp %645 : vector<2x128xf32>
    %cst_157 = arith.constant 1.000000e+00 : f32
    %647 = vector.broadcast %cst_157 : f32 to vector<2x128xf32>
    %648 = arith.addf %647, %646 : vector<2x128xf32>
    %649 = arith.divf %647, %648 : vector<2x128xf32>
    %650 = math.tanh %644 : vector<2x128xf32>
    %651 = vector.extract_strided_slice %649 {offsets = [0, 0], sizes = [2, 32], strides = [1, 1]} : vector<2x128xf32> to vector<2x32xf32>
    %652 = vector.extract_strided_slice %649 {offsets = [0, 32], sizes = [2, 32], strides = [1, 1]} : vector<2x128xf32> to vector<2x32xf32>
    %653 = vector.extract_strided_slice %650 {offsets = [0, 64], sizes = [2, 32], strides = [1, 1]} : vector<2x128xf32> to vector<2x32xf32>
    %654 = vector.extract_strided_slice %649 {offsets = [0, 96], sizes = [2, 32], strides = [1, 1]} : vector<2x128xf32> to vector<2x32xf32>
    %655 = arith.mulf %652, %591 : vector<2x32xf32>
    %656 = arith.mulf %651, %653 : vector<2x32xf32>
    %657 = arith.addf %655, %656 : vector<2x32xf32>
    %658 = math.tanh %657 : vector<2x32xf32>
    %659 = arith.mulf %654, %658 : vector<2x32xf32>
    %cst_158 = arith.constant 0.000000e+00 : f32
    %660 = vector.broadcast %cst_158 : f32 to vector<2x32xf32>
    %661 = arith.maximumf %659, %660 : vector<2x32xf32>
    %cst_159 = arith.constant dense<0.000000e+00> : vector<2x128xf32>
    %662 = tpu.matmul %661, %347, %cst_159 {dimension_numbers = #tpu.dot_dimension_numbers<[1], [0], [0], [1], [0, 0, 1, 1], [], []>} : vector<2x32xf32>, vector<32x128xf32>, vector<2x128xf32> -> vector<2x128xf32>
    %cst_160 = arith.constant dense<0.000000e+00> : vector<2x128xf32>
    %663 = tpu.matmul %614, %348, %cst_160 {dimension_numbers = #tpu.dot_dimension_numbers<[1], [0], [0], [1], [0, 0, 1, 1], [], []>} : vector<2x32xf32>, vector<32x128xf32>, vector<2x128xf32> -> vector<2x128xf32>
    %664 = arith.addf %662, %663 : vector<2x128xf32>
    %665 = arith.addf %664, %351 : vector<2x128xf32>
    %666 = arith.negf %665 : vector<2x128xf32>
    %667 = math.exp %666 : vector<2x128xf32>
    %cst_161 = arith.constant 1.000000e+00 : f32
    %668 = vector.broadcast %cst_161 : f32 to vector<2x128xf32>
    %669 = arith.addf %668, %667 : vector<2x128xf32>
    %670 = arith.divf %668, %669 : vector<2x128xf32>
    %671 = math.tanh %665 : vector<2x128xf32>
    %672 = vector.extract_strided_slice %670 {offsets = [0, 0], sizes = [2, 32], strides = [1, 1]} : vector<2x128xf32> to vector<2x32xf32>
    %673 = vector.extract_strided_slice %670 {offsets = [0, 32], sizes = [2, 32], strides = [1, 1]} : vector<2x128xf32> to vector<2x32xf32>
    %674 = vector.extract_strided_slice %671 {offsets = [0, 64], sizes = [2, 32], strides = [1, 1]} : vector<2x128xf32> to vector<2x32xf32>
    %675 = vector.extract_strided_slice %670 {offsets = [0, 96], sizes = [2, 32], strides = [1, 1]} : vector<2x128xf32> to vector<2x32xf32>
    %676 = arith.mulf %673, %612 : vector<2x32xf32>
    %677 = arith.mulf %672, %674 : vector<2x32xf32>
    %678 = arith.addf %676, %677 : vector<2x32xf32>
    %679 = math.tanh %678 : vector<2x32xf32>
    %680 = arith.mulf %675, %679 : vector<2x32xf32>
    %cst_162 = arith.constant dense<0.000000e+00> : vector<2x4xf32>
    %681 = tpu.matmul %680, %352, %cst_162 {dimension_numbers = #tpu.dot_dimension_numbers<[1], [0], [0], [1], [0, 0, 1, 1], [], []>} : vector<2x32xf32>, vector<32x4xf32>, vector<2x4xf32> -> vector<2x4xf32>
    %682 = arith.addf %681, %355 : vector<2x4xf32>
    %c0_163 = arith.constant 0 : index
    %c4 = arith.constant 4 : index
    %c0_164 = arith.constant 0 : index
    %683 = vector.load %arg15[%c0_163, %c4, %c0_164] : memref<2x8x4xf32, #tpu.memory_space<vmem>>, vector<2x1x4xf32>
    %684 = vector.shape_cast %683 : vector<2x1x4xf32> to vector<2x4xf32>
    %685 = vector.shape_cast %682 : vector<2x4xf32> to vector<2x1x4xf32>
    tpu.vector_store %arg15[%c0_163, %c4, %c0_164], %685 {strides = array<i32>} : memref<2x8x4xf32, #tpu.memory_space<vmem>>, vector<2x1x4xf32>,
    %c8_i32_165 = arith.constant 8 : i32
    %686 = vector.broadcast %c8_i32_165 : i32 to vector<2x128xi32>
    %687 = arith.muli %346, %686 : vector<2x128xi32>
    %c5_i32 = arith.constant 5 : i32
    %688 = vector.broadcast %c5_i32 : i32 to vector<2x128xi32>
    %689 = arith.addi %687, %688 : vector<2x128xi32>
    %c2_i32_166 = arith.constant 2 : i32
    %c0_i32_167 = arith.constant 0 : i32
    %690 = arith.cmpi eq, %c2_i32_166, %c0_i32_167 : i32
    %c1_i32_168 = arith.constant 1 : i32
    %691 = arith.select %690, %c1_i32_168, %c2_i32_166 : i32
    %692 = vector.broadcast %691 : i32 to vector<2x128xi32>
    %693 = arith.remsi %689, %692 : vector<2x128xi32>
    %c0_i32_169 = arith.constant 0 : i32
    %694 = vector.broadcast %c0_i32_169 : i32 to vector<2x128xi32>
    %695 = arith.cmpi ne, %693, %694 : vector<2x128xi32>
    %c0_i32_170 = arith.constant 0 : i32
    %696 = vector.broadcast %c0_i32_170 : i32 to vector<2x128xi32>
    %697 = arith.cmpi slt, %693, %696 : vector<2x128xi32>
    %c0_i32_171 = arith.constant 0 : i32
    %698 = arith.cmpi slt, %691, %c0_i32_171 : i32
    %699 = vector.broadcast %698 : i1 to vector<2x128xi1>
    %700 = vector.broadcast %699 : vector<2x128xi1> to vector<2x128xi1>
    %701 = arith.xori %697, %700 : vector<2x128xi1>
    %702 = arith.andi %701, %695 : vector<2x128xi1>
    %703 = vector.broadcast %691 : i32 to vector<2x128xi32>
    %704 = arith.addi %693, %703 : vector<2x128xi32>
    %705 = arith.select %702, %704, %693 : vector<2x128xi1>, vector<2x128xi32>
    %c1_i32_172 = arith.constant 1 : i32
    %706 = vector.broadcast %c1_i32_172 : i32 to vector<2x128xi32>
    %707 = arith.cmpi eq, %705, %706 : vector<2x128xi32>
    %708 = arith.select %707, %345, %342 : vector<2x128xi1>, vector<2x128xf32>
    %cst_173 = arith.constant dense<0.000000e+00> : vector<2x128xf32>
    %709 = tpu.matmul %659, %334, %cst_173 {dimension_numbers = #tpu.dot_dimension_numbers<[1], [0], [0], [1], [0, 0, 1, 1], [], []>} : vector<2x32xf32>, vector<32x128xf32>, vector<2x128xf32> -> vector<2x128xf32>
    %710 = arith.addf %708, %709 : vector<2x128xf32>
    %711 = arith.negf %710 : vector<2x128xf32>
    %712 = math.exp %711 : vector<2x128xf32>
    %cst_174 = arith.constant 1.000000e+00 : f32
    %713 = vector.broadcast %cst_174 : f32 to vector<2x128xf32>
    %714 = arith.addf %713, %712 : vector<2x128xf32>
    %715 = arith.divf %713, %714 : vector<2x128xf32>
    %716 = math.tanh %710 : vector<2x128xf32>
    %717 = vector.extract_strided_slice %715 {offsets = [0, 0], sizes = [2, 32], strides = [1, 1]} : vector<2x128xf32> to vector<2x32xf32>
    %718 = vector.extract_strided_slice %715 {offsets = [0, 32], sizes = [2, 32], strides = [1, 1]} : vector<2x128xf32> to vector<2x32xf32>
    %719 = vector.extract_strided_slice %716 {offsets = [0, 64], sizes = [2, 32], strides = [1, 1]} : vector<2x128xf32> to vector<2x32xf32>
    %720 = vector.extract_strided_slice %715 {offsets = [0, 96], sizes = [2, 32], strides = [1, 1]} : vector<2x128xf32> to vector<2x32xf32>
    %721 = arith.mulf %718, %657 : vector<2x32xf32>
    %722 = arith.mulf %717, %719 : vector<2x32xf32>
    %723 = arith.addf %721, %722 : vector<2x32xf32>
    %724 = math.tanh %723 : vector<2x32xf32>
    %725 = arith.mulf %720, %724 : vector<2x32xf32>
    %cst_175 = arith.constant 0.000000e+00 : f32
    %726 = vector.broadcast %cst_175 : f32 to vector<2x32xf32>
    %727 = arith.maximumf %725, %726 : vector<2x32xf32>
    %cst_176 = arith.constant dense<0.000000e+00> : vector<2x128xf32>
    %728 = tpu.matmul %727, %347, %cst_176 {dimension_numbers = #tpu.dot_dimension_numbers<[1], [0], [0], [1], [0, 0, 1, 1], [], []>} : vector<2x32xf32>, vector<32x128xf32>, vector<2x128xf32> -> vector<2x128xf32>
    %cst_177 = arith.constant dense<0.000000e+00> : vector<2x128xf32>
    %729 = tpu.matmul %680, %348, %cst_177 {dimension_numbers = #tpu.dot_dimension_numbers<[1], [0], [0], [1], [0, 0, 1, 1], [], []>} : vector<2x32xf32>, vector<32x128xf32>, vector<2x128xf32> -> vector<2x128xf32>
    %730 = arith.addf %728, %729 : vector<2x128xf32>
    %731 = arith.addf %730, %351 : vector<2x128xf32>
    %732 = arith.negf %731 : vector<2x128xf32>
    %733 = math.exp %732 : vector<2x128xf32>
    %cst_178 = arith.constant 1.000000e+00 : f32
    %734 = vector.broadcast %cst_178 : f32 to vector<2x128xf32>
    %735 = arith.addf %734, %733 : vector<2x128xf32>
    %736 = arith.divf %734, %735 : vector<2x128xf32>
    %737 = math.tanh %731 : vector<2x128xf32>
    %738 = vector.extract_strided_slice %736 {offsets = [0, 0], sizes = [2, 32], strides = [1, 1]} : vector<2x128xf32> to vector<2x32xf32>
    %739 = vector.extract_strided_slice %736 {offsets = [0, 32], sizes = [2, 32], strides = [1, 1]} : vector<2x128xf32> to vector<2x32xf32>
    %740 = vector.extract_strided_slice %737 {offsets = [0, 64], sizes = [2, 32], strides = [1, 1]} : vector<2x128xf32> to vector<2x32xf32>
    %741 = vector.extract_strided_slice %736 {offsets = [0, 96], sizes = [2, 32], strides = [1, 1]} : vector<2x128xf32> to vector<2x32xf32>
    %742 = arith.mulf %739, %678 : vector<2x32xf32>
    %743 = arith.mulf %738, %740 : vector<2x32xf32>
    %744 = arith.addf %742, %743 : vector<2x32xf32>
    %745 = math.tanh %744 : vector<2x32xf32>
    %746 = arith.mulf %741, %745 : vector<2x32xf32>
    %cst_179 = arith.constant dense<0.000000e+00> : vector<2x4xf32>
    %747 = tpu.matmul %746, %352, %cst_179 {dimension_numbers = #tpu.dot_dimension_numbers<[1], [0], [0], [1], [0, 0, 1, 1], [], []>} : vector<2x32xf32>, vector<32x4xf32>, vector<2x4xf32> -> vector<2x4xf32>
    %748 = arith.addf %747, %355 : vector<2x4xf32>
    %c0_180 = arith.constant 0 : index
    %c5 = arith.constant 5 : index
    %c0_181 = arith.constant 0 : index
    %749 = vector.load %arg15[%c0_180, %c5, %c0_181] : memref<2x8x4xf32, #tpu.memory_space<vmem>>, vector<2x1x4xf32>
    %750 = vector.shape_cast %749 : vector<2x1x4xf32> to vector<2x4xf32>
    %751 = vector.shape_cast %748 : vector<2x4xf32> to vector<2x1x4xf32>
    tpu.vector_store %arg15[%c0_180, %c5, %c0_181], %751 {strides = array<i32>} : memref<2x8x4xf32, #tpu.memory_space<vmem>>, vector<2x1x4xf32>,
    %c8_i32_182 = arith.constant 8 : i32
    %752 = vector.broadcast %c8_i32_182 : i32 to vector<2x128xi32>
    %753 = arith.muli %346, %752 : vector<2x128xi32>
    %c6_i32 = arith.constant 6 : i32
    %754 = vector.broadcast %c6_i32 : i32 to vector<2x128xi32>
    %755 = arith.addi %753, %754 : vector<2x128xi32>
    %c2_i32_183 = arith.constant 2 : i32
    %c0_i32_184 = arith.constant 0 : i32
    %756 = arith.cmpi eq, %c2_i32_183, %c0_i32_184 : i32
    %c1_i32_185 = arith.constant 1 : i32
    %757 = arith.select %756, %c1_i32_185, %c2_i32_183 : i32
    %758 = vector.broadcast %757 : i32 to vector<2x128xi32>
    %759 = arith.remsi %755, %758 : vector<2x128xi32>
    %c0_i32_186 = arith.constant 0 : i32
    %760 = vector.broadcast %c0_i32_186 : i32 to vector<2x128xi32>
    %761 = arith.cmpi ne, %759, %760 : vector<2x128xi32>
    %c0_i32_187 = arith.constant 0 : i32
    %762 = vector.broadcast %c0_i32_187 : i32 to vector<2x128xi32>
    %763 = arith.cmpi slt, %759, %762 : vector<2x128xi32>
    %c0_i32_188 = arith.constant 0 : i32
    %764 = arith.cmpi slt, %757, %c0_i32_188 : i32
    %765 = vector.broadcast %764 : i1 to vector<2x128xi1>
    %766 = vector.broadcast %765 : vector<2x128xi1> to vector<2x128xi1>
    %767 = arith.xori %763, %766 : vector<2x128xi1>
    %768 = arith.andi %767, %761 : vector<2x128xi1>
    %769 = vector.broadcast %757 : i32 to vector<2x128xi32>
    %770 = arith.addi %759, %769 : vector<2x128xi32>
    %771 = arith.select %768, %770, %759 : vector<2x128xi1>, vector<2x128xi32>
    %c1_i32_189 = arith.constant 1 : i32
    %772 = vector.broadcast %c1_i32_189 : i32 to vector<2x128xi32>
    %773 = arith.cmpi eq, %771, %772 : vector<2x128xi32>
    %774 = arith.select %773, %345, %342 : vector<2x128xi1>, vector<2x128xf32>
    %cst_190 = arith.constant dense<0.000000e+00> : vector<2x128xf32>
    %775 = tpu.matmul %725, %334, %cst_190 {dimension_numbers = #tpu.dot_dimension_numbers<[1], [0], [0], [1], [0, 0, 1, 1], [], []>} : vector<2x32xf32>, vector<32x128xf32>, vector<2x128xf32> -> vector<2x128xf32>
    %776 = arith.addf %774, %775 : vector<2x128xf32>
    %777 = arith.negf %776 : vector<2x128xf32>
    %778 = math.exp %777 : vector<2x128xf32>
    %cst_191 = arith.constant 1.000000e+00 : f32
    %779 = vector.broadcast %cst_191 : f32 to vector<2x128xf32>
    %780 = arith.addf %779, %778 : vector<2x128xf32>
    %781 = arith.divf %779, %780 : vector<2x128xf32>
    %782 = math.tanh %776 : vector<2x128xf32>
    %783 = vector.extract_strided_slice %781 {offsets = [0, 0], sizes = [2, 32], strides = [1, 1]} : vector<2x128xf32> to vector<2x32xf32>
    %784 = vector.extract_strided_slice %781 {offsets = [0, 32], sizes = [2, 32], strides = [1, 1]} : vector<2x128xf32> to vector<2x32xf32>
    %785 = vector.extract_strided_slice %782 {offsets = [0, 64], sizes = [2, 32], strides = [1, 1]} : vector<2x128xf32> to vector<2x32xf32>
    %786 = vector.extract_strided_slice %781 {offsets = [0, 96], sizes = [2, 32], strides = [1, 1]} : vector<2x128xf32> to vector<2x32xf32>
    %787 = arith.mulf %784, %723 : vector<2x32xf32>
    %788 = arith.mulf %783, %785 : vector<2x32xf32>
    %789 = arith.addf %787, %788 : vector<2x32xf32>
    %790 = math.tanh %789 : vector<2x32xf32>
    %791 = arith.mulf %786, %790 : vector<2x32xf32>
    %cst_192 = arith.constant 0.000000e+00 : f32
    %792 = vector.broadcast %cst_192 : f32 to vector<2x32xf32>
    %793 = arith.maximumf %791, %792 : vector<2x32xf32>
    %cst_193 = arith.constant dense<0.000000e+00> : vector<2x128xf32>
    %794 = tpu.matmul %793, %347, %cst_193 {dimension_numbers = #tpu.dot_dimension_numbers<[1], [0], [0], [1], [0, 0, 1, 1], [], []>} : vector<2x32xf32>, vector<32x128xf32>, vector<2x128xf32> -> vector<2x128xf32>
    %cst_194 = arith.constant dense<0.000000e+00> : vector<2x128xf32>
    %795 = tpu.matmul %746, %348, %cst_194 {dimension_numbers = #tpu.dot_dimension_numbers<[1], [0], [0], [1], [0, 0, 1, 1], [], []>} : vector<2x32xf32>, vector<32x128xf32>, vector<2x128xf32> -> vector<2x128xf32>
    %796 = arith.addf %794, %795 : vector<2x128xf32>
    %797 = arith.addf %796, %351 : vector<2x128xf32>
    %798 = arith.negf %797 : vector<2x128xf32>
    %799 = math.exp %798 : vector<2x128xf32>
    %cst_195 = arith.constant 1.000000e+00 : f32
    %800 = vector.broadcast %cst_195 : f32 to vector<2x128xf32>
    %801 = arith.addf %800, %799 : vector<2x128xf32>
    %802 = arith.divf %800, %801 : vector<2x128xf32>
    %803 = math.tanh %797 : vector<2x128xf32>
    %804 = vector.extract_strided_slice %802 {offsets = [0, 0], sizes = [2, 32], strides = [1, 1]} : vector<2x128xf32> to vector<2x32xf32>
    %805 = vector.extract_strided_slice %802 {offsets = [0, 32], sizes = [2, 32], strides = [1, 1]} : vector<2x128xf32> to vector<2x32xf32>
    %806 = vector.extract_strided_slice %803 {offsets = [0, 64], sizes = [2, 32], strides = [1, 1]} : vector<2x128xf32> to vector<2x32xf32>
    %807 = vector.extract_strided_slice %802 {offsets = [0, 96], sizes = [2, 32], strides = [1, 1]} : vector<2x128xf32> to vector<2x32xf32>
    %808 = arith.mulf %805, %744 : vector<2x32xf32>
    %809 = arith.mulf %804, %806 : vector<2x32xf32>
    %810 = arith.addf %808, %809 : vector<2x32xf32>
    %811 = math.tanh %810 : vector<2x32xf32>
    %812 = arith.mulf %807, %811 : vector<2x32xf32>
    %cst_196 = arith.constant dense<0.000000e+00> : vector<2x4xf32>
    %813 = tpu.matmul %812, %352, %cst_196 {dimension_numbers = #tpu.dot_dimension_numbers<[1], [0], [0], [1], [0, 0, 1, 1], [], []>} : vector<2x32xf32>, vector<32x4xf32>, vector<2x4xf32> -> vector<2x4xf32>
    %814 = arith.addf %813, %355 : vector<2x4xf32>
    %c0_197 = arith.constant 0 : index
    %c6 = arith.constant 6 : index
    %c0_198 = arith.constant 0 : index
    %815 = vector.load %arg15[%c0_197, %c6, %c0_198] : memref<2x8x4xf32, #tpu.memory_space<vmem>>, vector<2x1x4xf32>
    %816 = vector.shape_cast %815 : vector<2x1x4xf32> to vector<2x4xf32>
    %817 = vector.shape_cast %814 : vector<2x4xf32> to vector<2x1x4xf32>
    tpu.vector_store %arg15[%c0_197, %c6, %c0_198], %817 {strides = array<i32>} : memref<2x8x4xf32, #tpu.memory_space<vmem>>, vector<2x1x4xf32>,
    %c8_i32_199 = arith.constant 8 : i32
    %818 = vector.broadcast %c8_i32_199 : i32 to vector<2x128xi32>
    %819 = arith.muli %346, %818 : vector<2x128xi32>
    %c7_i32 = arith.constant 7 : i32
    %820 = vector.broadcast %c7_i32 : i32 to vector<2x128xi32>
    %821 = arith.addi %819, %820 : vector<2x128xi32>
    %c2_i32_200 = arith.constant 2 : i32
    %c0_i32_201 = arith.constant 0 : i32
    %822 = arith.cmpi eq, %c2_i32_200, %c0_i32_201 : i32
    %c1_i32_202 = arith.constant 1 : i32
    %823 = arith.select %822, %c1_i32_202, %c2_i32_200 : i32
    %824 = vector.broadcast %823 : i32 to vector<2x128xi32>
    %825 = arith.remsi %821, %824 : vector<2x128xi32>
    %c0_i32_203 = arith.constant 0 : i32
    %826 = vector.broadcast %c0_i32_203 : i32 to vector<2x128xi32>
    %827 = arith.cmpi ne, %825, %826 : vector<2x128xi32>
    %c0_i32_204 = arith.constant 0 : i32
    %828 = vector.broadcast %c0_i32_204 : i32 to vector<2x128xi32>
    %829 = arith.cmpi slt, %825, %828 : vector<2x128xi32>
    %c0_i32_205 = arith.constant 0 : i32
    %830 = arith.cmpi slt, %823, %c0_i32_205 : i32
    %831 = vector.broadcast %830 : i1 to vector<2x128xi1>
    %832 = vector.broadcast %831 : vector<2x128xi1> to vector<2x128xi1>
    %833 = arith.xori %829, %832 : vector<2x128xi1>
    %834 = arith.andi %833, %827 : vector<2x128xi1>
    %835 = vector.broadcast %823 : i32 to vector<2x128xi32>
    %836 = arith.addi %825, %835 : vector<2x128xi32>
    %837 = arith.select %834, %836, %825 : vector<2x128xi1>, vector<2x128xi32>
    %c1_i32_206 = arith.constant 1 : i32
    %838 = vector.broadcast %c1_i32_206 : i32 to vector<2x128xi32>
    %839 = arith.cmpi eq, %837, %838 : vector<2x128xi32>
    %840 = arith.select %839, %345, %342 : vector<2x128xi1>, vector<2x128xf32>
    %cst_207 = arith.constant dense<0.000000e+00> : vector<2x128xf32>
    %841 = tpu.matmul %791, %334, %cst_207 {dimension_numbers = #tpu.dot_dimension_numbers<[1], [0], [0], [1], [0, 0, 1, 1], [], []>} : vector<2x32xf32>, vector<32x128xf32>, vector<2x128xf32> -> vector<2x128xf32>
    %842 = arith.addf %840, %841 : vector<2x128xf32>
    %843 = arith.negf %842 : vector<2x128xf32>
    %844 = math.exp %843 : vector<2x128xf32>
    %cst_208 = arith.constant 1.000000e+00 : f32
    %845 = vector.broadcast %cst_208 : f32 to vector<2x128xf32>
    %846 = arith.addf %845, %844 : vector<2x128xf32>
    %847 = arith.divf %845, %846 : vector<2x128xf32>
    %848 = math.tanh %842 : vector<2x128xf32>
    %849 = vector.extract_strided_slice %847 {offsets = [0, 0], sizes = [2, 32], strides = [1, 1]} : vector<2x128xf32> to vector<2x32xf32>
    %850 = vector.extract_strided_slice %847 {offsets = [0, 32], sizes = [2, 32], strides = [1, 1]} : vector<2x128xf32> to vector<2x32xf32>
    %851 = vector.extract_strided_slice %848 {offsets = [0, 64], sizes = [2, 32], strides = [1, 1]} : vector<2x128xf32> to vector<2x32xf32>
    %852 = vector.extract_strided_slice %847 {offsets = [0, 96], sizes = [2, 32], strides = [1, 1]} : vector<2x128xf32> to vector<2x32xf32>
    %853 = arith.mulf %850, %789 : vector<2x32xf32>
    %854 = arith.mulf %849, %851 : vector<2x32xf32>
    %855 = arith.addf %853, %854 : vector<2x32xf32>
    %856 = math.tanh %855 : vector<2x32xf32>
    %857 = arith.mulf %852, %856 : vector<2x32xf32>
    %cst_209 = arith.constant 0.000000e+00 : f32
    %858 = vector.broadcast %cst_209 : f32 to vector<2x32xf32>
    %859 = arith.maximumf %857, %858 : vector<2x32xf32>
    %cst_210 = arith.constant dense<0.000000e+00> : vector<2x128xf32>
    %860 = tpu.matmul %859, %347, %cst_210 {dimension_numbers = #tpu.dot_dimension_numbers<[1], [0], [0], [1], [0, 0, 1, 1], [], []>} : vector<2x32xf32>, vector<32x128xf32>, vector<2x128xf32> -> vector<2x128xf32>
    %cst_211 = arith.constant dense<0.000000e+00> : vector<2x128xf32>
    %861 = tpu.matmul %812, %348, %cst_211 {dimension_numbers = #tpu.dot_dimension_numbers<[1], [0], [0], [1], [0, 0, 1, 1], [], []>} : vector<2x32xf32>, vector<32x128xf32>, vector<2x128xf32> -> vector<2x128xf32>
    %862 = arith.addf %860, %861 : vector<2x128xf32>
    %863 = arith.addf %862, %351 : vector<2x128xf32>
    %864 = arith.negf %863 : vector<2x128xf32>
    %865 = math.exp %864 : vector<2x128xf32>
    %cst_212 = arith.constant 1.000000e+00 : f32
    %866 = vector.broadcast %cst_212 : f32 to vector<2x128xf32>
    %867 = arith.addf %866, %865 : vector<2x128xf32>
    %868 = arith.divf %866, %867 : vector<2x128xf32>
    %869 = math.tanh %863 : vector<2x128xf32>
    %870 = vector.extract_strided_slice %868 {offsets = [0, 0], sizes = [2, 32], strides = [1, 1]} : vector<2x128xf32> to vector<2x32xf32>
    %871 = vector.extract_strided_slice %868 {offsets = [0, 32], sizes = [2, 32], strides = [1, 1]} : vector<2x128xf32> to vector<2x32xf32>
    %872 = vector.extract_strided_slice %869 {offsets = [0, 64], sizes = [2, 32], strides = [1, 1]} : vector<2x128xf32> to vector<2x32xf32>
    %873 = vector.extract_strided_slice %868 {offsets = [0, 96], sizes = [2, 32], strides = [1, 1]} : vector<2x128xf32> to vector<2x32xf32>
    %874 = arith.mulf %871, %810 : vector<2x32xf32>
    %875 = arith.mulf %870, %872 : vector<2x32xf32>
    %876 = arith.addf %874, %875 : vector<2x32xf32>
    %877 = math.tanh %876 : vector<2x32xf32>
    %878 = arith.mulf %873, %877 : vector<2x32xf32>
    %cst_213 = arith.constant dense<0.000000e+00> : vector<2x4xf32>
    %879 = tpu.matmul %878, %352, %cst_213 {dimension_numbers = #tpu.dot_dimension_numbers<[1], [0], [0], [1], [0, 0, 1, 1], [], []>} : vector<2x32xf32>, vector<32x4xf32>, vector<2x4xf32> -> vector<2x4xf32>
    %880 = arith.addf %879, %355 : vector<2x4xf32>
    %c0_214 = arith.constant 0 : index
    %c7 = arith.constant 7 : index
    %c0_215 = arith.constant 0 : index
    %881 = vector.load %arg15[%c0_214, %c7, %c0_215] : memref<2x8x4xf32, #tpu.memory_space<vmem>>, vector<2x1x4xf32>
    %882 = vector.shape_cast %881 : vector<2x1x4xf32> to vector<2x4xf32>
    %883 = vector.shape_cast %880 : vector<2x4xf32> to vector<2x1x4xf32>
    tpu.vector_store %arg15[%c0_214, %c7, %c0_215], %883 {strides = array<i32>} : memref<2x8x4xf32, #tpu.memory_space<vmem>>, vector<2x1x4xf32>,
    return
  }
}

</mosaic_0001>

<bundles_post_ra>
// kernel: lstm_autoencoder_forward.1
= control target key start
LH: loop header
LB: loop body
LE: loop exit
PB: predicated region body
PF: predicated region fallthrough
CT: control target
= control target key end

     0   :  { %20 = vsyncpa [#allocation3], 0  ;;  %s5245_s0 = inlined_call_operand.vmem [shape: f32[2,8,4], index: 0, kind: input, shape index: {}]   ;;  %s5246_s1 = inlined_call_operand.vmem [shape: f32[4,128], index: 1, kind: input, shape index: {}]   ;;  %s5247_s2 = inlined_call_operand.vmem [shape: f32[32,128], index: 2, kind: input, shape index: {}]   ;;  %s5248_s3 = inlined_call_operand.vmem [shape: f32[1,128], index: 3, kind: input, shape index: {}]   ;;  %s5249_s4 = inlined_call_operand.hbm [shape: f32[32,128], index: 4, kind: input, shape index: {}]   ;;  %s5250_s5 = inlined_call_operand.hbm [shape: f32[32,128], index: 5, kind: input, shape index: {}]   ;;  %s5251_s6 = inlined_call_operand.vmem [shape: f32[1,128], index: 6, kind: input, shape index: {}]   ;;  %s5252_s7 = inlined_call_operand.hbm [shape: f32[32,128], index: 7, kind: input, shape index: {}]   ;;  %s5253_s8 = inlined_call_operand.hbm [shape: f32[32,128], index: 8, kind: input, shape index: {}]   ;;  %s5254_s9 = inlined_call_operand.vmem [shape: f32[1,128], index: 9, kind: input, shape index: {}]   ;;  %s5255_s10 = inlined_call_operand.hbm [shape: f32[32,128], index: 10, kind: input, shape index: {}]   ;;  %s5256_s11 = inlined_call_operand.hbm [shape: f32[32,128], index: 11, kind: input, shape index: {}]   ;;  %s5257_s12 = inlined_call_operand.vmem [shape: f32[1,128], index: 12, kind: input, shape index: {}]   ;;  %s5258_s13 = inlined_call_operand.vmem [shape: f32[32,4], index: 13, kind: input, shape index: {}]   ;;  %s5259_s14 = inlined_call_operand.vmem [shape: f32[1,4], index: 14, kind: input, shape index: {}]   ;;  %s5260_s15 = inlined_call_operand.vmem [shape: f32[2,8,4], index: 15, kind: output, shape index: {}]  }
   0x1   :  { %21 = vsyncpa [#allocation5], 0 }
   0x2   :  { %22 = vsyncpa [#allocation8], 0 }
   0x3   :  { %23 = vsyncpa [#allocation11], 0  ;;  %s49_s20 = sshll.u32 %s5250_s5, 4  ;;  %s4076_s21 = smov [#allocation4]   ;;  %s50_s20 = int_to_ptr.hbm [resolvable:$true] %s49_s20 }
   0x4   :  { %s51_s22 = sshll.u32 %s4076_s21, 4  ;;  %s77_s25 = sshll.u32 %s5253_s8, 4  ;;  %s52_s22 = int_to_ptr.vmem [resolvable:$true] %s51_s22  ;;  %s78_s25 = int_to_ptr.hbm [resolvable:$true] %s77_s25 }
   0x5   :  { %s4077_s26 = smov 128   ;;  %s4078_s27 = smov 8  }
   0x6   :  { %57 = dma.hbm_to_vmem [thread:$0]  %s50_s20, 512, %s52_s22, [#allocation5], %s4077_s26, %s4077_s26, %s4078_s27  }
   0x7   :  { %s4079_s28 = smov [#allocation7]   ;;  %s36_s5 = sshll.u32 %s5249_s4, 4  ;;  %s37_s5 = int_to_ptr.hbm [resolvable:$true] %s36_s5 }
   0x8   :  { %s79_s29 = sshll.u32 %s4079_s28, 4  ;;  %s64_s18 = sshll.u32 %s5252_s7, 4  ;;  %s80_s29 = int_to_ptr.vmem [resolvable:$true] %s79_s29  ;;  %s65_s18 = int_to_ptr.hbm [resolvable:$true] %s64_s18 }
   0x9   :  { %85 = dma.hbm_to_vmem [thread:$0]  %s78_s25, 512, %s80_s29, [#allocation8], %s4077_s26, %s4077_s26, %s4078_s27  }
   0xa   :  { %s4080_s19 = smov [#allocation2]   ;;  %s4081_s20 = smov [#allocation6]  }
   0xb   :  { %s38_s21 = sshll.u32 %s4080_s19, 4  ;;  %s66_s4 = sshll.u32 %s4081_s20, 4  ;;  %s39_s21 = int_to_ptr.vmem [resolvable:$true] %s38_s21  ;;  %s67_s4 = int_to_ptr.vmem [resolvable:$true] %s66_s4 }
   0xc   :  { %44 = dma.hbm_to_vmem [thread:$0]  %s37_s5, 512, %s39_s21, [#allocation3], %s4077_s26, %s4077_s26, %s4078_s27  }
   0xd   :  { %s92_s24 = sshll.u32 %s5255_s10, 4  ;;  %s105_s28 = sshll.u32 %s5256_s11, 4  ;;  %s93_s24 = int_to_ptr.hbm [resolvable:$true] %s92_s24  ;;  %s106_s28 = int_to_ptr.hbm [resolvable:$true] %s105_s28 }
   0xe   :  { %72 = dma.hbm_to_vmem [thread:$0]  %s65_s18, 512, %s67_s4, [#allocation5], %s4077_s26, %s4077_s26, %s4078_s27  }
   0xf   :  { %s4082_s29 = smov [#allocation9]   ;;  %s4083_s16 = smov [#allocation10]  }
  0x10   :  { %s94_s30 = sshll.u32 %s4082_s29, 4  ;;  %s107_s10 = sshll.u32 %s4083_s16, 4  ;;  %s95_s30 = int_to_ptr.vmem [resolvable:$true] %s94_s30  ;;  %s108_s10 = int_to_ptr.vmem [resolvable:$true] %s107_s10 }
  0x11   :  { %100 = dma.hbm_to_vmem [thread:$0]  %s93_s24, 512, %s95_s30, [#allocation8], %s4077_s26, %s4077_s26, %s4078_s27  }
  0x12   :  { %113 = dma.hbm_to_vmem [thread:$0]  %s106_s28, 512, %s108_s10, [#allocation11], %s4077_s26, %s4077_s26, %s4078_s27  }
  0x13   :  { %4068 = dma.done.wait [#allocation3], 512  }
  0x14   :  { %4069 = vsyncadd [#allocation3], 4294966784 }
  0x15   :  { %4070 = dma.done.wait [#allocation5], 1024  }
  0x16   :  { %4071 = vsyncadd [#allocation5], 4294966272 }
  0x17   :  { %4072 = dma.done.wait [#allocation8], 1024  }
  0x18   :  { %4073 = vsyncadd [#allocation8], 4294966272 }
  0x19   :  { %4074 = dma.done.wait [#allocation11], 512  }
  0x1a   :  { %4075 = vsyncadd [#allocation11], 4294966784  ;;  %vm162_vm0 = vcmask 1043456   ;;  %vm155_vm1 = vcmask 31744   ;;  %v150_v0 = vld [vmem:[%s5246_s1] sm:$0xf] }
  0x1b   :  { %v4209_v1 = vld [vmem:[%s5247_s2 + $0x18] sm:$0xff]  ;;  %v144_v2 = vld [vmem:[%s5245_s0] sm:$0xff]  ;;  %3461 = vmatpush.msk.msra.mxu0 %vm162_vm0, %v150_v0  ;;  %v4218_v3 = vld [vmem:[%s5247_s2 + $0x10] sm:$0xff]  ;;  %v4084_v7 = vmov 0.0   ;;  %s4085_s7 = smov 64   ;;  %vm330_vm10 = vcmask 1041409  }
  0x1c   :  { %217 = vmatpush.msra.mxu1 %v4209_v1  ;;  %3462 = vmatmul.msk.f32.vlgmr.msra.gmra.mxu0 %vm155_vm1, %v144_v2  ;;  %v4224_v4 = vld [vmem:[%s5247_s2 + $0x8] sm:$0xff]  ;;  %v4231_v5 = vld [vmem:[%s5247_s2] sm:$0xff]  ;;  %v4268_v57 = vld [vmem:[#allocation4 + $0x18] sm:$0xff]  ;;  %vm5261_vm11 = vcmask 261120  }
  0x1d   :  { %621 = vmatpush.msrb.mxu0 %v4209_v1  ;;  %v145_v6 = vld [vmem:[%s5245_s0 + $0x8] sm:$0xff]  ;;  %v3568_v10 = vld [vmem:[%s5248_s3] ss:$0 sm:$0xff]  ;;  %s4086_s3 = smov 32   ;;  %v4270_v58 = vld [vmem:[#allocation2 + $0x18] sm:$0xff]  ;;  %319 = vmatpush.msra.mxu2 %v4268_v57 }
  0x1e   :  { %218 = vmatpush.msra.mxu1 %v4218_v3  ;;  %v4272_v59 = vld [vmem:[#allocation4 + $0x10] sm:$0xff]  ;;  %348 = vmatpush.msra.mxu3 %v4270_v58  ;;  %v4278_v61 = vld [vmem:[#allocation4 + $0x8] sm:$0xff] }
  0x1f   :  { %622 = vmatpush.msrb.mxu0 %v4218_v3  ;;  %v4276_v60 = vld [vmem:[#allocation2 + $0x10] sm:$0xff]  ;;  %v4280_v62 = vld [vmem:[#allocation2 + $0x8] sm:$0xff]  ;;  %320 = vmatpush.msra.mxu2 %v4272_v59 }
  0x20   :  { %219 = vmatpush.msra.mxu1 %v4224_v4  ;;  %349 = vmatpush.msra.mxu3 %v4276_v60 }
  0x21   :  { %623 = vmatpush.msrb.mxu0 %v4224_v4  ;;  %321 = vmatpush.msra.mxu2 %v4278_v61 }
  0x22   :  { %220 = vmatpush.msra.mxu1 %v4231_v5  ;;  %350 = vmatpush.msra.mxu3 %v4280_v62 }
  0x23   :  { %221 = vmatmul.f32.vlgmr.msra.gmra.mxu1 %v4084_v7  ;;  %624 = vmatpush.msrb.mxu0 %v4231_v5 }
  0x24   :  { %414 = vmatpush.msrb.mxu1 %v4209_v1  ;;  %3463 = vmatmul.msk.f32.gmra.mxu0 %vm155_vm1, %v145_v6 }
  0x25   :  { %945 = vmatpush.msra.mxu0 %v4268_v57 }
  0x26   :  { %415 = vmatpush.msrb.mxu1 %v4218_v3 }
  0x27   :  { %946 = vmatpush.msra.mxu0 %v4272_v59 }
  0x28   :  { %416 = vmatpush.msrb.mxu1 %v4224_v4 }
  0x29   :  { %947 = vmatpush.msra.mxu0 %v4278_v61 }
  0x2a   :  { %417 = vmatpush.msrb.mxu1 %v4231_v5 }
  0x2c   :  { %735 = vmatpush.msra.mxu1 %v4268_v57 }
  0x2e   :  { %736 = vmatpush.msra.mxu1 %v4272_v59 }
  0x30   :  { %737 = vmatpush.msra.mxu1 %v4278_v61 }
  0x99   :  { %v183_v8 = vpop.f32.mrf.mxu0 }
  0x9a   :  { %v4253_v15 = vadd.f32 %v3568_v10, %v183_v8 }
  0xa0   :  { %v222_v9 = vpop.f32.mrf.mxu1 }
  0xa1   :  { %v226_v11 = vrot.slane %v222_v9, 1  ;;  %v186_v12 = vpop.f32.mrf.mxu0  ;;  %v229_v16 = vadd.f32 %v222_v9, %v4253_v15 }
  0xa2   :  { %v4250_v13 = vadd.f32 %v3568_v10, %v186_v12 }
  0xa3   :  { %v3464_v20 = vmul.f32 -1.442695, %v229_v16 }
  0xa4   :  { %v230_v14 = vadd.f32 %v226_v11, %v4250_v13 }
  0xa6   :  { %3573 = vtanh.f32 %v230_v14  ;;  %v3465_v19 = vmul.f32 -1.442695, %v230_v14 }
  0xa7   :  { %3575 = vtanh.f32 %v229_v16  ;;  %v4296_v16 = vld [vmem:[#allocation4] sm:$0xff] }
  0xa8   :  { %3577 = vpow2.f32 %v3465_v19  ;;  %322 = vmatpush.msra.mxu2 %v4296_v16  ;;  %738 = vmatpush.msra.mxu1 %v4296_v16 }
  0xa9   :  { %3579 = vpow2.f32 %v3464_v20  ;;  %323 = vmatmul.f32.vlgmr.msra.gmra.mxu2 %v4084_v7  ;;  %948 = vmatpush.msra.mxu0 %v4296_v16 }
  0xaa   :  { %527 = vmatpush.msrb.mxu2 %v4268_v57 }
  0xac   :  { %v3574_v17 = vpop.eup %3573  ;;  %528 = vmatpush.msrb.mxu2 %v4272_v59 }
  0xad   :  { %277 = vrot.lane.b32.xlu0 %v3574_v17, %s4085_s7  ;;  %v3576_v18 = vpop.eup %3575  ;;  %v4298_v17 = vld [vmem:[#allocation2] sm:$0xff] }
  0xae   :  { %v3578_v21 = vpop.eup %3577  ;;  %351 = vmatpush.msra.mxu3 %v4298_v17  ;;  %529 = vmatpush.msrb.mxu2 %v4278_v61 }
  0xaf   :  { %v238_v22 = vadd.f32 1.0, %v3578_v21  ;;  %v3580_v23 = vpop.eup %3579 }
  0xb0   :  { %v237_v24 = vadd.f32 1.0, %v3580_v23  ;;  %555 = vmatpush.msrb.mxu3 %v4270_v58  ;;  %530 = vmatpush.msrb.mxu2 %v4296_v16 }
  0xb1   :  { %3581 = vrcp.f32 %v238_v22  ;;  %v265_v33 = vand.u32 2147483648, %v238_v22  ;;  %vm259_vm3 = vweird.f32 %v238_v22  ;;  %v263_v34 = vand.u32 2147483647, %v238_v22 }
  0xb2   :  { %3583 = vrcp.f32 %v237_v24  ;;  %v250_v42 = vand.u32 2147483648, %v237_v24  ;;  %vm244_vm7 = vweird.f32 %v237_v24  ;;  %v248_v43 = vand.u32 2147483647, %v237_v24  ;;  %556 = vmatpush.msrb.mxu3 %v4276_v60  ;;  %764 = vmatpush.msra.mxu2 %v4270_v58 }
  0xb3   :  { %v266_v37 = vor.u32 1.1754944e-38, %v265_v33  ;;  %vm264_vm5 = vcmp.eq.f32.partialorder %v263_v34, 8.507059e+37 }
  0xb4   :  { %v251_v45 = vor.u32 1.1754944e-38, %v250_v42  ;;  %vm249_vm9 = vcmp.eq.f32.partialorder %v248_v43, 8.507059e+37  ;;  %557 = vmatpush.msrb.mxu3 %v4280_v62  ;;  %765 = vmatpush.msra.mxu2 %v4276_v60 }
  0xb5   :  { %275 = vrot.lane.b32.xlu0 %v3576_v18, %s4085_s7 }
  0xb6   :  { %558 = vmatpush.msrb.mxu3 %v4298_v17  ;;  %766 = vmatpush.msra.mxu2 %v4280_v62 }
  0xb7   :  { %v3582_v25 = vpop.eup %3581 }
  0xb8   :  { %v255_v26 = vmul.f32 %v3582_v25, %v238_v22  ;;  %v3584_v28 = vpop.eup %3583  ;;  %vm260_vm2 = vweird.f32 %v3582_v25  ;;  %767 = vmatpush.msra.mxu2 %v4298_v17 }
  0xb9   :  { %v240_v30 = vmul.f32 %v3584_v28, %v237_v24  ;;  %vm261_vm4 = vmor %vm259_vm3, %vm260_vm2  ;;  %vm245_vm6 = vweird.f32 %v3584_v28 }
  0xba   :  { %v256_v27 = vsub.f32 1.0, %v255_v26  ;;  %vm246_vm8 = vmor %vm244_vm7, %vm245_vm6 }
  0xbb   :  { %v241_v32 = vsub.f32 1.0, %v240_v30 }
  0xbc   :  { %v257_v29 = vmul.f32 %v3582_v25, %v256_v27 }
  0xbd   :  { %v242_v36 = vmul.f32 %v3584_v28, %v241_v32 }
  0xbe   :  { %v258_v31 = vadd.f32 %v3582_v25, %v257_v29 }
  0xbf   :  { %v243_v41 = vadd.f32 %v3584_v28, %v242_v36 }
  0xc0   :  { %v262_v35 = vsel %vm261_vm4, %v3582_v25, %v258_v31  ;;  %v4332_v25 = vld [vmem:[%s5251_s6] ss:$0 sm:$0xff] }
  0xc1   :  { %v267_v39 = vsel %vm264_vm5, %v266_v37, %v262_v35  ;;  %v247_v44 = vsel %vm246_vm8, %v3584_v28, %v243_v41 }
  0xc2   :  { %v252_v47 = vsel %vm249_vm9, %v251_v45, %v247_v44  ;;  %v272_v49 = vmul.f32 0.0, %v267_v39 }
  0xc3   :  { %v271_v52 = vmul.f32 0.0, %v252_v47 }
 0x11f   :  { %v278_v38 = vpop.permute.xlu0 %277 }
 0x120   :  { %v282_v40 = vmul.f32 %v278_v38, %v267_v39 }
 0x122   :  { %287 = vrot.lane.b32.xlu1 %v282_v40, %s4086_s3 }
 0x127   :  { %v276_v46 = vpop.permute.xlu0 %275 }
 0x128   :  { %v281_v48 = vmul.f32 %v276_v46, %v252_v47 }
 0x12a   :  { %285 = vrot.lane.b32.xlu1 %v281_v48, %s4086_s3 }
 0x12c   :  { %v324_v24 = vpop.f32.mrf.mxu2 }
 0x194   :  { %v288_v50 = vpop.permute.xlu1 %287 }
 0x195   :  { %v4260_v51 = vadd.f32 %v288_v50, %v272_v49 }
 0x197   :  { %3585 = vtanh.f32 %v4260_v51 }
 0x19c   :  { %v286_v53 = vpop.permute.xlu1 %285 }
 0x19d   :  { %v3586_v54 = vpop.eup %3585  ;;  %v4263_v55 = vadd.f32 %v286_v53, %v271_v52 }
 0x19e   :  { %299 = vrot.lane.b32.xlu2 %v3586_v54, %s4085_s7 }
 0x19f   :  { %3587 = vtanh.f32 %v4263_v55 }
 0x1a5   :  { %v3588_v56 = vpop.eup %3587 }
 0x1a6   :  { %297 = vrot.lane.b32.xlu2 %v3588_v56, %s4085_s7 }
 0x1f8   :  { %v300_v63 = vpop.permute.xlu2 %299 }
 0x1f9   :  { %v304_v0 = vmul.f32 %v300_v63, %v267_v39 }
 0x1fb   :  { %v306_v2 = vmax.f32 %v304_v0, 0.0  ;;  %v396_v8 = vrot.slane %v304_v0, 7 }
 0x1fd   :  { %v329_v10 = vrot.slane %v306_v2, 7 }
 0x200   :  { %v298_v6 = vpop.permute.xlu2 %297 }
 0x201   :  { %v303_v9 = vmul.f32 %v298_v6, %v252_v47 }
 0x203   :  { %v305_v11 = vmax.f32 %v303_v9, 0.0  ;;  %v397_v12 = vsel %vm330_vm10, %v396_v8, %v303_v9 }
 0x204   :  { %398 = vrot.lane.b32.xlu0 %v397_v12, %s4086_s3 }
 0x205   :  { %v331_v14 = vsel %vm330_vm10, %v329_v10, %v305_v11 }
 0x206   :  { %332 = vrot.lane.b32.xlu1 %v331_v14, %s4086_s3 }
 0x276   :  { %v399_v18 = vpop.permute.xlu0 %398 }
 0x277   :  { %3468 = vmatmul.msk.f32.vlgmr.msrb.gmra.mxu1 %vm5261_vm11, %v399_v18 }
 0x278   :  { %v333_v19 = vpop.permute.xlu1 %332  ;;  %974 = vmatpush.msrb.mxu1 %v4270_v58 }
 0x279   :  { %3466 = vmatmul.msk.f32.vlgmr.msra.gmra.mxu3 %vm5261_vm11, %v333_v19 }
 0x27a   :  { %831 = vmatpush.msra.mxu3 %v4209_v1  ;;  %975 = vmatpush.msrb.mxu1 %v4276_v60 }
 0x27c   :  { %832 = vmatpush.msra.mxu3 %v4218_v3  ;;  %976 = vmatpush.msrb.mxu1 %v4280_v62 }
 0x27e   :  { %833 = vmatpush.msra.mxu3 %v4224_v4  ;;  %977 = vmatpush.msrb.mxu1 %v4298_v17 }
 0x280   :  { %834 = vmatpush.msra.mxu3 %v4231_v5 }
 0x2f4   :  { %v419_v20 = vpop.f32.mrf.mxu1 }
 0x2f5   :  { %v423_v21 = vrot.slane %v419_v20, 7  ;;  %v427_v22 = vadd.f32 %v419_v20, %v4250_v13 }
 0x2f7   :  { %v426_v23 = vadd.f32 %v423_v21, %v4253_v15  ;;  %3589 = vtanh.f32 %v427_v22  ;;  %v3470_v35 = vmul.f32 -1.442695, %v427_v22 }
 0x2f9   :  { %3591 = vtanh.f32 %v426_v23  ;;  %v3469_v32 = vmul.f32 -1.442695, %v426_v23 }
 0x2fc   :  { %v353_v26 = vpop.f32.mrf.mxu3 }
 0x2fd   :  { %v3590_v27 = vpop.eup %3589  ;;  %v354_v28 = vadd.f32 %v353_v26, %v324_v24 }
 0x2fe   :  { %480 = vrot.lane.b32.xlu0 %v3590_v27, %s4085_s7 }
 0x2ff   :  { %v356_v29 = vadd.f32 %v4332_v25, %v354_v28  ;;  %v3592_v30 = vpop.eup %3591 }
 0x300   :  { %478 = vrot.lane.b32.xlu2 %v3592_v30, %s4085_s7 }
 0x301   :  { %3593 = vtanh.f32 %v356_v29  ;;  %v3467_v40 = vmul.f32 -1.442695, %v356_v29 }
 0x302   :  { %3595 = vpow2.f32 %v3469_v32 }
 0x307   :  { %v3594_v31 = vpop.eup %3593 }
 0x308   :  { %379 = vrot.lane.b32.xlu1 %v3594_v31, %s4085_s7  ;;  %v3596_v33 = vpop.eup %3595  ;;  %v470_v31 = vrot.slane %v4263_v55, 7 }
 0x309   :  { %v434_v34 = vadd.f32 1.0, %v3596_v33 }
 0x30b   :  { %3597 = vrcp.f32 %v434_v34  ;;  %v447_v44 = vand.u32 2147483648, %v434_v34  ;;  %vm441_vm13 = vweird.f32 %v434_v34  ;;  %v445_v45 = vand.u32 2147483647, %v434_v34 }
 0x30c   :  { %3599 = vpow2.f32 %v3470_v35 }
 0x30d   :  { %3601 = vpow2.f32 %v3467_v40  ;;  %v448_v48 = vor.u32 1.1754944e-38, %v447_v44  ;;  %vm446_vm15 = vcmp.eq.f32.partialorder %v445_v45, 8.507059e+37 }
 0x311   :  { %v3598_v36 = vpop.eup %3597 }
 0x312   :  { %v437_v37 = vmul.f32 %v3598_v36, %v434_v34  ;;  %v3600_v39 = vpop.eup %3599  ;;  %vm442_vm12 = vweird.f32 %v3598_v36 }
 0x313   :  { %v435_v41 = vadd.f32 1.0, %v3600_v39  ;;  %v3602_v46 = vpop.eup %3601  ;;  %vm443_vm14 = vmor %vm441_vm13, %vm442_vm12 }
 0x314   :  { %v438_v38 = vsub.f32 1.0, %v437_v37  ;;  %v360_v50 = vadd.f32 1.0, %v3602_v46 }
 0x315   :  { %3603 = vrcp.f32 %v435_v41  ;;  %v462_v9 = vand.u32 2147483648, %v435_v41  ;;  %vm456_vm1 = vweird.f32 %v435_v41  ;;  %v460_v10 = vand.u32 2147483647, %v435_v41 }
 0x316   :  { %v439_v42 = vmul.f32 %v3598_v36, %v438_v38  ;;  %3605 = vrcp.f32 %v360_v50  ;;  %v372_v23 = vand.u32 2147483648, %v360_v50  ;;  %vm366_vm5 = vweird.f32 %v360_v50 }
 0x317   :  { %v463_v14 = vor.u32 1.1754944e-38, %v462_v9  ;;  %vm461_vm3 = vcmp.eq.f32.partialorder %v460_v10, 8.507059e+37  ;;  %v370_v24 = vand.u32 2147483647, %v360_v50 }
 0x318   :  { %v440_v43 = vadd.f32 %v3598_v36, %v439_v42  ;;  %v373_v27 = vor.u32 1.1754944e-38, %v372_v23 }
 0x319   :  { %vm371_vm7 = vcmp.eq.f32.partialorder %v370_v24, 8.507059e+37 }
 0x31a   :  { %v444_v47 = vsel %vm443_vm14, %v3598_v36, %v440_v43  ;;  %v471_v36 = vrot.slane %v4260_v51, 7 }
 0x31b   :  { %v3604_v49 = vpop.eup %3603  ;;  %v449_v53 = vsel %vm446_vm15, %v448_v48, %v444_v47 }
 0x31c   :  { %v452_v56 = vmul.f32 %v3604_v49, %v435_v41  ;;  %v3606_v0 = vpop.eup %3605  ;;  %vm457_vm0 = vweird.f32 %v3604_v49  ;;  %v474_v32 = vmul.f32 %v470_v31, %v449_v53 }
 0x31d   :  { %v362_v6 = vmul.f32 %v3606_v0, %v360_v50  ;;  %vm458_vm2 = vmor %vm456_vm1, %vm457_vm0  ;;  %vm367_vm4 = vweird.f32 %v3606_v0 }
 0x31e   :  { %v453_v63 = vsub.f32 1.0, %v452_v56  ;;  %vm368_vm6 = vmor %vm366_vm5, %vm367_vm4 }
 0x31f   :  { %v363_v11 = vsub.f32 1.0, %v362_v6 }
 0x320   :  { %v454_v2 = vmul.f32 %v3604_v49, %v453_v63 }
 0x321   :  { %v364_v18 = vmul.f32 %v3606_v0, %v363_v11 }
 0x322   :  { %v455_v8 = vadd.f32 %v3604_v49, %v454_v2 }
 0x323   :  { %v365_v22 = vadd.f32 %v3606_v0, %v364_v18 }
 0x324   :  { %v459_v12 = vsel %vm458_vm2, %v3604_v49, %v455_v8 }
 0x325   :  { %v464_v20 = vsel %vm461_vm3, %v463_v14, %v459_v12  ;;  %v369_v26 = vsel %vm368_vm6, %v3606_v0, %v365_v22 }
 0x326   :  { %v374_v29 = vsel %vm371_vm7, %v373_v27, %v369_v26  ;;  %v475_v37 = vmul.f32 %v471_v36, %v464_v20 }
 0x327   :  { %v377_v41 = vmul.f32 0.0, %v374_v29 }
 0x35a   :  { %v479_v52 = vpop.permute.xlu2 %478 }
 0x35b   :  { %v484_v54 = vmul.f32 %v479_v52, %v449_v53 }
 0x35d   :  { %488 = vrot.lane.b32.xlu2 %v484_v54, %s4086_s3 }
 0x370   :  { %v481_v19 = vpop.permute.xlu0 %480 }
 0x371   :  { %v485_v21 = vmul.f32 %v481_v19, %v464_v20 }
 0x373   :  { %490 = vrot.lane.b32.xlu0 %v485_v21, %s4086_s3 }
 0x37a   :  { %v380_v28 = vpop.permute.xlu1 %379 }
 0x37b   :  { %v382_v30 = vmul.f32 %v380_v28, %v374_v29 }
 0x37d   :  { %384 = vrot.lane.b32.xlu1 %v382_v30, %s4086_s3 }
 0x3b7   :  { %v489_v33 = vpop.permute.xlu2 %488 }
 0x3b8   :  { %v4342_v34 = vadd.f32 %v489_v33, %v474_v32 }
 0x3ba   :  { %3607 = vtanh.f32 %v4342_v34 }
 0x3c0   :  { %v3608_v35 = vpop.eup %3607 }
 0x3c1   :  { %500 = vrot.lane.b32.xlu2 %v3608_v35, %s4085_s7 }
 0x3e5   :  { %v491_v38 = vpop.permute.xlu0 %490 }
 0x3e6   :  { %v4347_v39 = vadd.f32 %v491_v38, %v475_v37 }
 0x3e8   :  { %3609 = vtanh.f32 %v4347_v39 }
 0x3ee   :  { %v3610_v40 = vpop.eup %3609 }
 0x3ef   :  { %502 = vrot.lane.b32.xlu0 %v3610_v40, %s4085_s7  ;;  %v385_v55 = vpop.permute.xlu1 %384 }
 0x3f0   :  { %v4351_v42 = vadd.f32 %v385_v55, %v377_v41 }
 0x3f2   :  { %3611 = vtanh.f32 %v4351_v42 }
 0x3f8   :  { %v3612_v43 = vpop.eup %3611 }
 0x3f9   :  { %390 = vrot.lane.b32.xlu1 %v3612_v43, %s4085_s7 }
 0x41b   :  { %v501_v44 = vpop.permute.xlu2 %500 }
 0x41c   :  { %v506_v51 = vmul.f32 %v501_v44, %v449_v53 }
 0x41e   :  { %v508_v45 = vmax.f32 %v506_v51, 0.0  ;;  %v603_v47 = vrot.slane %v506_v51, 1 }
 0x420   :  { %v537_v49 = vrot.slane %v508_v45, 1 }
 0x461   :  { %v503_v46 = vpop.permute.xlu0 %502 }
 0x462   :  { %v507_v48 = vmul.f32 %v503_v46, %v464_v20 }
 0x464   :  { %v509_v50 = vmax.f32 %v507_v48, 0.0  ;;  %v604_v52 = vsel %vm330_vm10, %v507_v48, %v603_v47 }
 0x465   :  { %605 = vrot.lane.b32.xlu2 %v604_v52, %s4086_s3 }
 0x466   :  { %v538_v54 = vsel %vm330_vm10, %v509_v50, %v537_v49 }
 0x467   :  { %539 = vrot.lane.b32.xlu1 %v538_v54, %s4086_s3 }
 0x46b   :  { %v391_v56 = vpop.permute.xlu1 %390 }
 0x46c   :  { %v393_v63 = vmul.f32 %v391_v56, %v374_v29 }
 0x46e   :  { %511 = vrot.lane.b32.xlu0 %v393_v63, %s4086_s3 }
 0x4bf   :  { %v606_v0 = vpop.permute.xlu2 %605 }
 0x4c0   :  { %3474 = vmatmul.msk.f32.vlgmr.msrb.gmra.mxu0 %vm5261_vm11, %v606_v0 }
 0x4c1   :  { %1184 = vmatpush.msrb.mxu0 %v4270_v58 }
 0x4c3   :  { %1185 = vmatpush.msrb.mxu0 %v4276_v60 }
 0x4c5   :  { %1186 = vmatpush.msrb.mxu0 %v4280_v62 }
 0x4c7   :  { %1187 = vmatpush.msrb.mxu0 %v4298_v17 }
 0x4d9   :  { %v540_v53 = vpop.permute.xlu1 %539 }
 0x4da   :  { %3472 = vmatmul.msk.f32.vlgmr.msrb.gmra.mxu3 %vm5261_vm11, %v540_v53 }
 0x4db   :  { %1155 = vmatpush.msrb.mxu3 %v4268_v57 }
 0x4dd   :  { %1156 = vmatpush.msrb.mxu3 %v4272_v59 }
 0x4df   :  { %1157 = vmatpush.msrb.mxu3 %v4278_v61 }
 0x4e0   :  { %v512_v2 = vpop.permute.xlu0 %511 }
 0x4e1   :  { %3471 = vmatmul.msk.f32.vlgmr.msrb.gmra.mxu2 %vm5261_vm11, %v512_v2  ;;  %1158 = vmatpush.msrb.mxu3 %v4296_v16 }
 0x4e2   :  { %1041 = vmatpush.msrb.mxu2 %v4209_v1 }
 0x4e4   :  { %1042 = vmatpush.msrb.mxu2 %v4218_v3 }
 0x4e6   :  { %1043 = vmatpush.msrb.mxu2 %v4224_v4 }
 0x4e8   :  { %1044 = vmatpush.msrb.mxu2 %v4231_v5 }
 0x53d   :  { %v626_v6 = vpop.f32.mrf.mxu0 }
 0x53e   :  { %v630_v8 = vrot.slane %v626_v6, 6  ;;  %v631_v9 = vrot.slane %v626_v6, 7 }
 0x540   :  { %v634_v10 = vadd.f32 %v630_v8, %v4253_v15  ;;  %v635_v11 = vadd.f32 %v631_v9, %v4250_v13 }
 0x542   :  { %3613 = vtanh.f32 %v634_v10  ;;  %v3475_v23 = vmul.f32 -1.442695, %v634_v10  ;;  %v3476_v28 = vmul.f32 -1.442695, %v635_v11 }
 0x543   :  { %3615 = vtanh.f32 %v635_v11 }
 0x548   :  { %v3614_v12 = vpop.eup %3613 }
 0x549   :  { %v3616_v14 = vpop.eup %3615  ;;  %686 = vrot.lane.b32.xlu2 %v3614_v12, %s4085_s7 }
 0x54a   :  { %688 = vrot.lane.b32.xlu0 %v3616_v14, %s4085_s7 }
 0x55d   :  { %v560_v18 = vpop.f32.mrf.mxu3 }
 0x564   :  { %v532_v19 = vpop.f32.mrf.mxu2 }
 0x565   :  { %v561_v20 = vadd.f32 %v560_v18, %v532_v19 }
 0x567   :  { %v563_v21 = vadd.f32 %v4332_v25, %v561_v20 }
 0x569   :  { %3617 = vtanh.f32 %v563_v21  ;;  %v3473_v47 = vmul.f32 -1.442695, %v563_v21 }
 0x56a   :  { %3619 = vpow2.f32 %v3475_v23  ;;  %v678_v23 = vrot.slane %v4342_v34, 7 }
 0x56f   :  { %v3618_v22 = vpop.eup %3617 }
 0x570   :  { %586 = vrot.lane.b32.xlu1 %v3618_v22, %s4085_s7  ;;  %v3620_v24 = vpop.eup %3619 }
 0x571   :  { %v642_v26 = vadd.f32 1.0, %v3620_v24 }
 0x573   :  { %3621 = vrcp.f32 %v642_v26  ;;  %v655_v36 = vand.u32 2147483648, %v642_v26  ;;  %vm649_vm9 = vweird.f32 %v642_v26  ;;  %v653_v37 = vand.u32 2147483647, %v642_v26 }
 0x574   :  { %3623 = vpow2.f32 %v3476_v28 }
 0x575   :  { %v656_v40 = vor.u32 1.1754944e-38, %v655_v36  ;;  %vm654_vm13 = vcmp.eq.f32.partialorder %v653_v37, 8.507059e+37 }
 0x579   :  { %v3622_v27 = vpop.eup %3621 }
 0x57a   :  { %v645_v29 = vmul.f32 %v3622_v27, %v642_v26  ;;  %v3624_v32 = vpop.eup %3623  ;;  %vm650_vm8 = vweird.f32 %v3622_v27 }
 0x57b   :  { %v643_v33 = vadd.f32 1.0, %v3624_v32  ;;  %vm651_vm12 = vmor %vm649_vm9, %vm650_vm8 }
 0x57c   :  { %v646_v30 = vsub.f32 1.0, %v645_v29  ;;  %v679_v29 = vrot.slane %v4347_v39, 7 }
 0x57d   :  { %3625 = vrcp.f32 %v643_v33  ;;  %v670_v49 = vand.u32 2147483648, %v643_v33  ;;  %vm664_vm15 = vweird.f32 %v643_v33  ;;  %v668_v50 = vand.u32 2147483647, %v643_v33 }
 0x57e   :  { %v647_v31 = vmul.f32 %v3622_v27, %v646_v30  ;;  %3627 = vpow2.f32 %v3473_v47 }
 0x57f   :  { %v671_v54 = vor.u32 1.1754944e-38, %v670_v49  ;;  %vm669_vm1 = vcmp.eq.f32.partialorder %v668_v50, 8.507059e+37 }
 0x580   :  { %v648_v35 = vadd.f32 %v3622_v27, %v647_v31 }
 0x582   :  { %v652_v38 = vsel %vm651_vm12, %v3622_v27, %v648_v35 }
 0x583   :  { %v4381_v55 = vsel %vm654_vm13, %v656_v40, %v652_v38  ;;  %v3626_v44 = vpop.eup %3625 }
 0x584   :  { %v660_v51 = vmul.f32 %v3626_v44, %v643_v33  ;;  %vm665_vm14 = vweird.f32 %v3626_v44  ;;  %v3628_v53 = vpop.eup %3627  ;;  %v682_v24 = vmul.f32 %v678_v23, %v4381_v55 }
 0x585   :  { %vm666_vm0 = vmor %vm664_vm15, %vm665_vm14  ;;  %v567_v2 = vadd.f32 1.0, %v3628_v53 }
 0x586   :  { %v661_v45 = vsub.f32 1.0, %v660_v51 }
 0x587   :  { %3629 = vrcp.f32 %v567_v2  ;;  %v579_v12 = vand.u32 2147483648, %v567_v2  ;;  %vm573_vm3 = vweird.f32 %v567_v2  ;;  %v577_v14 = vand.u32 2147483647, %v567_v2 }
 0x588   :  { %v662_v46 = vmul.f32 %v3626_v44, %v661_v45 }
 0x589   :  { %v580_v19 = vor.u32 1.1754944e-38, %v579_v12  ;;  %vm578_vm5 = vcmp.eq.f32.partialorder %v577_v14, 8.507059e+37 }
 0x58a   :  { %v663_v48 = vadd.f32 %v3626_v44, %v662_v46 }
 0x58c   :  { %v667_v52 = vsel %vm666_vm0, %v3626_v44, %v663_v48 }
 0x58d   :  { %v672_v56 = vsel %vm669_vm1, %v671_v54, %v667_v52  ;;  %v3630_v6 = vpop.eup %3629 }
 0x58e   :  { %v569_v8 = vmul.f32 %v3630_v6, %v567_v2  ;;  %vm574_vm2 = vweird.f32 %v3630_v6  ;;  %v683_v30 = vmul.f32 %v679_v29, %v672_v56 }
 0x58f   :  { %vm575_vm4 = vmor %vm573_vm3, %vm574_vm2 }
 0x590   :  { %v570_v9 = vsub.f32 1.0, %v569_v8 }
 0x592   :  { %v571_v10 = vmul.f32 %v3630_v6, %v570_v9 }
 0x594   :  { %v572_v11 = vadd.f32 %v3630_v6, %v571_v10 }
 0x596   :  { %v576_v18 = vsel %vm575_vm4, %v3630_v6, %v572_v11 }
 0x597   :  { %v581_v21 = vsel %vm578_vm5, %v580_v19, %v576_v18 }
 0x598   :  { %v584_v34 = vmul.f32 %v581_v21, %v4351_v42 }
 0x5a3   :  { %v687_v41 = vpop.permute.xlu2 %686 }
 0x5a4   :  { %v692_v43 = vmul.f32 %v687_v41, %v4381_v55 }
 0x5a6   :  { %696 = vrot.lane.b32.xlu2 %v692_v43, %s4086_s3 }
 0x5bc   :  { %v689_v63 = vpop.permute.xlu0 %688 }
 0x5bd   :  { %v693_v0 = vmul.f32 %v689_v63, %v672_v56 }
 0x5bf   :  { %698 = vrot.lane.b32.xlu0 %v693_v0, %s4086_s3 }
 0x5e2   :  { %v587_v20 = vpop.permute.xlu1 %586 }
 0x5e3   :  { %v589_v22 = vmul.f32 %v587_v20, %v581_v21 }
 0x5e5   :  { %591 = vrot.lane.b32.xlu1 %v589_v22, %s4086_s3 }
 0x600   :  { %v697_v26 = vpop.permute.xlu2 %696 }
 0x601   :  { %v4389_v27 = vadd.f32 %v697_v26, %v682_v24 }
 0x603   :  { %3631 = vtanh.f32 %v4389_v27 }
 0x609   :  { %v3632_v28 = vpop.eup %3631 }
 0x60a   :  { %708 = vrot.lane.b32.xlu2 %v3632_v28, %s4085_s7 }
 0x631   :  { %v699_v31 = vpop.permute.xlu0 %698 }
 0x632   :  { %v4394_v32 = vadd.f32 %v699_v31, %v683_v30 }
 0x634   :  { %3633 = vtanh.f32 %v4394_v32 }
 0x63a   :  { %v3634_v33 = vpop.eup %3633 }
 0x63b   :  { %710 = vrot.lane.b32.xlu0 %v3634_v33, %s4085_s7 }
 0x657   :  { %v592_v35 = vpop.permute.xlu1 %591 }
 0x658   :  { %v4399_v36 = vadd.f32 %v592_v35, %v584_v34 }
 0x65a   :  { %3635 = vtanh.f32 %v4399_v36 }
 0x660   :  { %v3636_v37 = vpop.eup %3635 }
 0x661   :  { %597 = vrot.lane.b32.xlu1 %v3636_v37, %s4085_s7 }
 0x664   :  { %v709_v39 = vpop.permute.xlu2 %708 }
 0x665   :  { %v714_v38 = vmul.f32 %v709_v39, %v4381_v55 }
 0x667   :  { %v716_v41 = vmax.f32 %v714_v38, 0.0  ;;  %v812_v44 = vrot.slane %v714_v38, 2 }
 0x669   :  { %v745_v46 = vrot.slane %v716_v41, 2 }
 0x6ad   :  { %v711_v40 = vpop.permute.xlu0 %710 }
 0x6ae   :  { %v715_v43 = vmul.f32 %v711_v40, %v672_v56 }
 0x6b0   :  { %v717_v51 = vmax.f32 %v715_v43, 0.0  ;;  %v813_v45 = vrot.slane %v715_v43, 1 }
 0x6b2   :  { %v746_v47 = vrot.slane %v717_v51, 1  ;;  %v814_v42 = vsel %vm330_vm10, %v813_v45, %v812_v44 }
 0x6b3   :  { %815 = vrot.lane.b32.xlu2 %v814_v42, %s4086_s3 }
 0x6b4   :  { %v747_v48 = vsel %vm330_vm10, %v746_v47, %v745_v46 }
 0x6b5   :  { %748 = vrot.lane.b32.xlu0 %v747_v48, %s4086_s3 }
 0x6d3   :  { %v598_v49 = vpop.permute.xlu1 %597 }
 0x6d4   :  { %v600_v50 = vmul.f32 %v598_v49, %v581_v21 }
 0x6d6   :  { %719 = vrot.lane.b32.xlu1 %v600_v50, %s4086_s3 }
 0x70d   :  { %v816_v55 = vpop.permute.xlu2 %815 }
 0x70e   :  { %3480 = vmatmul.msk.f32.vlgmr.msra.gmra.mxu3 %vm5261_vm11, %v816_v55 }
 0x70f   :  { %1394 = vmatpush.msra.mxu3 %v4270_v58 }
 0x711   :  { %1395 = vmatpush.msra.mxu3 %v4276_v60 }
 0x713   :  { %1396 = vmatpush.msra.mxu3 %v4280_v62 }
 0x715   :  { %1397 = vmatpush.msra.mxu3 %v4298_v17 }
 0x727   :  { %v749_v52 = vpop.permute.xlu0 %748 }
 0x728   :  { %3478 = vmatmul.msk.f32.vlgmr.msra.gmra.mxu2 %vm5261_vm11, %v749_v52 }
 0x729   :  { %1365 = vmatpush.msra.mxu2 %v4268_v57 }
 0x72b   :  { %1366 = vmatpush.msra.mxu2 %v4272_v59 }
 0x72d   :  { %1367 = vmatpush.msra.mxu2 %v4278_v61 }
 0x72f   :  { %1368 = vmatpush.msra.mxu2 %v4296_v16 }
 0x748   :  { %v720_v54 = vpop.permute.xlu1 %719 }
 0x749   :  { %3477 = vmatmul.msk.f32.vlgmr.msra.gmra.mxu1 %vm5261_vm11, %v720_v54 }
 0x74a   :  { %1251 = vmatpush.msra.mxu1 %v4209_v1 }
 0x74c   :  { %1252 = vmatpush.msra.mxu1 %v4218_v3 }
 0x74e   :  { %1253 = vmatpush.msra.mxu1 %v4224_v4 }
 0x750   :  { %1254 = vmatpush.msra.mxu1 %v4231_v5 }
 0x791   :  { %v836_v56 = vpop.f32.mrf.mxu3 }
 0x792   :  { %v840_v63 = vrot.slane %v836_v56, 5  ;;  %v841_v0 = vrot.slane %v836_v56, 6 }
 0x794   :  { %v844_v53 = vadd.f32 %v840_v63, %v4253_v15  ;;  %v845_v2 = vadd.f32 %v841_v0, %v4250_v13 }
 0x796   :  { %3637 = vtanh.f32 %v844_v53  ;;  %v3481_v9 = vmul.f32 -1.442695, %v844_v53  ;;  %v3482_v18 = vmul.f32 -1.442695, %v845_v2 }
 0x797   :  { %3639 = vtanh.f32 %v845_v2 }
 0x79c   :  { %v3638_v6 = vpop.eup %3637 }
 0x79d   :  { %v3640_v8 = vpop.eup %3639  ;;  %896 = vrot.lane.b32.xlu2 %v3638_v6, %s4085_s7 }
 0x79e   :  { %898 = vrot.lane.b32.xlu0 %v3640_v8, %s4085_s7 }
 0x7ab   :  { %v769_v1 = vpop.f32.mrf.mxu2 }
 0x7c6   :  { %v740_v3 = vpop.f32.mrf.mxu1 }
 0x7c7   :  { %v770_v4 = vadd.f32 %v769_v1, %v740_v3  ;;  %v888_v3 = vrot.slane %v4389_v27, 7 }
 0x7c9   :  { %v772_v5 = vadd.f32 %v4332_v25, %v770_v4 }
 0x7cb   :  { %3641 = vtanh.f32 %v772_v5  ;;  %v3479_v42 = vmul.f32 -1.442695, %v772_v5 }
 0x7cc   :  { %3643 = vpow2.f32 %v3481_v9 }
 0x7d1   :  { %v3642_v10 = vpop.eup %3641 }
 0x7d2   :  { %795 = vrot.lane.b32.xlu1 %v3642_v10, %s4085_s7  ;;  %v3644_v11 = vpop.eup %3643 }
 0x7d3   :  { %v852_v12 = vadd.f32 1.0, %v3644_v11  ;;  %v889_v11 = vrot.slane %v4394_v32, 7 }
 0x7d5   :  { %3645 = vrcp.f32 %v852_v12  ;;  %v865_v26 = vand.u32 2147483648, %v852_v12  ;;  %vm859_vm7 = vweird.f32 %v852_v12  ;;  %v863_v28 = vand.u32 2147483647, %v852_v12 }
 0x7d6   :  { %3647 = vpow2.f32 %v3482_v18 }
 0x7d7   :  { %v866_v30 = vor.u32 1.1754944e-38, %v865_v26  ;;  %vm864_vm9 = vcmp.eq.f32.partialorder %v863_v28, 8.507059e+37 }
 0x7db   :  { %v3646_v14 = vpop.eup %3645 }
 0x7dc   :  { %v855_v19 = vmul.f32 %v3646_v14, %v852_v12  ;;  %v3648_v22 = vpop.eup %3647  ;;  %vm860_vm6 = vweird.f32 %v3646_v14 }
 0x7dd   :  { %v853_v23 = vadd.f32 1.0, %v3648_v22  ;;  %vm861_vm8 = vmor %vm859_vm7, %vm860_vm6 }
 0x7de   :  { %v856_v20 = vsub.f32 1.0, %v855_v19 }
 0x7df   :  { %3649 = vrcp.f32 %v853_v23  ;;  %v880_v41 = vand.u32 2147483648, %v853_v23  ;;  %vm874_vm13 = vweird.f32 %v853_v23  ;;  %v878_v43 = vand.u32 2147483647, %v853_v23 }
 0x7e0   :  { %v857_v21 = vmul.f32 %v3646_v14, %v856_v20  ;;  %3651 = vpow2.f32 %v3479_v42 }
 0x7e1   :  { %v881_v51 = vor.u32 1.1754944e-38, %v880_v41  ;;  %vm879_vm15 = vcmp.eq.f32.partialorder %v878_v43, 8.507059e+37 }
 0x7e2   :  { %v858_v24 = vadd.f32 %v3646_v14, %v857_v21 }
 0x7e4   :  { %v862_v29 = vsel %vm861_vm8, %v3646_v14, %v858_v24 }
 0x7e5   :  { %v4430_v33 = vsel %vm864_vm9, %v866_v30, %v862_v29  ;;  %v3650_v35 = vpop.eup %3649 }
 0x7e6   :  { %v870_v37 = vmul.f32 %v3650_v35, %v853_v23  ;;  %vm875_vm12 = vweird.f32 %v3650_v35  ;;  %v3652_v48 = vpop.eup %3651  ;;  %v892_v4 = vmul.f32 %v888_v3, %v4430_v33 }
 0x7e7   :  { %vm876_vm14 = vmor %vm874_vm13, %vm875_vm12  ;;  %v776_v49 = vadd.f32 1.0, %v3652_v48 }
 0x7e8   :  { %v871_v39 = vsub.f32 1.0, %v870_v37 }
 0x7e9   :  { %3653 = vrcp.f32 %v776_v49  ;;  %v788_v63 = vand.u32 2147483648, %v776_v49  ;;  %vm782_vm1 = vweird.f32 %v776_v49  ;;  %v786_v0 = vand.u32 2147483647, %v776_v49 }
 0x7ea   :  { %v872_v38 = vmul.f32 %v3650_v35, %v871_v39 }
 0x7eb   :  { %v789_v2 = vor.u32 1.1754944e-38, %v788_v63  ;;  %vm787_vm3 = vcmp.eq.f32.partialorder %v786_v0, 8.507059e+37 }
 0x7ec   :  { %v873_v40 = vadd.f32 %v3650_v35, %v872_v38 }
 0x7ee   :  { %v877_v44 = vsel %vm876_vm14, %v3650_v35, %v873_v40 }
 0x7ef   :  { %v882_v46 = vsel %vm879_vm15, %v881_v51, %v877_v44  ;;  %v3654_v50 = vpop.eup %3653 }
 0x7f0   :  { %v778_v55 = vmul.f32 %v3654_v50, %v776_v49  ;;  %vm783_vm0 = vweird.f32 %v3654_v50  ;;  %v893_v12 = vmul.f32 %v889_v11, %v882_v46 }
 0x7f1   :  { %vm784_vm2 = vmor %vm782_vm1, %vm783_vm0 }
 0x7f2   :  { %v779_v52 = vsub.f32 1.0, %v778_v55 }
 0x7f4   :  { %v780_v54 = vmul.f32 %v3654_v50, %v779_v52 }
 0x7f6   :  { %v781_v56 = vadd.f32 %v3654_v50, %v780_v54 }
 0x7f7   :  { %v897_v31 = vpop.permute.xlu2 %896 }
 0x7f8   :  { %v902_v34 = vmul.f32 %v897_v31, %v4430_v33  ;;  %v785_v53 = vsel %vm784_vm2, %v3654_v50, %v781_v56 }
 0x7f9   :  { %v790_v8 = vsel %vm787_vm3, %v789_v2, %v785_v53 }
 0x7fa   :  { %906 = vrot.lane.b32.xlu2 %v902_v34, %s4086_s3  ;;  %v793_v27 = vmul.f32 %v790_v8, %v4399_v36 }
 0x810   :  { %v899_v45 = vpop.permute.xlu0 %898 }
 0x811   :  { %v903_v47 = vmul.f32 %v899_v45, %v882_v46 }
 0x813   :  { %908 = vrot.lane.b32.xlu0 %v903_v47, %s4086_s3 }
 0x844   :  { %v796_v6 = vpop.permute.xlu1 %795 }
 0x845   :  { %v798_v1 = vmul.f32 %v796_v6, %v790_v8 }
 0x847   :  { %800 = vrot.lane.b32.xlu1 %v798_v1, %s4086_s3 }
 0x854   :  { %v907_v5 = vpop.permute.xlu2 %906 }
 0x855   :  { %v4438_v9 = vadd.f32 %v907_v5, %v892_v4 }
 0x857   :  { %3655 = vtanh.f32 %v4438_v9 }
 0x85d   :  { %v3656_v10 = vpop.eup %3655 }
 0x85e   :  { %918 = vrot.lane.b32.xlu2 %v3656_v10, %s4085_s7 }
 0x885   :  { %v909_v14 = vpop.permute.xlu0 %908 }
 0x886   :  { %v4443_v18 = vadd.f32 %v909_v14, %v893_v12 }
 0x888   :  { %3657 = vtanh.f32 %v4443_v18 }
 0x88e   :  { %v3658_v19 = vpop.eup %3657 }
 0x88f   :  { %920 = vrot.lane.b32.xlu0 %v3658_v19, %s4085_s7 }
 0x8b8   :  { %v919_v32 = vpop.permute.xlu2 %918 }
 0x8b9   :  { %v801_v20 = vpop.permute.xlu1 %800  ;;  %v924_v23 = vmul.f32 %v919_v32, %v4430_v33 }
 0x8ba   :  { %v4448_v21 = vadd.f32 %v801_v20, %v793_v27 }
 0x8bb   :  { %v926_v26 = vmax.f32 %v924_v23, 0.0  ;;  %v1022_v29 = vrot.slane %v924_v23, 3 }
 0x8bc   :  { %3659 = vtanh.f32 %v4448_v21 }
 0x8bd   :  { %v955_v34 = vrot.slane %v926_v26, 3 }
 0x8c2   :  { %v3660_v22 = vpop.eup %3659 }
 0x8c3   :  { %806 = vrot.lane.b32.xlu1 %v3660_v22, %s4085_s7 }
 0x901   :  { %v921_v24 = vpop.permute.xlu0 %920 }
 0x902   :  { %v925_v28 = vmul.f32 %v921_v24, %v882_v46 }
 0x904   :  { %v927_v30 = vmax.f32 %v925_v28, 0.0  ;;  %v1023_v31 = vrot.slane %v925_v28, 2 }
 0x906   :  { %v956_v35 = vrot.slane %v927_v30, 2  ;;  %v1024_v36 = vsel %vm330_vm10, %v1023_v31, %v1022_v29 }
 0x907   :  { %1025 = vrot.lane.b32.xlu2 %v1024_v36, %s4086_s3 }
 0x908   :  { %v957_v37 = vsel %vm330_vm10, %v956_v35, %v955_v34 }
 0x909   :  { %958 = vrot.lane.b32.xlu1 %v957_v37, %s4086_s3 }
 0x935   :  { %v807_v39 = vpop.permute.xlu1 %806 }
 0x936   :  { %v809_v38 = vmul.f32 %v807_v39, %v790_v8 }
 0x938   :  { %929 = vrot.lane.b32.xlu0 %v809_v38, %s4086_s3 }
 0x961   :  { %v1026_v33 = vpop.permute.xlu2 %1025 }
 0x962   :  { %3486 = vmatmul.msk.f32.vlgmr.msrb.gmra.mxu2 %vm5261_vm11, %v1026_v33 }
 0x963   :  { %1604 = vmatpush.msrb.mxu2 %v4270_v58  ;;  %v4472_v58 = vld [vmem:[%s5247_s2 + $0x18] sm:$0xff] }
 0x965   :  { %1605 = vmatpush.msrb.mxu2 %v4276_v60  ;;  %v4490_v60 = vld [vmem:[%s5247_s2] sm:$0xff] }
 0x967   :  { %1606 = vmatpush.msrb.mxu2 %v4280_v62 }
 0x969   :  { %1607 = vmatpush.msrb.mxu2 %v4298_v17 }
 0x97b   :  { %v959_v40 = vpop.permute.xlu1 %958 }
 0x97c   :  { %3484 = vmatmul.msk.f32.vlgmr.msrb.gmra.mxu1 %vm5261_vm11, %v959_v40 }
 0x97d   :  { %1575 = vmatpush.msrb.mxu1 %v4268_v57  ;;  %v4478_v57 = vld [vmem:[%s5247_s2 + $0x10] sm:$0xff] }
 0x97f   :  { %1576 = vmatpush.msrb.mxu1 %v4272_v59  ;;  %v4484_v59 = vld [vmem:[%s5247_s2 + $0x8] sm:$0xff] }
 0x981   :  { %1577 = vmatpush.msrb.mxu1 %v4278_v61 }
 0x983   :  { %1578 = vmatpush.msrb.mxu1 %v4296_v16 }
 0x9aa   :  { %v930_v41 = vpop.permute.xlu0 %929 }
 0x9ab   :  { %3483 = vmatmul.msk.f32.vlgmr.msra.gmra.mxu0 %vm5261_vm11, %v930_v41 }
 0x9ac   :  { %1461 = vmatpush.msra.mxu0 %v4472_v58 }
 0x9ae   :  { %1462 = vmatpush.msra.mxu0 %v4478_v57 }
 0x9b0   :  { %1463 = vmatpush.msra.mxu0 %v4484_v59 }
 0x9b2   :  { %1464 = vmatpush.msra.mxu0 %v4490_v60 }
 0x9e5   :  { %v1046_v61 = vpop.f32.mrf.mxu2 }
 0x9e6   :  { %v1050_v62 = vrot.slane %v1046_v61, 4  ;;  %v1051_v16 = vrot.slane %v1046_v61, 5  ;;  %v1098_v61 = vrot.slane %v4438_v9, 7 }
 0x9e8   :  { %v1054_v17 = vadd.f32 %v1050_v62, %v4253_v15  ;;  %v1055_v43 = vadd.f32 %v1051_v16, %v4250_v13 }
 0x9ea   :  { %3661 = vtanh.f32 %v1054_v17  ;;  %v3487_v45 = vmul.f32 -1.442695, %v1054_v17  ;;  %v3488_v54 = vmul.f32 -1.442695, %v1055_v43 }
 0x9eb   :  { %3663 = vtanh.f32 %v1055_v43 }
 0x9ec   :  { %3665 = vpow2.f32 %v3487_v45 }
 0x9f0   :  { %v3662_v44 = vpop.eup %3661 }
 0x9f1   :  { %v3664_v51 = vpop.eup %3663  ;;  %1106 = vrot.lane.b32.xlu2 %v3662_v44, %s4085_s7 }
 0x9f2   :  { %1108 = vrot.lane.b32.xlu0 %v3664_v51, %s4085_s7  ;;  %v3666_v46 = vpop.eup %3665 }
 0x9f3   :  { %v1062_v49 = vadd.f32 1.0, %v3666_v46  ;;  %v1099_v46 = vrot.slane %v4443_v18, 7 }
 0x9f5   :  { %v1075_v8 = vand.u32 2147483648, %v1062_v49  ;;  %vm1069_vm5 = vweird.f32 %v1062_v49  ;;  %v1073_v1 = vand.u32 2147483647, %v1062_v49 }
 0x9f7   :  { %v1076_v3 = vor.u32 1.1754944e-38, %v1075_v8  ;;  %vm1074_vm7 = vcmp.eq.f32.partialorder %v1073_v1, 8.507059e+37 }
 0x9f9   :  { %v979_v47 = vpop.f32.mrf.mxu1 }
 0xa28   :  { %v950_v42 = vpop.f32.mrf.mxu0 }
 0xa29   :  { %v980_v48 = vadd.f32 %v979_v47, %v950_v42 }
 0xa2b   :  { %v982_v50 = vadd.f32 %v4332_v25, %v980_v48 }
 0xa2d   :  { %3667 = vtanh.f32 %v982_v50  ;;  %v3485_v29 = vmul.f32 -1.442695, %v982_v50 }
 0xa2e   :  { %3669 = vrcp.f32 %v1062_v49 }
 0xa2f   :  { %3671 = vpow2.f32 %v3488_v54 }
 0xa33   :  { %v3668_v55 = vpop.eup %3667 }
 0xa34   :  { %1005 = vrot.lane.b32.xlu1 %v3668_v55, %s4085_s7  ;;  %v3670_v52 = vpop.eup %3669 }
 0xa35   :  { %v1065_v56 = vmul.f32 %v3670_v52, %v1062_v49  ;;  %v3672_v53 = vpop.eup %3671  ;;  %vm1070_vm4 = vweird.f32 %v3670_v52 }
 0xa36   :  { %v1063_v2 = vadd.f32 1.0, %v3672_v53  ;;  %vm1071_vm6 = vmor %vm1069_vm5, %vm1070_vm4 }
 0xa37   :  { %v1066_v63 = vsub.f32 1.0, %v1065_v56 }
 0xa38   :  { %3673 = vrcp.f32 %v1063_v2  ;;  %v1090_v20 = vand.u32 2147483648, %v1063_v2  ;;  %vm1084_vm9 = vweird.f32 %v1063_v2  ;;  %v1088_v22 = vand.u32 2147483647, %v1063_v2 }
 0xa39   :  { %v1067_v0 = vmul.f32 %v3670_v52, %v1066_v63  ;;  %3675 = vpow2.f32 %v3485_v29 }
 0xa3a   :  { %v1091_v23 = vor.u32 1.1754944e-38, %v1090_v20  ;;  %vm1089_vm13 = vcmp.eq.f32.partialorder %v1088_v22, 8.507059e+37  ;;  %v3902_v20 = vld [vmem:[#allocation4 + $0x10] sm:$0xff]  ;;  %v3903_v22 = vld [vmem:[#allocation4 + $0x8] sm:$0xff] }
 0xa3b   :  { %v1068_v6 = vadd.f32 %v3670_v52, %v1067_v0 }
 0xa3d   :  { %v1072_v25 = vsel %vm1071_vm6, %v3670_v52, %v1068_v6 }
 0xa3e   :  { %v4499_v5 = vsel %vm1074_vm7, %v1076_v3, %v1072_v25  ;;  %v3674_v11 = vpop.eup %3673 }
 0xa3f   :  { %v1080_v12 = vmul.f32 %v3674_v11, %v1063_v2  ;;  %vm1085_vm8 = vweird.f32 %v3674_v11  ;;  %v3676_v30 = vpop.eup %3675  ;;  %v1102_v17 = vmul.f32 %v1098_v61, %v4499_v5 }
 0xa40   :  { %vm1086_vm12 = vmor %vm1084_vm9, %vm1085_vm8  ;;  %v986_v31 = vadd.f32 1.0, %v3676_v30 }
 0xa41   :  { %v1081_v14 = vsub.f32 1.0, %v1080_v12  ;;  %v3899_v12 = vld [vmem:[#allocation2 + $0x8] sm:$0xff] }
 0xa42   :  { %3677 = vrcp.f32 %v986_v31  ;;  %v998_v38 = vand.u32 2147483648, %v986_v31  ;;  %vm992_vm15 = vweird.f32 %v986_v31  ;;  %v996_v33 = vand.u32 2147483647, %v986_v31 }
 0xa43   :  { %v1082_v19 = vmul.f32 %v3674_v11, %v1081_v14  ;;  %v3900_v14 = vld [vmem:[#allocation2] sm:$0xff] }
 0xa44   :  { %v999_v41 = vor.u32 1.1754944e-38, %v998_v38  ;;  %vm997_vm1 = vcmp.eq.f32.partialorder %v996_v33, 8.507059e+37 }
 0xa45   :  { %v1083_v27 = vadd.f32 %v3674_v11, %v1082_v19 }
 0xa47   :  { %v1087_v32 = vsel %vm1086_vm12, %v3674_v11, %v1083_v27  ;;  %v3898_v11 = vld [vmem:[#allocation2 + $0x10] sm:$0xff]  ;;  %v3901_v27 = vld [vmem:[#allocation4 + $0x18] sm:$0xff] }
 0xa48   :  { %v1092_v24 = vsel %vm1089_vm13, %v1091_v23, %v1087_v32  ;;  %v3678_v34 = vpop.eup %3677  ;;  %v3904_v32 = vld [vmem:[#allocation4] sm:$0xff] }
 0xa49   :  { %v988_v35 = vmul.f32 %v3678_v34, %v986_v31  ;;  %vm993_vm14 = vweird.f32 %v3678_v34  ;;  %v1103_v47 = vmul.f32 %v1099_v46, %v1092_v24 }
 0xa4a   :  { %vm994_vm0 = vmor %vm992_vm15, %vm993_vm14 }
 0xa4b   :  { %v1107_v4 = vpop.permute.xlu2 %1106  ;;  %v989_v36 = vsub.f32 1.0, %v988_v35 }
 0xa4c   :  { %v1112_v10 = vmul.f32 %v1107_v4, %v4499_v5 }
 0xa4d   :  { %v990_v37 = vmul.f32 %v3678_v34, %v989_v36 }
 0xa4e   :  { %1116 = vrot.lane.b32.xlu2 %v1112_v10, %s4086_s3  ;;  %v3897_v10 = vld [vmem:[#allocation2 + $0x18] sm:$0xff] }
 0xa4f   :  { %v991_v39 = vadd.f32 %v3678_v34, %v990_v37 }
 0xa51   :  { %v995_v40 = vsel %vm994_vm0, %v3678_v34, %v991_v39 }
 0xa52   :  { %v1000_v16 = vsel %vm997_vm1, %v999_v41, %v995_v40 }
 0xa53   :  { %v1003_v49 = vmul.f32 %v1000_v16, %v4448_v21 }
 0xa64   :  { %v1109_v26 = vpop.permute.xlu0 %1108 }
 0xa65   :  { %v1113_v28 = vmul.f32 %v1109_v26, %v1092_v24 }
 0xa67   :  { %1118 = vrot.lane.b32.xlu0 %v1113_v28, %s4086_s3 }
 0xaa6   :  { %v1006_v62 = vpop.permute.xlu1 %1005 }
 0xaa7   :  { %v1008_v43 = vmul.f32 %v1006_v62, %v1000_v16 }
 0xaa8   :  { %v1117_v44 = vpop.permute.xlu2 %1116 }
 0xaa9   :  { %v4506_v51 = vadd.f32 %v1117_v44, %v1102_v17  ;;  %1010 = vrot.lane.b32.xlu1 %v1008_v43, %s4086_s3 }
 0xaab   :  { %3679 = vtanh.f32 %v4506_v51 }
 0xab1   :  { %v3680_v45 = vpop.eup %3679 }
 0xab2   :  { %1128 = vrot.lane.b32.xlu2 %v3680_v45, %s4085_s7 }
 0xad9   :  { %v1119_v9 = vpop.permute.xlu0 %1118 }
 0xada   :  { %v4512_v42 = vadd.f32 %v1119_v9, %v1103_v47 }
 0xadc   :  { %3681 = vtanh.f32 %v4512_v42 }
 0xae2   :  { %v3682_v48 = vpop.eup %3681 }
 0xae3   :  { %1130 = vrot.lane.b32.xlu0 %v3682_v48, %s4085_s7 }
 0xb0c   :  { %v1129_v18 = vpop.permute.xlu2 %1128 }
 0xb0d   :  { %v1134_v54 = vmul.f32 %v1129_v18, %v4499_v5 }
 0xb0f   :  { %v1136_v63 = vmax.f32 %v1134_v54, 0.0  ;;  %v1232_v53 = vrot.slane %v1134_v54, 4 }
 0xb11   :  { %v1165_v8 = vrot.slane %v1136_v63, 4 }
 0xb1b   :  { %v1011_v50 = vpop.permute.xlu1 %1010 }
 0xb1c   :  { %v4517_v55 = vadd.f32 %v1011_v50, %v1003_v49 }
 0xb1e   :  { %3683 = vtanh.f32 %v4517_v55 }
 0xb24   :  { %v3684_v52 = vpop.eup %3683 }
 0xb25   :  { %1016 = vrot.lane.b32.xlu1 %v3684_v52, %s4085_s7 }
 0xb55   :  { %v1131_v56 = vpop.permute.xlu0 %1130 }
 0xb56   :  { %v1135_v0 = vmul.f32 %v1131_v56, %v1092_v24 }
 0xb58   :  { %v1137_v2 = vmax.f32 %v1135_v0, 0.0  ;;  %v1233_v6 = vrot.slane %v1135_v0, 3 }
 0xb5a   :  { %v1166_v1 = vrot.slane %v1137_v2, 3  ;;  %v1234_v21 = vsel %vm330_vm10, %v1233_v6, %v1232_v53 }
 0xb5b   :  { %1235 = vrot.lane.b32.xlu2 %v1234_v21, %s4086_s3 }
 0xb5c   :  { %v1167_v25 = vsel %vm330_vm10, %v1166_v1, %v1165_v8 }
 0xb5d   :  { %1168 = vrot.lane.b32.xlu1 %v1167_v25, %s4086_s3 }
 0xb97   :  { %v1017_v3 = vpop.permute.xlu1 %1016 }
 0xb98   :  { %v1019_v4 = vmul.f32 %v1017_v3, %v1000_v16  ;;  %v4541_v16 = vld [vmem:[%s5251_s6] ss:$0 sm:$0xff] }
 0xb9a   :  { %1139 = vrot.lane.b32.xlu0 %v1019_v4, %s4086_s3  ;;  %v1308_v4 = vrot.slane %v4506_v51, 7 }
 0xbb5   :  { %v1236_v5 = vpop.permute.xlu2 %1235 }
 0xbb6   :  { %3492 = vmatmul.msk.f32.vlgmr.msra.gmra.mxu1 %vm5261_vm11, %v1236_v5 }
 0xbb7   :  { %1814 = vmatpush.msra.mxu1 %v3897_v10 }
 0xbb9   :  { %1815 = vmatpush.msra.mxu1 %v3898_v11 }
 0xbbb   :  { %1816 = vmatpush.msra.mxu1 %v3899_v12 }
 0xbbd   :  { %1817 = vmatpush.msra.mxu1 %v3900_v14 }
 0xbcf   :  { %v1169_v19 = vpop.permute.xlu1 %1168 }
 0xbd0   :  { %3490 = vmatmul.msk.f32.vlgmr.msrb.gmra.mxu0 %vm5261_vm11, %v1169_v19 }
 0xbd1   :  { %1785 = vmatpush.msrb.mxu0 %v3901_v27 }
 0xbd3   :  { %1786 = vmatpush.msrb.mxu0 %v3902_v20 }
 0xbd5   :  { %1787 = vmatpush.msrb.mxu0 %v3903_v22 }
 0xbd7   :  { %1788 = vmatpush.msrb.mxu0 %v3904_v32 }
 0xc0c   :  { %v1140_v23 = vpop.permute.xlu0 %1139 }
 0xc0d   :  { %3489 = vmatmul.msk.f32.vlgmr.msrb.gmra.mxu3 %vm5261_vm11, %v1140_v23 }
 0xc0e   :  { %1671 = vmatpush.msrb.mxu3 %v4472_v58 }
 0xc10   :  { %1672 = vmatpush.msrb.mxu3 %v4478_v57 }
 0xc12   :  { %1673 = vmatpush.msrb.mxu3 %v4484_v59 }
 0xc14   :  { %1674 = vmatpush.msrb.mxu3 %v4490_v60 }
 0xc33   :  { %v1256_v24 = vpop.f32.mrf.mxu1 }
 0xc34   :  { %v1260_v26 = vrot.slane %v1256_v24, 3  ;;  %v1261_v28 = vrot.slane %v1256_v24, 4 }
 0xc36   :  { %v1264_v29 = vadd.f32 %v1260_v26, %v4253_v15  ;;  %v1265_v30 = vadd.f32 %v1261_v28, %v4250_v13 }
 0xc38   :  { %3685 = vtanh.f32 %v1264_v29  ;;  %v3493_v58 = vmul.f32 -1.442695, %v1264_v29  ;;  %v3494_v35 = vmul.f32 -1.442695, %v1265_v30 }
 0xc39   :  { %3687 = vtanh.f32 %v1265_v30  ;;  %v1309_v30 = vrot.slane %v4512_v42, 7 }
 0xc3a   :  { %3689 = vpow2.f32 %v3493_v58 }
 0xc3e   :  { %v3686_v31 = vpop.eup %3685 }
 0xc3f   :  { %v3688_v34 = vpop.eup %3687  ;;  %1316 = vrot.lane.b32.xlu2 %v3686_v31, %s4085_s7 }
 0xc40   :  { %1318 = vrot.lane.b32.xlu0 %v3688_v34, %s4085_s7  ;;  %v3690_v57 = vpop.eup %3689 }
 0xc41   :  { %v1272_v59 = vadd.f32 1.0, %v3690_v57 }
 0xc43   :  { %3691 = vrcp.f32 %v1272_v59  ;;  %v1285_v43 = vand.u32 2147483648, %v1272_v59  ;;  %vm1279_vm3 = vweird.f32 %v1272_v59  ;;  %v1283_v44 = vand.u32 2147483647, %v1272_v59 }
 0xc44   :  { %3693 = vpow2.f32 %v3494_v35 }
 0xc45   :  { %v1286_v46 = vor.u32 1.1754944e-38, %v1285_v43  ;;  %vm1284_vm5 = vcmp.eq.f32.partialorder %v1283_v44, 8.507059e+37 }
 0xc49   :  { %v3692_v60 = vpop.eup %3691 }
 0xc4a   :  { %v1275_v36 = vmul.f32 %v3692_v60, %v1272_v59  ;;  %v3694_v38 = vpop.eup %3693  ;;  %vm1280_vm2 = vweird.f32 %v3692_v60 }
 0xc4b   :  { %v1273_v61 = vadd.f32 1.0, %v3694_v38  ;;  %vm1281_vm4 = vmor %vm1279_vm3, %vm1280_vm2 }
 0xc4c   :  { %v1276_v37 = vsub.f32 1.0, %v1275_v36 }
 0xc4d   :  { %v1189_v33 = vpop.f32.mrf.mxu0  ;;  %v1300_v63 = vand.u32 2147483648, %v1273_v61  ;;  %vm1294_vm7 = vweird.f32 %v1273_v61  ;;  %v1298_v0 = vand.u32 2147483647, %v1273_v61 }
 0xc4e   :  { %v1277_v39 = vmul.f32 %v3692_v60, %v1276_v37 }
 0xc4f   :  { %v1301_v2 = vor.u32 1.1754944e-38, %v1300_v63  ;;  %vm1299_vm9 = vcmp.eq.f32.partialorder %v1298_v0, 8.507059e+37 }
 0xc50   :  { %v1278_v62 = vadd.f32 %v3692_v60, %v1277_v39 }
 0xc52   :  { %v1282_v45 = vsel %vm1281_vm4, %v3692_v60, %v1278_v62 }
 0xc53   :  { %v4544_v9 = vsel %vm1284_vm5, %v1286_v46, %v1282_v45 }
 0xc54   :  { %v1312_v5 = vmul.f32 %v1308_v4, %v4544_v9 }
 0xc90   :  { %v1160_v40 = vpop.f32.mrf.mxu3 }
 0xc91   :  { %v1190_v41 = vadd.f32 %v1189_v33, %v1160_v40 }
 0xc93   :  { %v1192_v17 = vadd.f32 %v4541_v16, %v1190_v41 }
 0xc95   :  { %3695 = vtanh.f32 %v1192_v17  ;;  %v3491_v21 = vmul.f32 -1.442695, %v1192_v17 }
 0xc96   :  { %3697 = vrcp.f32 %v1273_v61 }
 0xc97   :  { %3699 = vpow2.f32 %v3491_v21 }
 0xc99   :  { %v1317_v47 = vpop.permute.xlu2 %1316 }
 0xc9a   :  { %v1322_v48 = vmul.f32 %v1317_v47, %v4544_v9 }
 0xc9b   :  { %v3696_v49 = vpop.eup %3695 }
 0xc9c   :  { %v3698_v50 = vpop.eup %3697  ;;  %1326 = vrot.lane.b32.xlu2 %v1322_v48, %s4086_s3  ;;  %1215 = vrot.lane.b32.xlu1 %v3696_v49, %s4085_s7 }
 0xc9d   :  { %v1290_v52 = vmul.f32 %v3698_v50, %v1273_v61  ;;  %vm1295_vm6 = vweird.f32 %v3698_v50  ;;  %v3700_v25 = vpop.eup %3699 }
 0xc9e   :  { %vm1296_vm8 = vmor %vm1294_vm7, %vm1295_vm6  ;;  %v1196_v3 = vadd.f32 1.0, %v3700_v25 }
 0xc9f   :  { %v1291_v18 = vsub.f32 1.0, %v1290_v52 }
 0xca0   :  { %3701 = vrcp.f32 %v1196_v3  ;;  %v1208_v32 = vand.u32 2147483648, %v1196_v3  ;;  %vm1202_vm13 = vweird.f32 %v1196_v3  ;;  %v1206_v23 = vand.u32 2147483647, %v1196_v3 }
 0xca1   :  { %v1292_v54 = vmul.f32 %v3698_v50, %v1291_v18 }
 0xca2   :  { %v1209_v24 = vor.u32 1.1754944e-38, %v1208_v32  ;;  %vm1207_vm15 = vcmp.eq.f32.partialorder %v1206_v23, 8.507059e+37 }
 0xca3   :  { %v1293_v56 = vadd.f32 %v3698_v50, %v1292_v54 }
 0xca5   :  { %v1297_v53 = vsel %vm1296_vm8, %v3698_v50, %v1293_v56 }
 0xca6   :  { %v1302_v6 = vsel %vm1299_vm9, %v1301_v2, %v1297_v53  ;;  %v3702_v12 = vpop.eup %3701 }
 0xca7   :  { %v1198_v14 = vmul.f32 %v3702_v12, %v1196_v3  ;;  %vm1203_vm12 = vweird.f32 %v3702_v12  ;;  %v1313_v31 = vmul.f32 %v1309_v30, %v1302_v6 }
 0xca8   :  { %vm1204_vm14 = vmor %vm1202_vm13, %vm1203_vm12 }
 0xca9   :  { %v1199_v27 = vsub.f32 1.0, %v1198_v14 }
 0xcab   :  { %v1200_v20 = vmul.f32 %v3702_v12, %v1199_v27 }
 0xcad   :  { %v1201_v22 = vadd.f32 %v3702_v12, %v1200_v20 }
 0xcaf   :  { %v1205_v51 = vsel %vm1204_vm14, %v3702_v12, %v1201_v22 }
 0xcb0   :  { %v1210_v28 = vsel %vm1207_vm15, %v1209_v24, %v1205_v51 }
 0xcb1   :  { %v1213_v59 = vmul.f32 %v1210_v28, %v4517_v55 }
 0xcb2   :  { %v1319_v8 = vpop.permute.xlu0 %1318 }
 0xcb3   :  { %v1323_v1 = vmul.f32 %v1319_v8, %v1302_v6 }
 0xcb5   :  { %1328 = vrot.lane.b32.xlu0 %v1323_v1, %s4086_s3 }
 0xcf6   :  { %v1327_v10 = vpop.permute.xlu2 %1326 }
 0xcf7   :  { %v4552_v11 = vadd.f32 %v1327_v10, %v1312_v5 }
 0xcf9   :  { %3703 = vtanh.f32 %v4552_v11 }
 0xcff   :  { %v3704_v19 = vpop.eup %3703 }
 0xd00   :  { %1338 = vrot.lane.b32.xlu2 %v3704_v19, %s4085_s7 }
 0xd0e   :  { %v1216_v26 = vpop.permute.xlu1 %1215 }
 0xd0f   :  { %v1218_v29 = vmul.f32 %v1216_v26, %v1210_v28 }
 0xd11   :  { %1220 = vrot.lane.b32.xlu1 %v1218_v29, %s4086_s3 }
 0xd27   :  { %v1329_v34 = vpop.permute.xlu0 %1328 }
 0xd28   :  { %v4558_v58 = vadd.f32 %v1329_v34, %v1313_v31 }
 0xd2a   :  { %3705 = vtanh.f32 %v4558_v58 }
 0xd30   :  { %v3706_v57 = vpop.eup %3705 }
 0xd31   :  { %1340 = vrot.lane.b32.xlu0 %v3706_v57, %s4085_s7 }
 0xd5a   :  { %v1339_v42 = vpop.permute.xlu2 %1338 }
 0xd5b   :  { %v1344_v37 = vmul.f32 %v1339_v42, %v4544_v9 }
 0xd5d   :  { %v1346_v38 = vmax.f32 %v1344_v37, 0.0  ;;  %v1442_v40 = vrot.slane %v1344_v37, 5 }
 0xd5f   :  { %v1375_v62 = vrot.slane %v1346_v38, 5 }
 0xd83   :  { %v1221_v60 = vpop.permute.xlu1 %1220 }
 0xd84   :  { %v4563_v35 = vadd.f32 %v1221_v60, %v1213_v59 }
 0xd86   :  { %3707 = vtanh.f32 %v4563_v35 }
 0xd8c   :  { %v3708_v36 = vpop.eup %3707 }
 0xd8d   :  { %1226 = vrot.lane.b32.xlu1 %v3708_v36, %s4085_s7 }
 0xda3   :  { %v1341_v39 = vpop.permute.xlu0 %1340 }
 0xda4   :  { %v1345_v33 = vmul.f32 %v1341_v39, %v1302_v6  ;;  %v1518_v39 = vrot.slane %v4552_v11, 7 }
 0xda6   :  { %v1347_v41 = vmax.f32 %v1345_v33, 0.0  ;;  %v1443_v61 = vrot.slane %v1345_v33, 4 }
 0xda8   :  { %v1376_v17 = vrot.slane %v1347_v41, 4  ;;  %v1444_v55 = vsel %vm330_vm10, %v1443_v61, %v1442_v40 }
 0xda9   :  { %1445 = vrot.lane.b32.xlu2 %v1444_v55, %s4086_s3 }
 0xdaa   :  { %v1377_v43 = vsel %vm330_vm10, %v1376_v17, %v1375_v62 }
 0xdab   :  { %1378 = vrot.lane.b32.xlu1 %v1377_v43, %s4086_s3 }
 0xdff   :  { %v1227_v44 = vpop.permute.xlu1 %1226 }
 0xe00   :  { %v1229_v45 = vmul.f32 %v1227_v44, %v1210_v28 }
 0xe02   :  { %1349 = vrot.lane.b32.xlu0 %v1229_v45, %s4086_s3 }
 0xe03   :  { %v1446_v46 = vpop.permute.xlu2 %1445 }
 0xe04   :  { %3498 = vmatmul.msk.f32.vlgmr.msra.gmra.mxu0 %vm5261_vm11, %v1446_v46 }
 0xe1d   :  { %v1379_v47 = vpop.permute.xlu1 %1378 }
 0xe1e   :  { %3496 = vmatmul.msk.f32.vlgmr.msra.gmra.mxu3 %vm5261_vm11, %v1379_v47 }
 0xe74   :  { %v1350_v9 = vpop.permute.xlu0 %1349 }
 0xe75   :  { %3495 = vmatmul.msk.f32.vlgmr.msra.gmra.mxu2 %vm5261_vm11, %v1350_v9  ;;  %v1519_v9 = vrot.slane %v4558_v58, 7 }
 0xe81   :  { %v1466_v48 = vpop.f32.mrf.mxu0 }
 0xe82   :  { %v1470_v49 = vrot.slane %v1466_v48, 2  ;;  %v1471_v50 = vrot.slane %v1466_v48, 3 }
 0xe84   :  { %v1474_v52 = vadd.f32 %v1470_v49, %v4253_v15  ;;  %v1475_v18 = vadd.f32 %v1471_v50, %v4250_v13 }
 0xe86   :  { %3709 = vtanh.f32 %v1474_v52  ;;  %v3499_v63 = vmul.f32 -1.442695, %v1474_v52  ;;  %v3500_v6 = vmul.f32 -1.442695, %v1475_v18 }
 0xe87   :  { %3711 = vtanh.f32 %v1475_v18 }
 0xe88   :  { %3713 = vpow2.f32 %v3499_v63 }
 0xe8c   :  { %v3710_v54 = vpop.eup %3709 }
 0xe8d   :  { %v3712_v56 = vpop.eup %3711  ;;  %1526 = vrot.lane.b32.xlu2 %v3710_v54, %s4085_s7 }
 0xe8e   :  { %1528 = vrot.lane.b32.xlu0 %v3712_v56, %s4085_s7  ;;  %v3714_v0 = vpop.eup %3713 }
 0xe8f   :  { %v1482_v53 = vadd.f32 1.0, %v3714_v0 }
 0xe91   :  { %3715 = vrcp.f32 %v1482_v53  ;;  %v1495_v5 = vand.u32 2147483648, %v1482_v53  ;;  %vm1489_vm1 = vweird.f32 %v1482_v53  ;;  %v1493_v10 = vand.u32 2147483647, %v1482_v53 }
 0xe92   :  { %3717 = vpow2.f32 %v3500_v6 }
 0xe93   :  { %v1496_v14 = vor.u32 1.1754944e-38, %v1495_v5  ;;  %vm1494_vm3 = vcmp.eq.f32.partialorder %v1493_v10, 8.507059e+37 }
 0xe97   :  { %v3716_v2 = vpop.eup %3715 }
 0xe98   :  { %v1485_v8 = vmul.f32 %v3716_v2, %v1482_v53  ;;  %v3718_v25 = vpop.eup %3717  ;;  %vm1490_vm0 = vweird.f32 %v3716_v2 }
 0xe99   :  { %v1483_v3 = vadd.f32 1.0, %v3718_v25  ;;  %vm1491_vm2 = vmor %vm1489_vm1, %vm1490_vm0 }
 0xe9a   :  { %v1486_v1 = vsub.f32 1.0, %v1485_v8 }
 0xe9b   :  { %3719 = vrcp.f32 %v1483_v3  ;;  %v1510_v30 = vand.u32 2147483648, %v1483_v3  ;;  %vm1504_vm5 = vweird.f32 %v1483_v3  ;;  %v1508_v34 = vand.u32 2147483647, %v1483_v3 }
 0xe9c   :  { %v1487_v21 = vmul.f32 %v3716_v2, %v1486_v1 }
 0xe9d   :  { %v1511_v59 = vor.u32 1.1754944e-38, %v1510_v30  ;;  %vm1509_vm7 = vcmp.eq.f32.partialorder %v1508_v34, 8.507059e+37 }
 0xe9e   :  { %v1488_v4 = vadd.f32 %v3716_v2, %v1487_v21 }
 0xea0   :  { %v1492_v12 = vsel %vm1491_vm2, %v3716_v2, %v1488_v4 }
 0xea1   :  { %v4580_v27 = vsel %vm1494_vm3, %v1496_v14, %v1492_v12  ;;  %v3720_v22 = vpop.eup %3719  ;;  %v1399_v24 = vpop.f32.mrf.mxu3 }
 0xea2   :  { %v1500_v32 = vmul.f32 %v3720_v22, %v1483_v3  ;;  %vm1505_vm4 = vweird.f32 %v3720_v22  ;;  %v1522_v38 = vmul.f32 %v1518_v39, %v4580_v27 }
 0xea3   :  { %vm1506_vm6 = vmor %vm1504_vm5, %vm1505_vm4 }
 0xea4   :  { %v1501_v23 = vsub.f32 1.0, %v1500_v32 }
 0xea6   :  { %v1502_v51 = vmul.f32 %v3720_v22, %v1501_v23 }
 0xea8   :  { %v1503_v29 = vadd.f32 %v3720_v22, %v1502_v51 }
 0xeaa   :  { %v1507_v57 = vsel %vm1506_vm6, %v3720_v22, %v1503_v29 }
 0xeab   :  { %v1512_v60 = vsel %vm1509_vm7, %v1511_v59, %v1507_v57 }
 0xeac   :  { %v1523_v49 = vmul.f32 %v1519_v9, %v1512_v60 }
 0xee7   :  { %v1527_v19 = vpop.permute.xlu2 %1526 }
 0xee8   :  { %v1532_v20 = vmul.f32 %v1527_v19, %v4580_v27 }
 0xeea   :  { %1536 = vrot.lane.b32.xlu2 %v1532_v20, %s4086_s3 }
 0xef8   :  { %v1370_v26 = vpop.f32.mrf.mxu2 }
 0xef9   :  { %v1400_v28 = vadd.f32 %v1399_v24, %v1370_v26 }
 0xefb   :  { %v1402_v31 = vadd.f32 %v4541_v16, %v1400_v28 }
 0xefd   :  { %3721 = vtanh.f32 %v1402_v31  ;;  %v3497_v41 = vmul.f32 -1.442695, %v1402_v31 }
 0xf00   :  { %v1529_v36 = vpop.permute.xlu0 %1528 }
 0xf01   :  { %v1533_v42 = vmul.f32 %v1529_v36, %v1512_v60 }
 0xf03   :  { %v3722_v37 = vpop.eup %3721  ;;  %1538 = vrot.lane.b32.xlu0 %v1533_v42, %s4086_s3 }
 0xf04   :  { %1425 = vrot.lane.b32.xlu1 %v3722_v37, %s4085_s7 }
 0xf44   :  { %v1537_v33 = vpop.permute.xlu2 %1536 }
 0xf45   :  { %v4589_v40 = vadd.f32 %v1537_v33, %v1522_v38 }
 0xf47   :  { %3723 = vtanh.f32 %v4589_v40 }
 0xf48   :  { %3725 = vpow2.f32 %v3497_v41 }
 0xf4d   :  { %v3724_v61 = vpop.eup %3723 }
 0xf4e   :  { %1548 = vrot.lane.b32.xlu2 %v3724_v61, %s4085_s7  ;;  %v3726_v62 = vpop.eup %3725 }
 0xf4f   :  { %v1406_v17 = vadd.f32 1.0, %v3726_v62 }
 0xf51   :  { %3727 = vrcp.f32 %v1406_v17  ;;  %v1418_v46 = vand.u32 2147483648, %v1406_v17  ;;  %vm1412_vm9 = vweird.f32 %v1406_v17  ;;  %v1416_v47 = vand.u32 2147483647, %v1406_v17 }
 0xf53   :  { %v1419_v50 = vor.u32 1.1754944e-38, %v1418_v46  ;;  %vm1417_vm13 = vcmp.eq.f32.partialorder %v1416_v47, 8.507059e+37 }
 0xf57   :  { %v3728_v55 = vpop.eup %3727 }
 0xf58   :  { %v1408_v43 = vmul.f32 %v3728_v55, %v1406_v17  ;;  %vm1413_vm8 = vweird.f32 %v3728_v55 }
 0xf59   :  { %vm1414_vm12 = vmor %vm1412_vm9, %vm1413_vm8 }
 0xf5a   :  { %v1409_v44 = vsub.f32 1.0, %v1408_v43 }
 0xf5c   :  { %v1410_v45 = vmul.f32 %v3728_v55, %v1409_v44 }
 0xf5e   :  { %v1411_v11 = vadd.f32 %v3728_v55, %v1410_v45 }
 0xf60   :  { %v1415_v48 = vsel %vm1414_vm12, %v3728_v55, %v1411_v11 }
 0xf61   :  { %v1420_v56 = vsel %vm1417_vm13, %v1419_v50, %v1415_v48 }
 0xf62   :  { %v1423_v58 = vmul.f32 %v1420_v56, %v4563_v35 }
 0xf75   :  { %v1539_v52 = vpop.permute.xlu0 %1538 }
 0xf76   :  { %v4594_v18 = vadd.f32 %v1539_v52, %v1523_v49  ;;  %v1426_v54 = vpop.permute.xlu1 %1425 }
 0xf77   :  { %v1428_v63 = vmul.f32 %v1426_v54, %v1420_v56 }
 0xf78   :  { %3729 = vtanh.f32 %v4594_v18 }
 0xf79   :  { %1430 = vrot.lane.b32.xlu1 %v1428_v63, %s4086_s3 }
 0xf7e   :  { %v3730_v0 = vpop.eup %3729 }
 0xf7f   :  { %1550 = vrot.lane.b32.xlu0 %v3730_v0, %s4085_s7 }
 0xfa8   :  { %v1549_v53 = vpop.permute.xlu2 %1548 }
 0xfa9   :  { %v1554_v8 = vmul.f32 %v1549_v53, %v4580_v27 }
 0xfab   :  { %v1556_v21 = vmax.f32 %v1554_v8, 0.0  ;;  %v1652_v4 = vrot.slane %v1554_v8, 6  ;;  %v1728_v8 = vrot.slane %v4589_v40, 7 }
 0xfad   :  { %v1585_v12 = vrot.slane %v1556_v21, 6 }
 0xfeb   :  { %v1431_v2 = vpop.permute.xlu1 %1430 }
 0xfec   :  { %v4600_v6 = vadd.f32 %v1431_v2, %v1423_v58 }
 0xfee   :  { %3731 = vtanh.f32 %v4600_v6 }
 0xff1   :  { %v1551_v1 = vpop.permute.xlu0 %1550 }
 0xff2   :  { %v1555_v25 = vmul.f32 %v1551_v1, %v1512_v60 }
 0xff4   :  { %v3732_v3 = vpop.eup %3731  ;;  %v1557_v5 = vmax.f32 %v1555_v25, 0.0  ;;  %v1653_v10 = vrot.slane %v1555_v25, 5 }
 0xff5   :  { %1436 = vrot.lane.b32.xlu1 %v3732_v3, %s4085_s7 }
 0xff6   :  { %v1586_v14 = vrot.slane %v1557_v5, 5  ;;  %v1654_v35 = vsel %vm330_vm10, %v1653_v10, %v1652_v4 }
 0xff7   :  { %1655 = vrot.lane.b32.xlu2 %v1654_v35, %s4086_s3  ;;  %v1729_v35 = vrot.slane %v4594_v18, 7 }
 0xff8   :  { %v1587_v19 = vsel %vm330_vm10, %v1586_v14, %v1585_v12 }
 0xff9   :  { %1588 = vrot.lane.b32.xlu0 %v1587_v19, %s4086_s3 }
0x1051   :  { %v1656_v27 = vpop.permute.xlu2 %1655 }
0x1052   :  { %3504 = vmatmul.msk.f32.vlgmr.msrb.gmra.mxu3 %vm5261_vm11, %v1656_v27 }
0x1067   :  { %v1437_v20 = vpop.permute.xlu1 %1436 }
0x1068   :  { %v1439_v22 = vmul.f32 %v1437_v20, %v1420_v56 }
0x106a   :  { %1559 = vrot.lane.b32.xlu1 %v1439_v22, %s4086_s3 }
0x106b   :  { %v1589_v32 = vpop.permute.xlu0 %1588 }
0x106c   :  { %3502 = vmatmul.msk.f32.vlgmr.msrb.gmra.mxu2 %vm5261_vm11, %v1589_v32 }
0x10d5   :  { %v1676_v23 = vpop.f32.mrf.mxu3 }
0x10d6   :  { %v1680_v51 = vrot.slane %v1676_v23, 1  ;;  %v1681_v24 = vrot.slane %v1676_v23, 2 }
0x10d8   :  { %v1684_v26 = vadd.f32 %v1680_v51, %v4253_v15  ;;  %v1685_v28 = vadd.f32 %v1681_v24, %v4250_v13 }
0x10da   :  { %3733 = vtanh.f32 %v1684_v26  ;;  %v3505_v34 = vmul.f32 -1.442695, %v1684_v26  ;;  %v3506_v15 = vmul.f32 -1.442695, %v1685_v28 }
0x10db   :  { %3735 = vtanh.f32 %v1685_v28 }
0x10dc   :  { %v1560_v29 = vpop.permute.xlu1 %1559  ;;  %3737 = vpow2.f32 %v3505_v34 }
0x10dd   :  { %3501 = vmatmul.msk.f32.vlgmr.msrb.gmra.mxu1 %vm5261_vm11, %v1560_v29 }
0x10e0   :  { %v3734_v30 = vpop.eup %3733 }
0x10e1   :  { %v3736_v31 = vpop.eup %3735  ;;  %1736 = vrot.lane.b32.xlu2 %v3734_v30, %s4085_s7 }
0x10e2   :  { %1738 = vrot.lane.b32.xlu0 %v3736_v31, %s4085_s7  ;;  %v3738_v57 = vpop.eup %3737 }
0x10e3   :  { %v1692_v59 = vadd.f32 1.0, %v3738_v57 }
0x10e5   :  { %3739 = vrcp.f32 %v1692_v59  ;;  %v1705_v33 = vand.u32 2147483648, %v1692_v59  ;;  %vm1699_vm15 = vweird.f32 %v1692_v59  ;;  %v1703_v41 = vand.u32 2147483647, %v1692_v59 }
0x10e6   :  { %3741 = vpow2.f32 %v3506_v15 }
0x10e7   :  { %v1706_v62 = vor.u32 1.1754944e-38, %v1705_v33  ;;  %vm1704_vm1 = vcmp.eq.f32.partialorder %v1703_v41, 8.507059e+37 }
0x10eb   :  { %v3740_v60 = vpop.eup %3739 }
0x10ec   :  { %v1695_v36 = vmul.f32 %v3740_v60, %v1692_v59  ;;  %v3742_v37 = vpop.eup %3741  ;;  %vm1700_vm14 = vweird.f32 %v3740_v60 }
0x10ed   :  { %v1693_v39 = vadd.f32 1.0, %v3742_v37  ;;  %vm1701_vm0 = vmor %vm1699_vm15, %vm1700_vm14 }
0x10ee   :  { %v1696_v13 = vsub.f32 1.0, %v1695_v36 }
0x10ef   :  { %3743 = vrcp.f32 %v1693_v39  ;;  %v1720_v9 = vand.u32 2147483648, %v1693_v39  ;;  %vm1714_vm3 = vweird.f32 %v1693_v39  ;;  %v1718_v48 = vand.u32 2147483647, %v1693_v39  ;;  %v1609_v63 = vpop.f32.mrf.mxu2 }
0x10f0   :  { %v1697_v42 = vmul.f32 %v3740_v60, %v1696_v13 }
0x10f1   :  { %v1721_v50 = vor.u32 1.1754944e-38, %v1720_v9  ;;  %vm1719_vm5 = vcmp.eq.f32.partialorder %v1718_v48, 8.507059e+37 }
0x10f2   :  { %v1698_v38 = vadd.f32 %v3740_v60, %v1697_v42 }
0x10f4   :  { %v1702_v61 = vsel %vm1701_vm0, %v3740_v60, %v1698_v38 }
0x10f5   :  { %v4617_v55 = vsel %vm1704_vm1, %v1706_v62, %v1702_v61  ;;  %v3744_v44 = vpop.eup %3743 }
0x10f6   :  { %v1710_v45 = vmul.f32 %v3744_v44, %v1693_v39  ;;  %vm1715_vm2 = vweird.f32 %v3744_v44  ;;  %v1732_v1 = vmul.f32 %v1728_v8, %v4617_v55 }
0x10f7   :  { %vm1716_vm4 = vmor %vm1714_vm3, %vm1715_vm2 }
0x10f8   :  { %v1711_v11 = vsub.f32 1.0, %v1710_v45 }
0x10fa   :  { %v1712_v46 = vmul.f32 %v3744_v44, %v1711_v11 }
0x10fc   :  { %v1713_v47 = vadd.f32 %v3744_v44, %v1712_v46 }
0x10fe   :  { %v1717_v49 = vsel %vm1716_vm4, %v3744_v44, %v1713_v47 }
0x10ff   :  { %v1722_v54 = vsel %vm1719_vm5, %v1721_v50, %v1717_v49 }
0x1100   :  { %v1733_v19 = vmul.f32 %v1729_v35, %v1722_v54 }
0x113b   :  { %v1737_v17 = vpop.permute.xlu2 %1736 }
0x113c   :  { %v1742_v43 = vmul.f32 %v1737_v17, %v4617_v55 }
0x113e   :  { %1746 = vrot.lane.b32.xlu2 %v1742_v43, %s4086_s3 }
0x1154   :  { %v1739_v52 = vpop.permute.xlu0 %1738 }
0x1155   :  { %v1743_v56 = vmul.f32 %v1739_v52, %v1722_v54 }
0x1157   :  { %1748 = vrot.lane.b32.xlu0 %v1743_v56, %s4086_s3 }
0x115a   :  { %v1580_v0 = vpop.f32.mrf.mxu1 }
0x115b   :  { %v1610_v58 = vadd.f32 %v1609_v63, %v1580_v0 }
0x115d   :  { %v1612_v53 = vadd.f32 %v4541_v16, %v1610_v58 }
0x115f   :  { %3745 = vtanh.f32 %v1612_v53  ;;  %v3503_v4 = vmul.f32 -1.442695, %v1612_v53 }
0x1165   :  { %v3746_v2 = vpop.eup %3745 }
0x1166   :  { %1635 = vrot.lane.b32.xlu1 %v3746_v2, %s4085_s7 }
0x1198   :  { %v1747_v21 = vpop.permute.xlu2 %1746 }
0x1199   :  { %v1752_v25 = vadd.f32 %v1747_v21, %v1732_v1 }
0x119b   :  { %3747 = vtanh.f32 %v1752_v25  ;;  %v1867_v25 = vld [vmem:[#allocation6 + $0x18] sm:$0xff] }
0x119c   :  { %3749 = vpow2.f32 %v3503_v4  ;;  %1889 = vmatpush.msra.mxu2 %v1867_v25  ;;  %v4642_v4 = vld [vmem:[#allocation7 + $0x18] sm:$0xff] }
0x119d   :  { %1948 = vmatpush.msra.mxu3 %v4642_v4 }
0x11a1   :  { %v3748_v3 = vpop.eup %3747 }
0x11a2   :  { %1758 = vrot.lane.b32.xlu2 %v3748_v3, %s4085_s7  ;;  %v3750_v5 = vpop.eup %3749  ;;  %v1866_v3 = vld [vmem:[#allocation6 + $0x10] sm:$0xff] }
0x11a3   :  { %v1616_v10 = vadd.f32 1.0, %v3750_v5  ;;  %v4644_v5 = vld [vmem:[#allocation7 + $0x10] sm:$0xff]  ;;  %1890 = vmatpush.msra.mxu2 %v1866_v3 }
0x11a4   :  { %1949 = vmatpush.msra.mxu3 %v4644_v5 }
0x11a5   :  { %3751 = vrcp.f32 %v1616_v10  ;;  %v1628_v51 = vand.u32 2147483648, %v1616_v10  ;;  %vm1622_vm7 = vweird.f32 %v1616_v10  ;;  %v1626_v24 = vand.u32 2147483647, %v1616_v10 }
0x11a7   :  { %v1629_v28 = vor.u32 1.1754944e-38, %v1628_v51  ;;  %vm1627_vm9 = vcmp.eq.f32.partialorder %v1626_v24, 8.507059e+37 }
0x11ab   :  { %v3752_v12 = vpop.eup %3751 }
0x11ac   :  { %v1618_v14 = vmul.f32 %v3752_v12, %v1616_v10  ;;  %vm1623_vm6 = vweird.f32 %v3752_v12  ;;  %v1865_v10 = vld [vmem:[#allocation6 + $0x8] sm:$0xff] }
0x11ad   :  { %vm1624_vm8 = vmor %vm1622_vm7, %vm1623_vm6  ;;  %1891 = vmatpush.msra.mxu2 %v1865_v10 }
0x11ae   :  { %v1619_v40 = vsub.f32 1.0, %v1618_v14 }
0x11b0   :  { %v1620_v22 = vmul.f32 %v3752_v12, %v1619_v40 }
0x11b2   :  { %v1621_v32 = vadd.f32 %v3752_v12, %v1620_v22 }
0x11b4   :  { %v1625_v26 = vsel %vm1624_vm8, %v3752_v12, %v1621_v32  ;;  %v1864_v12 = vld [vmem:[#allocation6] sm:$0xff] }
0x11b5   :  { %v1630_v18 = vsel %vm1627_vm9, %v1629_v28, %v1625_v26  ;;  %1892 = vmatpush.msra.mxu2 %v1864_v12 }
0x11b6   :  { %v1633_v37 = vmul.f32 %v1630_v18, %v4600_v6 }
0x11c9   :  { %v1749_v27 = vpop.permute.xlu0 %1748 }
0x11ca   :  { %v1753_v20 = vadd.f32 %v1749_v27, %v1733_v19  ;;  %v4649_v19 = vld [vmem:[#allocation7 + $0x8] sm:$0xff]  ;;  %v4651_v27 = vld [vmem:[#allocation7] sm:$0xff] }
0x11cb   :  { %1950 = vmatpush.msra.mxu3 %v4649_v19 }
0x11cc   :  { %3753 = vtanh.f32 %v1753_v20  ;;  %v1899_v20 = vlaneseq }
0x11cd   :  { %1951 = vmatpush.msra.mxu3 %v4651_v27 }
0x11ce   :  { %1952 = vmatmul.f32.vlgmr.msra.gmra.mxu3 %v4084_v7  ;;  %v1900_v22 = vshrl.u32 %v1899_v20, 7 }
0x11cf   :  { %2141 = vmatpush.msrb.mxu3 %v4642_v4 }
0x11d0   :  { %v1921_v32 = vmul.u32 8, %v1900_v22 }
0x11d1   :  { %2142 = vmatpush.msrb.mxu3 %v4644_v5 }
0x11d2   :  { %v3754_v23 = vpop.eup %3753  ;;  %v2301_v51 = vadd.s32 2, %v1921_v32  ;;  %v2493_v24 = vadd.s32 3, %v1921_v32  ;;  %v1923_v26 = vsub.s32 0, %v1921_v32  ;;  %v2685_v28 = vadd.s32 4, %v1921_v32 }
0x11d3   :  { %1760 = vrot.lane.b32.xlu0 %v3754_v23, %s4085_s7  ;;  %2143 = vmatpush.msrb.mxu3 %v4649_v19  ;;  %v2109_v23 = vadd.s32 1, %v1921_v32  ;;  %vm1922_vm15 = vcmp.lt.s32.totalorder %v1921_v32, 0 }
0x11d4   :  { %vm2302_vm1 = vcmp.lt.s32.totalorder %v2301_v51, 0  ;;  %vm2494_vm2 = vcmp.lt.s32.totalorder %v2493_v24, 0  ;;  %vm2686_vm3 = vcmp.lt.s32.totalorder %v2685_v28, 0 }
0x11d5   :  { %2144 = vmatpush.msrb.mxu3 %v4651_v27  ;;  %vm2110_vm0 = vcmp.lt.s32.totalorder %v2109_v23, 0 }
0x11d7   :  { %2333 = vmatpush.msra.mxu3 %v4642_v4 }
0x11d8   :  { %v1636_v29 = vpop.permute.xlu1 %1635 }
0x11d9   :  { %v1638_v30 = vmul.f32 %v1636_v29, %v1630_v18  ;;  %2334 = vmatpush.msra.mxu3 %v4644_v5  ;;  %v2111_v29 = vsub.s32 0, %v2109_v23 }
0x11db   :  { %1640 = vrot.lane.b32.xlu1 %v1638_v30, %s4086_s3  ;;  %2335 = vmatpush.msra.mxu3 %v4649_v19  ;;  %v2303_v30 = vsub.s32 0, %v2301_v51 }
0x11dd   :  { %2336 = vmatpush.msra.mxu3 %v4651_v27 }
0x11fc   :  { %v1759_v31 = vpop.permute.xlu2 %1758 }
0x11fd   :  { %v1764_v34 = vmul.f32 %v1759_v31, %v4617_v55  ;;  %v3069_v31 = vadd.s32 6, %v1921_v32 }
0x11ff   :  { %v1766_v59 = vmax.f32 %v1764_v34, 0.0  ;;  %v2495_v34 = vsub.s32 0, %v2493_v24  ;;  %vm3070_vm5 = vcmp.lt.s32.totalorder %v3069_v31, 0 }
0x1201   :  { %v1795_v36 = vrot.slane %v1766_v59, 7  ;;  %v2687_v59 = vsub.s32 0, %v2685_v28 }
0x1245   :  { %v1761_v57 = vpop.permute.xlu0 %1760 }
0x1246   :  { %v1765_v60 = vmul.f32 %v1761_v57, %v1722_v54  ;;  %v1924_v57 = vsel %vm1922_vm15, %v1923_v26, %v1921_v32 }
0x1248   :  { %v1767_v15 = vmax.f32 %v1765_v60, 0.0  ;;  %v2112_v60 = vsel %vm2110_vm0, %v2111_v29, %v2109_v23  ;;  %v4824_v29 = vld [vmem:[#allocation10] sm:$0xff] }
0x124a   :  { %v1796_v13 = vrot.slane %v1767_v15, 6 }
0x124c   :  { %v1797_v42 = vsel %vm330_vm10, %v1796_v13, %v1795_v36  ;;  %v2304_v36 = vsel %vm2302_vm1, %v2303_v30, %v2301_v51  ;;  %v3071_v13 = vsub.s32 0, %v3069_v31  ;;  %v3570_v51 = vld [vmem:[%s5254_s9] ss:$0 sm:$0xff] }
0x124d   :  { %1798 = vrot.lane.b32.xlu0 %v1797_v42, %s4086_s3  ;;  %v1641_v39 = vpop.permute.xlu1 %1640  ;;  %v1926_v42 = vand.u32 1, %v1924_v57 }
0x124e   :  { %v1643_v38 = vadd.f32 %v1641_v39, %v1633_v37  ;;  %v2496_v37 = vsel %vm2494_vm2, %v2495_v34, %v2493_v24  ;;  %v2114_v39 = vand.u32 1, %v2112_v60  ;;  %v4816_v24 = vld [vmem:[#allocation9 + $0x10] sm:$0xff] }
0x1250   :  { %3755 = vtanh.f32 %v1643_v38 }
0x1256   :  { %v3756_v33 = vpop.eup %3755 }
0x1257   :  { %1646 = vrot.lane.b32.xlu1 %v3756_v33, %s4085_s7  ;;  %v3261_v33 = vadd.s32 7, %v1921_v32 }
0x1259   :  { %vm3262_vm6 = vcmp.lt.s32.totalorder %v3261_v33, 0 }
0x12bf   :  { %v1799_v41 = vpop.permute.xlu0 %1798 }
0x12c0   :  { %3508 = vmatmul.msk.f32.vlgmr.msra.gmra.mxu1 %vm5261_vm11, %v1799_v41  ;;  %v2306_v41 = vand.u32 1, %v2304_v36 }
0x12c9   :  { %v1647_v61 = vpop.permute.xlu1 %1646 }
0x12ca   :  { %v1649_v62 = vmul.f32 %v1647_v61, %v1630_v18  ;;  %v2877_v18 = vadd.s32 5, %v1921_v32 }
0x12cc   :  { %1769 = vrot.lane.b32.xlu2 %v1649_v62, %s4086_s3  ;;  %v2879_v15 = vsub.s32 0, %v2877_v18  ;;  %vm2878_vm4 = vcmp.lt.s32.totalorder %v2877_v18, 0  ;;  %v2498_v62 = vand.u32 1, %v2496_v37 }
0x12ce   :  { %v2880_v61 = vsel %vm2878_vm4, %v2879_v15, %v2877_v18 }
0x1326   :  { %v1770_v17 = vpop.permute.xlu2 %1769 }
0x1327   :  { %3507 = vmatmul.msk.f32.vlgmr.msrb.gmra.mxu0 %vm5261_vm11, %v1770_v17  ;;  %v3072_v17 = vsel %vm3070_vm5, %v3071_v13, %v3069_v31 }
0x133d   :  { %v1819_v55 = vpop.f32.mrf.mxu1 }
0x13a4   :  { %v1790_v6 = vpop.f32.mrf.mxu0 }
0x13a5   :  { %v1820_v43 = vadd.f32 %v1819_v55, %v1790_v6  ;;  %v1927_v55 = vsub.s32 0, %v1926_v42 }
0x13a7   :  { %v1822_v44 = vadd.f32 %v4541_v16, %v1820_v43  ;;  %v2115_v43 = vsub.s32 0, %v2114_v39 }
0x13a9   :  { %3757 = vtanh.f32 %v1822_v44  ;;  %v3509_v11 = vmul.f32 -1.442695, %v1822_v44  ;;  %v2882_v44 = vand.u32 1, %v2880_v61  ;;  %v1953_v61 = vpop.f32.mrf.mxu3 }
0x13ab   :  { %3759 = vpow2.f32 %v3509_v11  ;;  %v2307_v11 = vsub.s32 0, %v2306_v41 }
0x13af   :  { %v3758_v45 = vpop.eup %3757 }
0x13b0   :  { %1845 = vrot.lane.b32.xlu1 %v3758_v45, %s4085_s7  ;;  %v3263_v45 = vsub.s32 0, %v3261_v33 }
0x13b1   :  { %v3760_v46 = vpop.eup %3759 }
0x13b2   :  { %v1826_v47 = vadd.f32 1.0, %v3760_v46  ;;  %v3074_v46 = vand.u32 1, %v3072_v17 }
0x13b4   :  { %3761 = vrcp.f32 %v1826_v47  ;;  %v1838_v54 = vand.u32 2147483648, %v1826_v47  ;;  %vm1832_vm12 = vweird.f32 %v1826_v47  ;;  %v1836_v56 = vand.u32 2147483647, %v1826_v47 }
0x13b6   :  { %v1839_v63 = vor.u32 1.1754944e-38, %v1838_v54  ;;  %vm1837_vm14 = vcmp.eq.f32.partialorder %v1836_v56, 8.507059e+37  ;;  %v2308_v54 = vsel %vm2302_vm1, %v2307_v11, %v2306_v41  ;;  %v3075_v56 = vsub.s32 0, %v3074_v46 }
0x13b7   :  { %v2312_v12 = vadd.s32 2, %v2308_v54 }
0x13ba   :  { %v3762_v9 = vpop.eup %3761 }
0x13bb   :  { %v1828_v48 = vmul.f32 %v3762_v9, %v1826_v47  ;;  %vm1833_vm10 = vweird.f32 %v3762_v9  ;;  %v2499_v47 = vsub.s32 0, %v2498_v62 }
0x13bc   :  { %vm1834_vm13 = vmor %vm1832_vm12, %vm1833_vm10  ;;  %vm2309_vm12 = vcmp.ne.s32.totalorder %v2308_v54, 0 }
0x13bd   :  { %v1829_v49 = vsub.f32 1.0, %v1828_v48 }
0x13bf   :  { %v1830_v50 = vmul.f32 %v3762_v9, %v1829_v49  ;;  %v2116_v49 = vsel %vm2110_vm0, %v2115_v43, %v2114_v39 }
0x13c0   :  { %vm2117_vm9 = vcmp.ne.s32.totalorder %v2116_v49, 0  ;;  %vm2118_vm10 = vcmp.lt.s32.totalorder %v2116_v49, 0  ;;  %v2120_v10 = vadd.s32 2, %v2116_v49 }
0x13c1   :  { %v1831_v52 = vadd.f32 %v3762_v9, %v1830_v50  ;;  %v2883_v50 = vsub.s32 0, %v2882_v44  ;;  %vm4684_vm1 = vmand %vm2118_vm10, %vm2117_vm9 }
0x13c2   :  { %v2121_v18 = vsel %vm4684_vm1, %v2120_v10, %v2116_v49 }
0x13c3   :  { %v1835_v16 = vsel %vm1834_vm13, %v3762_v9, %v1831_v52  ;;  %v1928_v9 = vsel %vm1922_vm15, %v1927_v55, %v1926_v42  ;;  %v3264_v52 = vsel %vm3262_vm6, %v3263_v45, %v3261_v33  ;;  %vm2310_vm13 = vcmp.lt.s32.totalorder %v2308_v54, 0 }
0x13c4   :  { %v1840_v58 = vsel %vm1837_vm14, %v1839_v63, %v1835_v16  ;;  %v3266_v16 = vand.u32 1, %v3264_v52  ;;  %vm1929_vm7 = vcmp.ne.s32.totalorder %v1928_v9, 0  ;;  %vm1930_vm8 = vcmp.lt.s32.totalorder %v1928_v9, 0 }
0x13c5   :  { %v1843_v2 = vmul.f32 %v1840_v58, %v1643_v38  ;;  %v2688_v38 = vsel %vm2686_vm3, %v2687_v59, %v2685_v28  ;;  %v2500_v63 = vsel %vm2494_vm2, %v2499_v47, %v2498_v62  ;;  %vm4679_vm14 = vmand %vm1930_vm8, %vm1929_vm7  ;;  %v1932_v25 = vadd.s32 2, %v1928_v9 }
0x13c6   :  { %v2690_v6 = vand.u32 1, %v2688_v38  ;;  %vm2501_vm15 = vcmp.ne.s32.totalorder %v2500_v63, 0  ;;  %vm2502_vm0 = vcmp.lt.s32.totalorder %v2500_v63, 0 }
0x13c7   :  { %vm4693_vm8 = vmand %vm2502_vm0, %vm2501_vm15  ;;  %v1933_v28 = vsel %vm4679_vm14, %v1932_v25, %v1928_v9  ;;  %vm4736_vm0 = vcmp.eq.s32.totalorder %v2121_v18, 1  ;;  %v4826_v18 = vld [vmem:[#allocation9] sm:$0xff] }
0x13c8   :  { %v2691_v48 = vsub.s32 0, %v2690_v6  ;;  %vm4730_vm14 = vcmp.eq.s32.totalorder %v1933_v28, 1  ;;  %v4820_v28 = vld [vmem:[#allocation9 + $0x8] sm:$0xff] }
0x1422   :  { %v1846_v0 = vpop.permute.xlu1 %1845 }
0x1423   :  { %v1848_v53 = vmul.f32 %v1846_v0, %v1840_v58  ;;  %v2692_v0 = vsel %vm2686_vm3, %v2691_v48, %v2690_v6  ;;  %vm4689_vm3 = vmand %vm2310_vm13, %vm2309_vm12 }
0x1424   :  { %vm2693_vm2 = vcmp.ne.s32.totalorder %v2692_v0, 0  ;;  %v2696_v20 = vadd.s32 2, %v2692_v0  ;;  %v2313_v30 = vsel %vm4689_vm3, %v2312_v12, %v2308_v54 }
0x1425   :  { %1850 = vrot.lane.b32.xlu2 %v1848_v53, %s4086_s3  ;;  %v2884_v53 = vsel %vm2878_vm4, %v2883_v50, %v2882_v44  ;;  %vm4740_vm1 = vcmp.eq.s32.totalorder %v2313_v30, 1 }
0x1426   :  { %vm2885_vm4 = vcmp.ne.s32.totalorder %v2884_v53, 0  ;;  %vm2886_vm7 = vcmp.lt.s32.totalorder %v2884_v53, 0  ;;  %v2888_v32 = vadd.s32 2, %v2884_v53 }
0x1427   :  { %vm4701_vm13 = vmand %vm2886_vm7, %vm2885_vm4 }
0x1428   :  { %v2889_v59 = vsel %vm4701_vm13, %v2888_v32, %v2884_v53  ;;  %v4808_v32 = vld [vmem:[#allocation10 + $0x18] sm:$0xff] }
0x1429   :  { %vm4756_vm4 = vcmp.eq.s32.totalorder %v2889_v59, 1  ;;  %2007 = vmatpush.msra.mxu0 %v4808_v32 }
0x147f   :  { %v1851_v8 = vpop.permute.xlu2 %1850 }
0x1480   :  { %v1853_v1 = vadd.f32 %v1851_v8, %v1843_v2  ;;  %v3076_v8 = vsel %vm3070_vm5, %v3075_v56, %v3074_v46 }
0x1481   :  { %vm3077_vm5 = vcmp.ne.s32.totalorder %v3076_v8, 0  ;;  %vm3078_vm9 = vcmp.lt.s32.totalorder %v3076_v8, 0  ;;  %v3080_v23 = vadd.s32 2, %v3076_v8 }
0x1482   :  { %3763 = vtanh.f32 %v1853_v1  ;;  %vm4708_vm15 = vmand %vm3078_vm9, %vm3077_vm5 }
0x1483   :  { %v3081_v60 = vsel %vm4708_vm15, %v3080_v23, %v3076_v8  ;;  %v4810_v23 = vld [vmem:[#allocation9 + $0x18] sm:$0xff] }
0x1484   :  { %vm4760_vm7 = vcmp.eq.s32.totalorder %v3081_v60, 1  ;;  %2032 = vmatpush.msrb.mxu1 %v4810_v23  ;;  %v4864_v60 = vld [vmem:[%s5257_s12] ss:$0 sm:$0xff] }
0x1486   :  { %2033 = vmatpush.msrb.mxu1 %v4816_v24 }
0x1488   :  { %v3764_v21 = vpop.eup %3763  ;;  %2034 = vmatpush.msrb.mxu1 %v4820_v28 }
0x1489   :  { %1856 = vrot.lane.b32.xlu0 %v3764_v21, %s4085_s7 }
0x148a   :  { %2035 = vmatpush.msrb.mxu1 %v4826_v18 }
0x148c   :  { %2225 = vmatpush.msra.mxu1 %v4810_v23 }
0x148e   :  { %2226 = vmatpush.msra.mxu1 %v4816_v24 }
0x1490   :  { %2227 = vmatpush.msra.mxu1 %v4820_v28 }
0x1492   :  { %2228 = vmatpush.msra.mxu1 %v4826_v18 }
0x14fb   :  { %v1857_v14 = vpop.permute.xlu0 %1856 }
0x14fc   :  { %v1859_v35 = vmul.f32 %v1857_v14, %v1840_v58  ;;  %v3267_v58 = vsub.s32 0, %v3266_v16 }
0x14fe   :  { %1873 = vrot.lane.b32.xlu1 %v1859_v35, %s4086_s3  ;;  %v3268_v21 = vsel %vm3262_vm6, %v3267_v58, %v3266_v16  ;;  %v2504_v35 = vadd.s32 2, %v2500_v63 }
0x14ff   :  { %vm3269_vm6 = vcmp.ne.s32.totalorder %v3268_v21, 0  ;;  %vm3270_vm12 = vcmp.lt.s32.totalorder %v3268_v21, 0  ;;  %v3272_v26 = vadd.s32 2, %v3268_v21 }
0x1500   :  { %v2505_v31 = vsel %vm4693_vm8, %v2504_v35, %v2500_v63 }
0x1570   :  { %v1874_v40 = vpop.permute.xlu1 %1873 }
0x1571   :  { %3510 = vmatmul.msk.f32.vlgmr.msra.gmra.mxu2 %vm5261_vm11, %v1874_v40  ;;  %vm2694_vm11 = vcmp.lt.s32.totalorder %v2692_v0, 0 }
0x1572   :  { %vm4697_vm10 = vmand %vm2694_vm11, %vm2693_vm2  ;;  %vm4744_vm2 = vcmp.eq.s32.totalorder %v2505_v31, 1 }
0x1573   :  { %vm4714_vm11 = vmand %vm3270_vm12, %vm3269_vm6  ;;  %v2697_v34 = vsel %vm4697_vm10, %v2696_v20, %v2692_v0  ;;  %vm5294_vm12 = vcmask 261120  }
0x1574   :  { %v3273_v13 = vsel %vm4714_vm11, %v3272_v26, %v3268_v21  ;;  %vm4748_vm3 = vcmp.eq.s32.totalorder %v2697_v34, 1  ;;  %v4818_v26 = vld [vmem:[#allocation10 + $0x8] sm:$0xff]  ;;  %vm5295_vm13 = vmmov %vm5294_vm12 }
0x1575   :  { %vm4764_vm8 = vcmp.eq.s32.totalorder %v3273_v13, 1 }
0x15f4   :  { %v1894_v57 = vpop.f32.mrf.mxu2 }
0x15f5   :  { %v1895_v15 = vadd.f32 %v3570_v51, %v1894_v57  ;;  %v4812_v51 = vld [vmem:[#allocation10 + $0x10] sm:$0xff] }
0x15f6   :  { %2008 = vmatpush.msra.mxu0 %v4812_v51 }
0x15f7   :  { %v4752_v33 = vperm.slane %v1895_v15, 0  ;;  %v4754_v41 = vperm.slane %v1895_v15, 1 }
0x15f8   :  { %2009 = vmatpush.msra.mxu0 %v4818_v26 }
0x15f9   :  { %v1935_v6 = vsel %vm4730_vm14, %v4754_v41, %v4752_v33  ;;  %v2123_v43 = vsel %vm4736_vm0, %v4754_v41, %v4752_v33  ;;  %v2315_v44 = vsel %vm4740_vm1, %v4754_v41, %v4752_v33  ;;  %v2507_v45 = vsel %vm4744_vm2, %v4754_v41, %v4752_v33 }
0x15fa   :  { %v1956_v11 = vadd.f32 %v1953_v61, %v1935_v6  ;;  %v2699_v46 = vsel %vm4748_vm3, %v4754_v41, %v4752_v33  ;;  %v2891_v47 = vsel %vm4756_vm4, %v4754_v41, %v4752_v33  ;;  %v3083_v9 = vsel %vm4760_vm7, %v4754_v41, %v4752_v33  ;;  %2010 = vmatpush.msra.mxu0 %v4824_v29 }
0x15fb   :  { %v3275_v48 = vsel %vm4764_vm8, %v4754_v41, %v4752_v33  ;;  %2011 = vmatmul.f32.vlgmr.msra.gmra.mxu0 %v4084_v7 }
0x15fc   :  { %3765 = vtanh.f32 %v1956_v11  ;;  %v3511_v50 = vmul.f32 -1.442695, %v1956_v11  ;;  %2200 = vmatpush.msrb.mxu0 %v4808_v32 }
0x15fe   :  { %3767 = vpow2.f32 %v3511_v50  ;;  %2201 = vmatpush.msrb.mxu0 %v4812_v51 }
0x1600   :  { %2202 = vmatpush.msrb.mxu0 %v4818_v26 }
0x1602   :  { %v3766_v49 = vpop.eup %3765  ;;  %2203 = vmatpush.msrb.mxu0 %v4824_v29 }
0x1603   :  { %1979 = vrot.lane.b32.xlu2 %v3766_v49, %s4085_s7 }
0x1604   :  { %v3768_v52 = vpop.eup %3767  ;;  %2392 = vmatpush.msra.mxu0 %v4808_v32 }
0x1605   :  { %v1960_v54 = vadd.f32 1.0, %v3768_v52 }
0x1606   :  { %2393 = vmatpush.msra.mxu0 %v4812_v51 }
0x1607   :  { %3769 = vrcp.f32 %v1960_v54  ;;  %v1972_v53 = vand.u32 2147483648, %v1960_v54  ;;  %vm1966_vm9 = vweird.f32 %v1960_v54  ;;  %v1970_v2 = vand.u32 2147483647, %v1960_v54 }
0x1608   :  { %2394 = vmatpush.msra.mxu0 %v4818_v26 }
0x1609   :  { %v1973_v1 = vor.u32 1.1754944e-38, %v1972_v53  ;;  %vm1971_vm6 = vcmp.eq.f32.partialorder %v1970_v2, 8.507059e+37 }
0x160a   :  { %2395 = vmatpush.msra.mxu0 %v4824_v29 }
0x160d   :  { %v3770_v56 = vpop.eup %3769 }
0x160e   :  { %v1962_v16 = vmul.f32 %v3770_v56, %v1960_v54  ;;  %vm1967_vm5 = vweird.f32 %v3770_v56 }
0x160f   :  { %vm1968_vm10 = vmor %vm1966_vm9, %vm1967_vm5 }
0x1610   :  { %v1963_v63 = vsub.f32 1.0, %v1962_v16 }
0x1612   :  { %v1964_v0 = vmul.f32 %v3770_v56, %v1963_v63 }
0x1614   :  { %v1965_v58 = vadd.f32 %v3770_v56, %v1964_v0 }
0x1616   :  { %v1969_v8 = vsel %vm1968_vm10, %v3770_v56, %v1965_v58 }
0x1617   :  { %v1974_v25 = vsel %vm1971_vm6, %v1973_v1, %v1969_v8 }
0x1618   :  { %v1977_v10 = vmul.f32 0.0, %v1974_v25 }
0x165d   :  { %v1980_v21 = vpop.permute.xlu2 %1979 }
0x165e   :  { %v1982_v3 = vmul.f32 %v1980_v21, %v1974_v25 }
0x1660   :  { %1984 = vrot.lane.b32.xlu0 %v1982_v3, %s4086_s3 }
0x1678   :  { %v2012_v59 = vpop.f32.mrf.mxu0 }
0x16d2   :  { %v1985_v12 = vpop.permute.xlu0 %1984 }
0x16d3   :  { %v4802_v14 = vadd.f32 %v1985_v12, %v1977_v10 }
0x16d5   :  { %3771 = vtanh.f32 %v4802_v14 }
0x16db   :  { %v3772_v35 = vpop.eup %3771 }
0x16dc   :  { %1990 = vrot.lane.b32.xlu1 %v3772_v35, %s4085_s7 }
0x174e   :  { %v1991_v40 = vpop.permute.xlu1 %1990 }
0x174f   :  { %v1993_v20 = vmul.f32 %v1991_v40, %v1974_v25 }
0x1751   :  { %v1994_v22 = vmax.f32 %v1993_v20, 0.0  ;;  %2125 = vrot.lane.b32.xlu2 %v1993_v20, %s4086_s3 }
0x1753   :  { %2016 = vrot.lane.b32.xlu0 %v1994_v22, %s4086_s3 }
0x17ab   :  { %v2126_v7 = vpop.permute.xlu2 %2125 }
0x17ac   :  { %3515 = vmatmul.msk.f32.vlgmr.msrb.gmra.mxu3 %vm5294_vm12, %v2126_v7 }
0x17ad   :  { %2525 = vmatpush.msrb.mxu3 %v4642_v4 }
0x17af   :  { %2526 = vmatpush.msrb.mxu3 %v4644_v5 }
0x17b1   :  { %2527 = vmatpush.msrb.mxu3 %v4649_v19 }
0x17b3   :  { %2528 = vmatpush.msrb.mxu3 %v4651_v27 }
0x17c5   :  { %v2017_v30 = vpop.permute.xlu0 %2016 }
0x17c6   :  { %3512 = vmatmul.msk.f32.vlgmr.msrb.gmra.mxu1 %vm5295_vm13, %v2017_v30  ;;  %vm5296_vm13 = vmmov %vm5294_vm12 }
0x17c7   :  { %2417 = vmatpush.msrb.mxu1 %v4810_v23 }
0x17c9   :  { %2418 = vmatpush.msrb.mxu1 %v4816_v24 }
0x17cb   :  { %2419 = vmatpush.msrb.mxu1 %v4820_v28 }
0x17cd   :  { %2420 = vmatpush.msrb.mxu1 %v4826_v18 }
0x182f   :  { %v2146_v31 = vpop.f32.mrf.mxu3 }
0x1830   :  { %v2149_v34 = vadd.f32 %v2146_v31, %v2123_v43 }
0x1832   :  { %3773 = vtanh.f32 %v2149_v34  ;;  %v3516_v6 = vmul.f32 -1.442695, %v2149_v34 }
0x1838   :  { %v3774_v57 = vpop.eup %3773 }
0x1839   :  { %2172 = vrot.lane.b32.xlu1 %v3774_v57, %s4085_s7 }
0x1843   :  { %v2037_v15 = vpop.f32.mrf.mxu1 }
0x1844   :  { %v2038_v36 = vadd.f32 %v2037_v15, %v2012_v59 }
0x1846   :  { %v2040_v13 = vadd.f32 %v4864_v60, %v2038_v36 }
0x1848   :  { %3775 = vtanh.f32 %v2040_v13  ;;  %v3513_v61 = vmul.f32 -1.442695, %v2040_v13 }
0x184a   :  { %3777 = vpow2.f32 %v3513_v61 }
0x184b   :  { %3779 = vpow2.f32 %v3516_v6 }
0x184e   :  { %v3776_v42 = vpop.eup %3775 }
0x184f   :  { %2063 = vrot.lane.b32.xlu2 %v3776_v42, %s4085_s7 }
0x1850   :  { %v3778_v43 = vpop.eup %3777 }
0x1851   :  { %v3780_v11 = vpop.eup %3779  ;;  %v2044_v49 = vadd.f32 1.0, %v3778_v43  ;;  %v4882_v43 = vld [vmem:[%s5258_s13 + $0x18] sm:$0xff] }
0x1852   :  { %v2153_v50 = vadd.f32 1.0, %v3780_v11  ;;  %2095 = vmatpush.msrb.mxu2 %v4882_v43  ;;  %v4893_v11 = vld [vmem:[%s5258_s13 + $0x8] sm:$0xff] }
0x1853   :  { %3781 = vrcp.f32 %v2044_v49  ;;  %v2056_v8 = vand.u32 2147483648, %v2044_v49  ;;  %vm2050_vm11 = vweird.f32 %v2044_v49  ;;  %v2054_v1 = vand.u32 2147483647, %v2044_v49 }
0x1854   :  { %3783 = vrcp.f32 %v2153_v50  ;;  %v2165_v25 = vand.u32 2147483648, %v2153_v50  ;;  %vm2159_vm5 = vweird.f32 %v2153_v50  ;;  %v2163_v10 = vand.u32 2147483647, %v2153_v50 }
0x1855   :  { %v2057_v12 = vor.u32 1.1754944e-38, %v2056_v8  ;;  %vm2055_vm10 = vcmp.eq.f32.partialorder %v2054_v1, 8.507059e+37 }
0x1856   :  { %v2166_v22 = vor.u32 1.1754944e-38, %v2165_v25  ;;  %vm2164_vm6 = vcmp.eq.f32.partialorder %v2163_v10, 8.507059e+37 }
0x1859   :  { %v3782_v52 = vpop.eup %3781 }
0x185a   :  { %v3784_v54 = vpop.eup %3783  ;;  %v2046_v56 = vmul.f32 %v3782_v52, %v2044_v49  ;;  %vm2051_vm15 = vweird.f32 %v3782_v52  ;;  %v4899_v49 = vld [vmem:[%s5258_s13] sm:$0xff] }
0x185b   :  { %v2155_v16 = vmul.f32 %v3784_v54, %v2153_v50  ;;  %vm2160_vm14 = vweird.f32 %v3784_v54  ;;  %vm2052_vm0 = vmor %vm2050_vm11, %vm2051_vm15 }
0x185c   :  { %v2047_v63 = vsub.f32 1.0, %v2046_v56  ;;  %vm2161_vm9 = vmor %vm2159_vm5, %vm2160_vm14  ;;  %vm2106_vm14 = vcmask 24576  }
0x185d   :  { %v2156_v0 = vsub.f32 1.0, %v2155_v16  ;;  %vm5297_vm15 = vmmov %vm5294_vm12 }
0x185e   :  { %v2048_v58 = vmul.f32 %v3782_v52, %v2047_v63  ;;  %vm5298_vm11 = vmmov %vm5294_vm12 }
0x185f   :  { %v2157_v53 = vmul.f32 %v3784_v54, %v2156_v0 }
0x1860   :  { %v2049_v2 = vadd.f32 %v3782_v52, %v2048_v58 }
0x1861   :  { %v2158_v21 = vadd.f32 %v3784_v54, %v2157_v53  ;;  %v4933_v53 = vld [vmem:[%s5259_s14] ss:$0 sm:$0xff] }
0x1862   :  { %v2053_v3 = vsel %vm2052_vm0, %v3782_v52, %v2049_v2 }
0x1863   :  { %v2162_v35 = vsel %vm2161_vm9, %v3784_v54, %v2158_v21  ;;  %v2058_v20 = vsel %vm2055_vm10, %v2057_v12, %v2053_v3 }
0x1864   :  { %v2167_v31 = vsel %vm2164_vm6, %v2166_v22, %v2162_v35  ;;  %v2061_v57 = vmul.f32 0.0, %v2058_v20 }
0x1865   :  { %v2170_v36 = vmul.f32 %v2167_v31, %v4802_v14  ;;  %v4887_v14 = vld [vmem:[%s5258_s13 + $0x10] sm:$0xff] }
0x1866   :  { %2096 = vmatpush.msrb.mxu2 %v4887_v14 }
0x1868   :  { %2097 = vmatpush.msrb.mxu2 %v4893_v11 }
0x186a   :  { %2098 = vmatpush.msrb.mxu2 %v4899_v49 }
0x186c   :  { %2288 = vmatpush.msra.mxu2 %v4882_v43 }
0x186e   :  { %2289 = vmatpush.msra.mxu2 %v4887_v14 }
0x1870   :  { %2290 = vmatpush.msra.mxu2 %v4893_v11 }
0x1872   :  { %2291 = vmatpush.msra.mxu2 %v4899_v49 }
0x18a9   :  { %v2064_v40 = vpop.permute.xlu2 %2063 }
0x18aa   :  { %v2066_v7 = vmul.f32 %v2064_v40, %v2058_v20 }
0x18ab   :  { %v2173_v30 = vpop.permute.xlu1 %2172 }
0x18ac   :  { %v2175_v34 = vmul.f32 %v2173_v30, %v2167_v31  ;;  %2068 = vrot.lane.b32.xlu1 %v2066_v7, %s4086_s3 }
0x18ae   :  { %2177 = vrot.lane.b32.xlu0 %v2175_v34, %s4086_s3 }
0x191e   :  { %v2069_v59 = vpop.permute.xlu1 %2068 }
0x191f   :  { %v4870_v15 = vadd.f32 %v2069_v59, %v2061_v57 }
0x1920   :  { %v2178_v13 = vpop.permute.xlu0 %2177 }
0x1921   :  { %3785 = vtanh.f32 %v4870_v15  ;;  %v4874_v42 = vadd.f32 %v2178_v13, %v2170_v36 }
0x1923   :  { %3787 = vtanh.f32 %v4874_v42 }
0x1927   :  { %v3786_v61 = vpop.eup %3785 }
0x1928   :  { %2074 = vrot.lane.b32.xlu0 %v3786_v61, %s4085_s7 }
0x1929   :  { %v3788_v6 = vpop.eup %3787 }
0x192a   :  { %2183 = vrot.lane.b32.xlu2 %v3788_v6, %s4085_s7 }
0x1984   :  { %v2184_v50 = vpop.permute.xlu2 %2183 }
0x1985   :  { %v2186_v52 = vmul.f32 %v2184_v50, %v2167_v31 }
0x1987   :  { %v2187_v54 = vmax.f32 %v2186_v52, 0.0  ;;  %2317 = vrot.lane.b32.xlu1 %v2186_v52, %s4086_s3 }
0x1989   :  { %2209 = vrot.lane.b32.xlu0 %v2187_v54, %s4086_s3 }
0x199a   :  { %v2075_v56 = vpop.permute.xlu0 %2074 }
0x199b   :  { %v2077_v16 = vmul.f32 %v2075_v56, %v2058_v20 }
0x199d   :  { %2079 = vrot.lane.b32.xlu2 %v2077_v16, %s4086_s3 }
0x19f7   :  { %v2080_v63 = vpop.permute.xlu2 %2079 }
0x19f8   :  { %3514 = vmatmul.msk.f32.vlgmr.msrb.gmra.mxu2 %vm5294_vm12, %v2080_v63  ;;  %3517 = vmatmul.msk.f32.vlgmr.msrb.gmra.mxu0 %vm5296_vm13, %v2080_v63 }
0x19f9   :  { %v2318_v0 = vpop.permute.xlu1 %2317  ;;  %2480 = vmatpush.msrb.mxu2 %v4882_v43  ;;  %2584 = vmatpush.msrb.mxu0 %v4808_v32 }
0x19fa   :  { %3521 = vmatmul.msk.f32.vlgmr.msra.gmra.mxu3 %vm5297_vm15, %v2318_v0  ;;  %vm5299_vm15 = vmmov %vm5298_vm11 }
0x19fb   :  { %v2210_v58 = vpop.permute.xlu0 %2209  ;;  %2481 = vmatpush.msrb.mxu2 %v4887_v14  ;;  %2585 = vmatpush.msrb.mxu0 %v4812_v51 }
0x19fc   :  { %3518 = vmatmul.msk.f32.vlgmr.msra.gmra.mxu1 %vm5298_vm11, %v2210_v58  ;;  %2717 = vmatpush.msra.mxu3 %v4642_v4 }
0x19fd   :  { %2482 = vmatpush.msrb.mxu2 %v4893_v11  ;;  %2586 = vmatpush.msrb.mxu0 %v4818_v26 }
0x19fe   :  { %2718 = vmatpush.msra.mxu3 %v4644_v5  ;;  %2609 = vmatpush.msra.mxu1 %v4810_v23 }
0x19ff   :  { %2483 = vmatpush.msrb.mxu2 %v4899_v49  ;;  %2587 = vmatpush.msrb.mxu0 %v4824_v29 }
0x1a00   :  { %2719 = vmatpush.msra.mxu3 %v4649_v19  ;;  %2610 = vmatpush.msra.mxu1 %v4816_v24 }
0x1a02   :  { %2720 = vmatpush.msra.mxu3 %v4651_v27  ;;  %2611 = vmatpush.msra.mxu1 %v4820_v28 }
0x1a04   :  { %2612 = vmatpush.msra.mxu1 %v4826_v18 }
0x1a75   :  { %v2205_v2 = vpop.f32.mrf.mxu0 }
0x1a79   :  { %v2230_v8 = vpop.f32.mrf.mxu1 }
0x1a7a   :  { %v2231_v1 = vadd.f32 %v2230_v8, %v2205_v2 }
0x1a7b   :  { %v2100_v21 = vpop.f32.mrf.mxu2 }
0x1a7c   :  { %v2233_v25 = vadd.f32 %v4864_v60, %v2231_v1  ;;  %v2101_v3 = vadd.f32 %v4933_v53, %v2100_v21 }
0x1a7d   :  { %v2338_v10 = vpop.f32.mrf.mxu3 }
0x1a7e   :  { %3789 = vtanh.f32 %v2233_v25  ;;  %v2104_v12 = vrot.slane %v2101_v3, 1  ;;  %2107 = vst.msk [vmem:[%s5260_s15] sm:$0x1] %vm2106_vm14, %v2101_v3  ;;  %v2341_v35 = vadd.f32 %v2338_v10, %v2315_v44  ;;  %v3519_v22 = vmul.f32 -1.442695, %v2233_v25 }
0x1a80   :  { %2108 = vst.msk [vmem:[%s5260_s15 + $0x8] sm:$0x1] %vm2106_vm14, %v2104_v12  ;;  %3791 = vtanh.f32 %v2341_v35  ;;  %v3522_v44 = vmul.f32 -1.442695, %v2341_v35 }
0x1a81   :  { %3793 = vpow2.f32 %v3519_v22 }
0x1a84   :  { %v3790_v40 = vpop.eup %3789 }
0x1a85   :  { %2256 = vrot.lane.b32.xlu2 %v3790_v40, %s4085_s7 }
0x1a86   :  { %v3792_v20 = vpop.eup %3791 }
0x1a87   :  { %2364 = vrot.lane.b32.xlu1 %v3792_v20, %s4085_s7  ;;  %v3794_v7 = vpop.eup %3793 }
0x1a88   :  { %v2237_v37 = vadd.f32 1.0, %v3794_v7 }
0x1a8a   :  { %3795 = vrcp.f32 %v2237_v37  ;;  %v2249_v13 = vand.u32 2147483648, %v2237_v37  ;;  %vm2243_vm0 = vweird.f32 %v2237_v37  ;;  %v2247_v6 = vand.u32 2147483647, %v2237_v37 }
0x1a8b   :  { %3797 = vpow2.f32 %v3522_v44 }
0x1a8c   :  { %v2250_v52 = vor.u32 1.1754944e-38, %v2249_v13  ;;  %vm2248_vm9 = vcmp.eq.f32.partialorder %v2247_v6, 8.507059e+37 }
0x1a90   :  { %v3796_v30 = vpop.eup %3795 }
0x1a91   :  { %v2239_v31 = vmul.f32 %v3796_v30, %v2237_v37  ;;  %v3798_v59 = vpop.eup %3797  ;;  %vm2244_vm1 = vweird.f32 %v3796_v30 }
0x1a92   :  { %v2345_v61 = vadd.f32 1.0, %v3798_v59  ;;  %vm2245_vm5 = vmor %vm2243_vm0, %vm2244_vm1 }
0x1a93   :  { %v2240_v34 = vsub.f32 1.0, %v2239_v31  ;;  %vm5300_vm1 = vmmov %vm5298_vm11 }
0x1a94   :  { %3799 = vrcp.f32 %v2345_v61  ;;  %v2357_v1 = vand.u32 2147483648, %v2345_v61  ;;  %vm2351_vm6 = vweird.f32 %v2345_v61  ;;  %v2355_v21 = vand.u32 2147483647, %v2345_v61  ;;  %vm5301_vm0 = vmmov %vm5300_vm1 }
0x1a95   :  { %v2241_v57 = vmul.f32 %v3796_v30, %v2240_v34 }
0x1a96   :  { %v2358_v3 = vor.u32 1.1754944e-38, %v2357_v1  ;;  %vm2356_vm13 = vcmp.eq.f32.partialorder %v2355_v21, 8.507059e+37 }
0x1a97   :  { %v2242_v36 = vadd.f32 %v3796_v30, %v2241_v57 }
0x1a99   :  { %v2246_v50 = vsel %vm2245_vm5, %v3796_v30, %v2242_v36 }
0x1a9a   :  { %v2251_v56 = vsel %vm2248_vm9, %v2250_v52, %v2246_v50  ;;  %v3800_v63 = vpop.eup %3799 }
0x1a9b   :  { %v2347_v0 = vmul.f32 %v3800_v63, %v2345_v61  ;;  %vm2352_vm10 = vweird.f32 %v3800_v63  ;;  %v2254_v40 = vmul.f32 %v2251_v56, %v4870_v15 }
0x1a9c   :  { %vm2353_vm12 = vmor %vm2351_vm6, %vm2352_vm10 }
0x1a9d   :  { %v2348_v58 = vsub.f32 1.0, %v2347_v0 }
0x1a9f   :  { %v2349_v2 = vmul.f32 %v3800_v63, %v2348_v58 }
0x1aa1   :  { %v2350_v8 = vadd.f32 %v3800_v63, %v2349_v2 }
0x1aa3   :  { %v2354_v25 = vsel %vm2353_vm12, %v3800_v63, %v2350_v8 }
0x1aa4   :  { %v2359_v12 = vsel %vm2356_vm13, %v2358_v3, %v2354_v25 }
0x1aa5   :  { %v2362_v37 = vmul.f32 %v2359_v12, %v4874_v42 }
0x1adf   :  { %v2257_v54 = vpop.permute.xlu2 %2256 }
0x1ae0   :  { %v2259_v16 = vmul.f32 %v2257_v54, %v2251_v56 }
0x1ae2   :  { %2261 = vrot.lane.b32.xlu1 %v2259_v16, %s4086_s3 }
0x1af9   :  { %v2365_v10 = vpop.permute.xlu1 %2364 }
0x1afa   :  { %v2367_v35 = vmul.f32 %v2365_v10, %v2359_v12 }
0x1afc   :  { %2369 = vrot.lane.b32.xlu0 %v2367_v35, %s4086_s3 }
0x1b54   :  { %v2262_v20 = vpop.permute.xlu1 %2261 }
0x1b55   :  { %v4955_v22 = vadd.f32 %v2262_v20, %v2254_v40 }
0x1b57   :  { %3801 = vtanh.f32 %v4955_v22 }
0x1b5d   :  { %v3802_v7 = vpop.eup %3801 }
0x1b5e   :  { %2267 = vrot.lane.b32.xlu0 %v3802_v7, %s4085_s7 }
0x1b6e   :  { %v2370_v30 = vpop.permute.xlu0 %2369 }
0x1b6f   :  { %v4960_v31 = vadd.f32 %v2370_v30, %v2362_v37 }
0x1b71   :  { %3803 = vtanh.f32 %v4960_v31 }
0x1b77   :  { %v3804_v44 = vpop.eup %3803 }
0x1b78   :  { %2375 = vrot.lane.b32.xlu2 %v3804_v44, %s4085_s7 }
0x1bd0   :  { %v2268_v34 = vpop.permute.xlu0 %2267 }
0x1bd1   :  { %v2270_v15 = vmul.f32 %v2268_v34, %v2251_v56 }
0x1bd2   :  { %v2376_v57 = vpop.permute.xlu2 %2375 }
0x1bd3   :  { %2272 = vrot.lane.b32.xlu2 %v2270_v15, %s4086_s3  ;;  %v2378_v59 = vmul.f32 %v2376_v57, %v2359_v12 }
0x1bd5   :  { %v2379_v36 = vmax.f32 %v2378_v59, 0.0  ;;  %2509 = vrot.lane.b32.xlu1 %v2378_v59, %s4086_s3 }
0x1bd7   :  { %2401 = vrot.lane.b32.xlu0 %v2379_v36, %s4086_s3 }
0x1c2d   :  { %v2273_v42 = vpop.permute.xlu2 %2272 }
0x1c2e   :  { %3520 = vmatmul.msk.f32.vlgmr.msra.gmra.mxu2 %vm5299_vm15, %v2273_v42  ;;  %3523 = vmatmul.msk.f32.vlgmr.msra.gmra.mxu0 %vm5298_vm11, %v2273_v42  ;;  %vm5302_vm11 = vmmov %vm5301_vm0 }
0x1c2f   :  { %2672 = vmatpush.msra.mxu2 %v4882_v43  ;;  %2776 = vmatpush.msra.mxu0 %v4808_v32 }
0x1c31   :  { %2673 = vmatpush.msra.mxu2 %v4887_v14  ;;  %2777 = vmatpush.msra.mxu0 %v4812_v51 }
0x1c33   :  { %2674 = vmatpush.msra.mxu2 %v4893_v11  ;;  %2778 = vmatpush.msra.mxu0 %v4818_v26 }
0x1c35   :  { %2675 = vmatpush.msra.mxu2 %v4899_v49  ;;  %2779 = vmatpush.msra.mxu0 %v4824_v29 }
0x1c47   :  { %v2510_v13 = vpop.permute.xlu1 %2509 }
0x1c48   :  { %3527 = vmatmul.msk.f32.vlgmr.msrb.gmra.mxu3 %vm5300_vm1, %v2510_v13  ;;  %vm5303_vm1 = vmmov %vm5301_vm0 }
0x1c49   :  { %v2402_v61 = vpop.permute.xlu0 %2401  ;;  %2909 = vmatpush.msrb.mxu3 %v4642_v4 }
0x1c4a   :  { %3524 = vmatmul.msk.f32.vlgmr.msrb.gmra.mxu1 %vm5301_vm0, %v2402_v61 }
0x1c4b   :  { %2910 = vmatpush.msrb.mxu3 %v4644_v5  ;;  %2801 = vmatpush.msrb.mxu1 %v4810_v23 }
0x1c4d   :  { %2911 = vmatpush.msrb.mxu3 %v4649_v19  ;;  %2802 = vmatpush.msrb.mxu1 %v4816_v24 }
0x1c4f   :  { %2912 = vmatpush.msrb.mxu3 %v4651_v27  ;;  %2803 = vmatpush.msrb.mxu1 %v4820_v28 }
0x1c51   :  { %2804 = vmatpush.msrb.mxu1 %v4826_v18 }
0x1cab   :  { %v2397_v5 = vpop.f32.mrf.mxu0 }
0x1cb1   :  { %v2293_v6 = vpop.f32.mrf.mxu2 }
0x1cb2   :  { %v2294_v50 = vadd.f32 %v4933_v53, %v2293_v6 }
0x1cb4   :  { %v2297_v4 = vrot.slane %v2294_v50, 1  ;;  %2299 = vst.msk [vmem:[%s5260_s15 + $0x1] sm:$0x1] %vm2106_vm14, %v2294_v50 }
0x1cb6   :  { %2300 = vst.msk [vmem:[%s5260_s15 + $0x9] sm:$0x1] %vm2106_vm14, %v2297_v4 }
0x1cc7   :  { %v2422_v19 = vpop.f32.mrf.mxu1 }
0x1cc8   :  { %v2423_v27 = vadd.f32 %v2422_v19, %v2397_v5 }
0x1cca   :  { %v2425_v52 = vadd.f32 %v4864_v60, %v2423_v27 }
0x1ccb   :  { %v2530_v54 = vpop.f32.mrf.mxu3 }
0x1ccc   :  { %3805 = vtanh.f32 %v2425_v52  ;;  %v2533_v56 = vadd.f32 %v2530_v54, %v2507_v45  ;;  %v3525_v0 = vmul.f32 -1.442695, %v2425_v52 }
0x1cce   :  { %3807 = vtanh.f32 %v2533_v56  ;;  %v3528_v21 = vmul.f32 -1.442695, %v2533_v56 }
0x1ccf   :  { %3809 = vpow2.f32 %v3525_v0 }
0x1cd2   :  { %v3806_v16 = vpop.eup %3805 }
0x1cd3   :  { %2448 = vrot.lane.b32.xlu2 %v3806_v16, %s4085_s7 }
0x1cd4   :  { %v3808_v63 = vpop.eup %3807 }
0x1cd5   :  { %2556 = vrot.lane.b32.xlu1 %v3808_v63, %s4085_s7  ;;  %v3810_v58 = vpop.eup %3809 }
0x1cd6   :  { %v2429_v2 = vadd.f32 1.0, %v3810_v58 }
0x1cd8   :  { %3811 = vrcp.f32 %v2429_v2  ;;  %v2441_v10 = vand.u32 2147483648, %v2429_v2  ;;  %vm2435_vm5 = vweird.f32 %v2429_v2  ;;  %v2439_v35 = vand.u32 2147483647, %v2429_v2 }
0x1cd9   :  { %3813 = vpow2.f32 %v3528_v21 }
0x1cda   :  { %v2442_v20 = vor.u32 1.1754944e-38, %v2441_v10  ;;  %vm2440_vm10 = vcmp.eq.f32.partialorder %v2439_v35, 8.507059e+37 }
0x1cde   :  { %v3812_v8 = vpop.eup %3811 }
0x1cdf   :  { %v2431_v1 = vmul.f32 %v3812_v8, %v2429_v2  ;;  %v3814_v3 = vpop.eup %3813  ;;  %vm2436_vm2 = vweird.f32 %v3812_v8 }
0x1ce0   :  { %v2537_v12 = vadd.f32 1.0, %v3814_v3  ;;  %vm2437_vm9 = vmor %vm2435_vm5, %vm2436_vm2  ;;  %v5038_v3 = vld [vmem:[#allocation7 + $0x8] sm:$0xff] }
0x1ce1   :  { %v2432_v39 = vsub.f32 1.0, %v2431_v1  ;;  %vm5304_vm2 = vmmov %vm5301_vm0 }
0x1ce2   :  { %3815 = vrcp.f32 %v2537_v12  ;;  %v2549_v36 = vand.u32 2147483648, %v2537_v12  ;;  %vm2543_vm12 = vweird.f32 %v2537_v12  ;;  %v2547_v42 = vand.u32 2147483647, %v2537_v12 }
0x1ce3   :  { %v2433_v25 = vmul.f32 %v3812_v8, %v2432_v39  ;;  %v5030_v39 = vld [vmem:[#allocation7 + $0x18] sm:$0xff] }
0x1ce4   :  { %v2550_v61 = vor.u32 1.1754944e-38, %v2549_v36  ;;  %vm2548_vm15 = vcmp.eq.f32.partialorder %v2547_v42, 8.507059e+37 }
0x1ce5   :  { %v2434_v45 = vadd.f32 %v3812_v8, %v2433_v25  ;;  %v5034_v25 = vld [vmem:[#allocation7 + $0x10] sm:$0xff] }
0x1ce7   :  { %v2438_v40 = vsel %vm2437_vm9, %v3812_v8, %v2434_v45  ;;  %v5042_v45 = vld [vmem:[#allocation7] sm:$0xff] }
0x1ce8   :  { %v2443_v37 = vsel %vm2440_vm10, %v2442_v20, %v2438_v40  ;;  %v3816_v44 = vpop.eup %3815 }
0x1ce9   :  { %v2539_v34 = vmul.f32 %v3816_v44, %v2537_v12  ;;  %vm2544_vm6 = vweird.f32 %v3816_v44  ;;  %v2446_v5 = vmul.f32 %v2443_v37, %v4955_v22 }
0x1cea   :  { %vm2545_vm13 = vmor %vm2543_vm12, %vm2544_vm6 }
0x1ceb   :  { %v2540_v15 = vsub.f32 1.0, %v2539_v34 }
0x1ced   :  { %v2541_v57 = vmul.f32 %v3816_v44, %v2540_v15 }
0x1cef   :  { %v2542_v59 = vadd.f32 %v3816_v44, %v2541_v57 }
0x1cf1   :  { %v2546_v13 = vsel %vm2545_vm13, %v3816_v44, %v2542_v59 }
0x1cf2   :  { %v2551_v50 = vsel %vm2548_vm15, %v2550_v61, %v2546_v13 }
0x1cf3   :  { %v2554_v54 = vmul.f32 %v2551_v50, %v4960_v31 }
0x1d2d   :  { %v2449_v7 = vpop.permute.xlu2 %2448 }
0x1d2e   :  { %v2451_v30 = vmul.f32 %v2449_v7, %v2443_v37 }
0x1d30   :  { %2453 = vrot.lane.b32.xlu1 %v2451_v30, %s4086_s3 }
0x1d47   :  { %v2557_v6 = vpop.permute.xlu1 %2556 }
0x1d48   :  { %v2559_v4 = vmul.f32 %v2557_v6, %v2551_v50 }
0x1d4a   :  { %2561 = vrot.lane.b32.xlu0 %v2559_v4, %s4086_s3 }
0x1da2   :  { %v2454_v19 = vpop.permute.xlu1 %2453 }
0x1da3   :  { %v5007_v27 = vadd.f32 %v2454_v19, %v2446_v5 }
0x1da5   :  { %3817 = vtanh.f32 %v5007_v27 }
0x1dab   :  { %v3818_v52 = vpop.eup %3817 }
0x1dac   :  { %2459 = vrot.lane.b32.xlu0 %v3818_v52, %s4085_s7 }
0x1dbc   :  { %v2562_v56 = vpop.permute.xlu0 %2561 }
0x1dbd   :  { %v5012_v16 = vadd.f32 %v2562_v56, %v2554_v54 }
0x1dbf   :  { %3819 = vtanh.f32 %v5012_v16 }
0x1dc5   :  { %v3820_v63 = vpop.eup %3819 }
0x1dc6   :  { %2567 = vrot.lane.b32.xlu2 %v3820_v63, %s4085_s7 }
0x1e1e   :  { %v2460_v0 = vpop.permute.xlu0 %2459 }
0x1e1f   :  { %v2462_v22 = vmul.f32 %v2460_v0, %v2443_v37 }
0x1e20   :  { %v2568_v58 = vpop.permute.xlu2 %2567 }
0x1e21   :  { %2464 = vrot.lane.b32.xlu2 %v2462_v22, %s4086_s3  ;;  %v2570_v2 = vmul.f32 %v2568_v58, %v2551_v50 }
0x1e23   :  { %v2571_v8 = vmax.f32 %v2570_v2, 0.0  ;;  %2701 = vrot.lane.b32.xlu1 %v2570_v2, %s4086_s3 }
0x1e25   :  { %2593 = vrot.lane.b32.xlu0 %v2571_v8, %s4086_s3 }
0x1e7b   :  { %v2465_v31 = vpop.permute.xlu2 %2464 }
0x1e7c   :  { %3526 = vmatmul.msk.f32.vlgmr.msrb.gmra.mxu2 %vm5302_vm11, %v2465_v31  ;;  %3529 = vmatmul.msk.f32.vlgmr.msrb.gmra.mxu0 %vm5303_vm1, %v2465_v31  ;;  %vm5305_vm11 = vmmov %vm5301_vm0 }
0x1e7d   :  { %2864 = vmatpush.msrb.mxu2 %v4882_v43  ;;  %2968 = vmatpush.msrb.mxu0 %v4808_v32  ;;  %vm5306_vm1 = vmmov %vm5301_vm0 }
0x1e7f   :  { %2865 = vmatpush.msrb.mxu2 %v4887_v14  ;;  %2969 = vmatpush.msrb.mxu0 %v4812_v51 }
0x1e81   :  { %2866 = vmatpush.msrb.mxu2 %v4893_v11  ;;  %2970 = vmatpush.msrb.mxu0 %v4818_v26 }
0x1e83   :  { %2867 = vmatpush.msrb.mxu2 %v4899_v49  ;;  %2971 = vmatpush.msrb.mxu0 %v4824_v29 }
0x1e95   :  { %v2702_v1 = vpop.permute.xlu1 %2701 }
0x1e96   :  { %3533 = vmatmul.msk.f32.vlgmr.msra.gmra.mxu3 %vm5301_vm0, %v2702_v1 }
0x1e97   :  { %v2594_v21 = vpop.permute.xlu0 %2593  ;;  %3101 = vmatpush.msra.mxu3 %v5030_v39 }
0x1e98   :  { %3530 = vmatmul.msk.f32.vlgmr.msra.gmra.mxu1 %vm5304_vm2, %v2594_v21  ;;  %vm5307_vm2 = vmmov %vm5301_vm0 }
0x1e99   :  { %3102 = vmatpush.msra.mxu3 %v5034_v25  ;;  %2993 = vmatpush.msra.mxu1 %v4810_v23 }
0x1e9b   :  { %3103 = vmatpush.msra.mxu3 %v5038_v3  ;;  %2994 = vmatpush.msra.mxu1 %v4816_v24 }
0x1e9d   :  { %3104 = vmatpush.msra.mxu3 %v5042_v45  ;;  %2995 = vmatpush.msra.mxu1 %v4820_v28 }
0x1e9f   :  { %2996 = vmatpush.msra.mxu1 %v4826_v18 }
0x1ef9   :  { %v2589_v40 = vpop.f32.mrf.mxu0 }
0x1eff   :  { %v2485_v10 = vpop.f32.mrf.mxu2 }
0x1f00   :  { %v2486_v12 = vadd.f32 %v4933_v53, %v2485_v10 }
0x1f02   :  { %v2489_v35 = vrot.slane %v2486_v12, 1  ;;  %2491 = vst.msk [vmem:[%s5260_s15 + $0x2] sm:$0x1] %vm2106_vm14, %v2486_v12 }
0x1f04   :  { %2492 = vst.msk [vmem:[%s5260_s15 + $0xa] sm:$0x1] %vm2106_vm14, %v2489_v35 }
0x1f15   :  { %v2614_v20 = vpop.f32.mrf.mxu1 }
0x1f16   :  { %v2615_v7 = vadd.f32 %v2614_v20, %v2589_v40 }
0x1f18   :  { %v2617_v37 = vadd.f32 %v4864_v60, %v2615_v7 }
0x1f19   :  { %v2722_v30 = vpop.f32.mrf.mxu3 }
0x1f1a   :  { %3821 = vtanh.f32 %v2617_v37  ;;  %v2725_v44 = vadd.f32 %v2722_v30, %v2699_v46  ;;  %v3531_v57 = vmul.f32 -1.442695, %v2617_v37 }
0x1f1c   :  { %3823 = vtanh.f32 %v2725_v44  ;;  %v3534_v61 = vmul.f32 -1.442695, %v2725_v44 }
0x1f1d   :  { %3825 = vpow2.f32 %v3531_v57 }
0x1f20   :  { %v3822_v34 = vpop.eup %3821 }
0x1f21   :  { %2640 = vrot.lane.b32.xlu2 %v3822_v34, %s4085_s7 }
0x1f22   :  { %v3824_v15 = vpop.eup %3823 }
0x1f23   :  { %2748 = vrot.lane.b32.xlu1 %v3824_v15, %s4085_s7  ;;  %v3826_v59 = vpop.eup %3825 }
0x1f24   :  { %v2621_v36 = vadd.f32 1.0, %v3826_v59 }
0x1f26   :  { %3827 = vrcp.f32 %v2621_v36  ;;  %v2633_v4 = vand.u32 2147483648, %v2621_v36  ;;  %vm2627_vm5 = vweird.f32 %v2621_v36  ;;  %v2631_v19 = vand.u32 2147483647, %v2621_v36 }
0x1f27   :  { %3829 = vpow2.f32 %v3534_v61 }
0x1f28   :  { %v2634_v54 = vor.u32 1.1754944e-38, %v2633_v4  ;;  %vm2632_vm10 = vcmp.eq.f32.partialorder %v2631_v19, 8.507059e+37 }
0x1f2c   :  { %v3828_v42 = vpop.eup %3827 }
0x1f2d   :  { %v2623_v13 = vmul.f32 %v3828_v42, %v2621_v36  ;;  %v3830_v50 = vpop.eup %3829  ;;  %vm2628_vm3 = vweird.f32 %v3828_v42 }
0x1f2e   :  { %v2729_v5 = vadd.f32 1.0, %v3830_v50  ;;  %vm2629_vm9 = vmor %vm2627_vm5, %vm2628_vm3 }
0x1f2f   :  { %v2624_v38 = vsub.f32 1.0, %v2623_v13 }
0x1f30   :  { %3831 = vrcp.f32 %v2729_v5  ;;  %v2741_v1 = vand.u32 2147483648, %v2729_v5  ;;  %vm2735_vm12 = vweird.f32 %v2729_v5  ;;  %v2739_v21 = vand.u32 2147483647, %v2729_v5 }
0x1f31   :  { %v2625_v6 = vmul.f32 %v3828_v42, %v2624_v38 }
0x1f32   :  { %v2742_v12 = vor.u32 1.1754944e-38, %v2741_v1  ;;  %vm2740_vm15 = vcmp.eq.f32.partialorder %v2739_v21, 8.507059e+37 }
0x1f33   :  { %v2626_v46 = vadd.f32 %v3828_v42, %v2625_v6 }
0x1f35   :  { %v2630_v52 = vsel %vm2629_vm9, %v3828_v42, %v2626_v46 }
0x1f36   :  { %v2635_v63 = vsel %vm2632_vm10, %v2634_v54, %v2630_v52  ;;  %v3832_v22 = vpop.eup %3831 }
0x1f37   :  { %v2731_v58 = vmul.f32 %v3832_v22, %v2729_v5  ;;  %vm2736_vm6 = vweird.f32 %v3832_v22  ;;  %v2638_v7 = vmul.f32 %v2635_v63, %v5007_v27 }
0x1f38   :  { %vm2737_vm13 = vmor %vm2735_vm12, %vm2736_vm6 }
0x1f39   :  { %v2732_v2 = vsub.f32 1.0, %v2731_v58 }
0x1f3b   :  { %v2733_v8 = vmul.f32 %v3832_v22, %v2732_v2 }
0x1f3d   :  { %v2734_v31 = vadd.f32 %v3832_v22, %v2733_v8 }
0x1f3f   :  { %v2738_v10 = vsel %vm2737_vm13, %v3832_v22, %v2734_v31 }
0x1f40   :  { %v2743_v40 = vsel %vm2740_vm15, %v2742_v12, %v2738_v10  ;;  %vm5308_vm15 = vmmov %vm5301_vm0 }
0x1f41   :  { %v2746_v34 = vmul.f32 %v2743_v40, %v5012_v16 }
0x1f7b   :  { %v2641_v56 = vpop.permute.xlu2 %2640 }
0x1f7c   :  { %v2643_v0 = vmul.f32 %v2641_v56, %v2635_v63 }
0x1f7e   :  { %2645 = vrot.lane.b32.xlu1 %v2643_v0, %s4086_s3 }
0x1f95   :  { %v2749_v35 = vpop.permute.xlu1 %2748 }
0x1f96   :  { %v2751_v20 = vmul.f32 %v2749_v35, %v2743_v40 }
0x1f98   :  { %2753 = vrot.lane.b32.xlu0 %v2751_v20, %s4086_s3 }
0x1ff0   :  { %v2646_v37 = vpop.permute.xlu1 %2645 }
0x1ff1   :  { %v5067_v30 = vadd.f32 %v2646_v37, %v2638_v7 }
0x1ff3   :  { %3833 = vtanh.f32 %v5067_v30 }
0x1ff9   :  { %v3834_v44 = vpop.eup %3833 }
0x1ffa   :  { %2651 = vrot.lane.b32.xlu0 %v3834_v44, %s4085_s7 }
0x200a   :  { %v2754_v15 = vpop.permute.xlu0 %2753 }
0x200b   :  { %v5072_v57 = vadd.f32 %v2754_v15, %v2746_v34 }
0x200d   :  { %3835 = vtanh.f32 %v5072_v57 }
0x2013   :  { %v3836_v59 = vpop.eup %3835 }
0x2014   :  { %2759 = vrot.lane.b32.xlu2 %v3836_v59, %s4085_s7 }
0x206c   :  { %v2652_v36 = vpop.permute.xlu0 %2651 }
0x206d   :  { %v2654_v27 = vmul.f32 %v2652_v36, %v2635_v63 }
0x206e   :  { %v2760_v42 = vpop.permute.xlu2 %2759 }
0x206f   :  { %2656 = vrot.lane.b32.xlu2 %v2654_v27, %s4086_s3  ;;  %v2762_v13 = vmul.f32 %v2760_v42, %v2743_v40 }
0x2071   :  { %v2763_v61 = vmax.f32 %v2762_v13, 0.0  ;;  %2893 = vrot.lane.b32.xlu1 %v2762_v13, %s4086_s3 }
0x2073   :  { %2785 = vrot.lane.b32.xlu0 %v2763_v61, %s4086_s3 }
0x20c9   :  { %v2657_v16 = vpop.permute.xlu2 %2656 }
0x20ca   :  { %3532 = vmatmul.msk.f32.vlgmr.msra.gmra.mxu2 %vm5305_vm11, %v2657_v16  ;;  %3535 = vmatmul.msk.f32.vlgmr.msra.gmra.mxu0 %vm5306_vm1, %v2657_v16  ;;  %vm5309_vm11 = vmmov %vm5301_vm0 }
0x20cb   :  { %3056 = vmatpush.msra.mxu2 %v4882_v43  ;;  %3160 = vmatpush.msra.mxu0 %v4808_v32  ;;  %vm5310_vm1 = vmmov %vm5301_vm0 }
0x20cd   :  { %3057 = vmatpush.msra.mxu2 %v4887_v14  ;;  %3161 = vmatpush.msra.mxu0 %v4812_v51 }
0x20cf   :  { %3058 = vmatpush.msra.mxu2 %v4893_v11  ;;  %3162 = vmatpush.msra.mxu0 %v4818_v26 }
0x20d1   :  { %3059 = vmatpush.msra.mxu2 %v4899_v49  ;;  %3163 = vmatpush.msra.mxu0 %v4824_v29 }
0x20e3   :  { %v2894_v38 = vpop.permute.xlu1 %2893 }
0x20e4   :  { %3539 = vmatmul.msk.f32.vlgmr.msrb.gmra.mxu3 %vm5301_vm0, %v2894_v38 }
0x20e5   :  { %v2786_v6 = vpop.permute.xlu0 %2785  ;;  %3293 = vmatpush.msrb.mxu3 %v5030_v39 }
0x20e6   :  { %3536 = vmatmul.msk.f32.vlgmr.msrb.gmra.mxu1 %vm5307_vm2, %v2786_v6 }
0x20e7   :  { %3185 = vmatpush.msrb.mxu1 %v4810_v23  ;;  %3294 = vmatpush.msrb.mxu3 %v5034_v25 }
0x20e9   :  { %3186 = vmatpush.msrb.mxu1 %v4816_v24  ;;  %3295 = vmatpush.msrb.mxu3 %v5038_v3 }
0x20eb   :  { %3187 = vmatpush.msrb.mxu1 %v4820_v28  ;;  %3296 = vmatpush.msrb.mxu3 %v5042_v45 }
0x20ed   :  { %3188 = vmatpush.msrb.mxu1 %v4826_v18 }
0x2147   :  { %v2781_v23 = vpop.f32.mrf.mxu0 }
0x214d   :  { %v2677_v32 = vpop.f32.mrf.mxu2 }
0x214e   :  { %v2678_v51 = vadd.f32 %v4933_v53, %v2677_v32 }
0x2150   :  { %v2681_v26 = vrot.slane %v2678_v51, 1  ;;  %2683 = vst.msk [vmem:[%s5260_s15 + $0x3] sm:$0x1] %vm2106_vm14, %v2678_v51 }
0x2152   :  { %2684 = vst.msk [vmem:[%s5260_s15 + $0xb] sm:$0x1] %vm2106_vm14, %v2681_v26  ;;  %v3910_v26 = vld [vmem:[#allocation10 + $0x18] sm:$0xff] }
0x2163   :  { %v2806_v24 = vpop.f32.mrf.mxu1 }
0x2164   :  { %v2807_v28 = vadd.f32 %v2806_v24, %v2781_v23  ;;  %v3911_v23 = vld [vmem:[#allocation10 + $0x10] sm:$0xff]  ;;  %v3912_v24 = vld [vmem:[#allocation10 + $0x8] sm:$0xff] }
0x2166   :  { %v2809_v29 = vadd.f32 %v4864_v60, %v2807_v28  ;;  %v3913_v28 = vld [vmem:[#allocation10] sm:$0xff] }
0x2167   :  { %v2914_v18 = vpop.f32.mrf.mxu3 }
0x2168   :  { %3837 = vtanh.f32 %v2809_v29  ;;  %v2917_v39 = vadd.f32 %v2914_v18, %v2891_v47  ;;  %v3537_v45 = vmul.f32 -1.442695, %v2809_v29 }
0x216a   :  { %3839 = vtanh.f32 %v2917_v39  ;;  %v3540_v5 = vmul.f32 -1.442695, %v2917_v39  ;;  %v3914_v39 = vld [vmem:[#allocation9 + $0x18] sm:$0xff] }
0x216b   :  { %3841 = vpow2.f32 %v3537_v45 }
0x216e   :  { %v3838_v25 = vpop.eup %3837 }
0x216f   :  { %2832 = vrot.lane.b32.xlu2 %v3838_v25, %s4085_s7  ;;  %v3916_v25 = vld [vmem:[#allocation9 + $0x8] sm:$0xff] }
0x2170   :  { %v3840_v3 = vpop.eup %3839 }
0x2171   :  { %2940 = vrot.lane.b32.xlu1 %v3840_v3, %s4085_s7  ;;  %v3842_v50 = vpop.eup %3841 }
0x2172   :  { %v2813_v46 = vadd.f32 1.0, %v3842_v50 }
0x2174   :  { %3843 = vrcp.f32 %v2813_v46  ;;  %v2825_v54 = vand.u32 2147483648, %v2813_v46  ;;  %vm2819_vm3 = vweird.f32 %v2813_v46  ;;  %v2823_v63 = vand.u32 2147483647, %v2813_v46 }
0x2175   :  { %3845 = vpow2.f32 %v3540_v5 }
0x2176   :  { %v2826_v22 = vor.u32 1.1754944e-38, %v2825_v54  ;;  %vm2824_vm9 = vcmp.eq.f32.partialorder %v2823_v63, 8.507059e+37 }
0x217a   :  { %v3844_v60 = vpop.eup %3843 }
0x217b   :  { %v2815_v4 = vmul.f32 %v3844_v60, %v2813_v46  ;;  %v3846_v52 = vpop.eup %3845  ;;  %vm2820_vm4 = vweird.f32 %v3844_v60 }
0x217c   :  { %v2921_v56 = vadd.f32 1.0, %v3846_v52  ;;  %vm2821_vm5 = vmor %vm2819_vm3, %vm2820_vm4 }
0x217d   :  { %v2816_v62 = vsub.f32 1.0, %v2815_v4 }
0x217e   :  { %3847 = vrcp.f32 %v2921_v56  ;;  %v2933_v35 = vand.u32 2147483648, %v2921_v56  ;;  %vm2927_vm6 = vweird.f32 %v2921_v56  ;;  %v2931_v40 = vand.u32 2147483647, %v2921_v56 }
0x217f   :  { %v2817_v19 = vmul.f32 %v3844_v60, %v2816_v62 }
0x2180   :  { %v2934_v7 = vor.u32 1.1754944e-38, %v2933_v35  ;;  %vm2932_vm13 = vcmp.eq.f32.partialorder %v2931_v40, 8.507059e+37 }
0x2181   :  { %v2818_v47 = vadd.f32 %v3844_v60, %v2817_v19 }
0x2183   :  { %v2822_v0 = vsel %vm2821_vm5, %v3844_v60, %v2818_v47  ;;  %v5151_v60 = vld [vmem:[%s5257_s12] ss:$0 sm:$0xff] }
0x2184   :  { %v2827_v2 = vsel %vm2824_vm9, %v2826_v22, %v2822_v0  ;;  %v3848_v31 = vpop.eup %3847 }
0x2185   :  { %v2923_v1 = vmul.f32 %v3848_v31, %v2921_v56  ;;  %vm2928_vm10 = vweird.f32 %v3848_v31  ;;  %v2830_v15 = vmul.f32 %v2827_v2, %v5067_v30 }
0x2186   :  { %vm2929_vm12 = vmor %vm2927_vm6, %vm2928_vm10 }
0x2187   :  { %v2924_v21 = vsub.f32 1.0, %v2923_v1 }
0x2189   :  { %v2925_v10 = vmul.f32 %v3848_v31, %v2924_v21 }
0x218b   :  { %v2926_v12 = vadd.f32 %v3848_v31, %v2925_v10 }
0x218d   :  { %v2930_v20 = vsel %vm2929_vm12, %v3848_v31, %v2926_v12  ;;  %vm5311_vm12 = vmmov %vm5301_vm0 }
0x218e   :  { %v2935_v44 = vsel %vm2932_vm13, %v2934_v7, %v2930_v20  ;;  %vm5312_vm13 = vmmov %vm5301_vm0 }
0x218f   :  { %v2938_v42 = vmul.f32 %v2935_v44, %v5072_v57 }
0x21c9   :  { %v2833_v58 = vpop.permute.xlu2 %2832 }
0x21ca   :  { %v2835_v8 = vmul.f32 %v2833_v58, %v2827_v2 }
0x21cc   :  { %2837 = vrot.lane.b32.xlu1 %v2835_v8, %s4086_s3 }
0x21e3   :  { %v2941_v37 = vpop.permute.xlu1 %2940 }
0x21e4   :  { %v2943_v34 = vmul.f32 %v2941_v37, %v2935_v44 }
0x21e6   :  { %2945 = vrot.lane.b32.xlu0 %v2943_v34, %s4086_s3 }
0x223e   :  { %v2838_v59 = vpop.permute.xlu1 %2837 }
0x223f   :  { %v5119_v36 = vadd.f32 %v2838_v59, %v2830_v15 }
0x2241   :  { %3849 = vtanh.f32 %v5119_v36 }
0x2247   :  { %v3850_v27 = vpop.eup %3849 }
0x2248   :  { %2843 = vrot.lane.b32.xlu0 %v3850_v27, %s4085_s7 }
0x2258   :  { %v2946_v13 = vpop.permute.xlu0 %2945 }
0x2259   :  { %v5124_v61 = vadd.f32 %v2946_v13, %v2938_v42 }
0x225b   :  { %3851 = vtanh.f32 %v5124_v61 }
0x2261   :  { %v3852_v16 = vpop.eup %3851 }
0x2262   :  { %2951 = vrot.lane.b32.xlu2 %v3852_v16, %s4085_s7 }
0x22ba   :  { %v2844_v38 = vpop.permute.xlu0 %2843 }
0x22bb   :  { %v2846_v30 = vmul.f32 %v2844_v38, %v2827_v2 }
0x22bc   :  { %v2952_v6 = vpop.permute.xlu2 %2951 }
0x22bd   :  { %2848 = vrot.lane.b32.xlu2 %v2846_v30, %s4086_s3  ;;  %v2954_v32 = vmul.f32 %v2952_v6, %v2935_v44 }
0x22bf   :  { %v2955_v51 = vmax.f32 %v2954_v32, 0.0  ;;  %3085 = vrot.lane.b32.xlu1 %v2954_v32, %s4086_s3 }
0x22c1   :  { %2977 = vrot.lane.b32.xlu0 %v2955_v51, %s4086_s3 }
0x2317   :  { %v2849_v57 = vpop.permute.xlu2 %2848 }
0x2318   :  { %3538 = vmatmul.msk.f32.vlgmr.msrb.gmra.mxu2 %vm5308_vm15, %v2849_v57  ;;  %3541 = vmatmul.msk.f32.vlgmr.msrb.gmra.mxu0 %vm5309_vm11, %v2849_v57  ;;  %vm5313_vm15 = vmmov %vm5301_vm0 }
0x2319   :  { %3352 = vmatpush.msrb.mxu0 %v3910_v26  ;;  %3248 = vmatpush.msrb.mxu2 %v4882_v43  ;;  %v3915_v43 = vld [vmem:[#allocation9 + $0x10] sm:$0xff]  ;;  %vm5314_vm11 = vmmov %vm5301_vm0 }
0x231b   :  { %3353 = vmatpush.msrb.mxu0 %v3911_v23  ;;  %3249 = vmatpush.msrb.mxu2 %v4887_v14  ;;  %v3917_v14 = vld [vmem:[#allocation9] sm:$0xff] }
0x231d   :  { %3354 = vmatpush.msrb.mxu0 %v3912_v24  ;;  %3250 = vmatpush.msrb.mxu2 %v4893_v11 }
0x231f   :  { %3355 = vmatpush.msrb.mxu0 %v3913_v28  ;;  %3251 = vmatpush.msrb.mxu2 %v4899_v49 }
0x2331   :  { %v3086_v29 = vpop.permute.xlu1 %3085 }
0x2332   :  { %3545 = vmatmul.msk.f32.vlgmr.msra.gmra.mxu3 %vm5310_vm1, %v3086_v29 }
0x2333   :  { %v2978_v18 = vpop.permute.xlu0 %2977 }
0x2334   :  { %3542 = vmatmul.msk.f32.vlgmr.msra.gmra.mxu1 %vm5301_vm0, %v2978_v18 }
0x2335   :  { %3377 = vmatpush.msra.mxu1 %v3914_v39 }
0x2337   :  { %3378 = vmatpush.msra.mxu1 %v3915_v43  ;;  %v3919_v43 = vld [vmem:[%s5258_s13 + $0x18] sm:$0xff] }
0x2339   :  { %3379 = vmatpush.msra.mxu1 %v3916_v25  ;;  %v3920_v25 = vld [vmem:[%s5258_s13 + $0x10] sm:$0xff] }
0x233b   :  { %3380 = vmatpush.msra.mxu1 %v3917_v14  ;;  %v3921_v14 = vld [vmem:[%s5258_s13 + $0x8] sm:$0xff] }
0x2395   :  { %v2973_v49 = vpop.f32.mrf.mxu0 }
0x239b   :  { %v2869_v3 = vpop.f32.mrf.mxu2 }
0x239c   :  { %v2870_v11 = vadd.f32 %v4933_v53, %v2869_v3  ;;  %v3922_v3 = vld [vmem:[%s5258_s13] sm:$0xff] }
0x239e   :  { %v2873_v45 = vrot.slane %v2870_v11, 1  ;;  %2875 = vst.msk [vmem:[%s5260_s15 + $0x4] sm:$0x1] %vm2106_vm14, %v2870_v11 }
0x23a0   :  { %2876 = vst.msk [vmem:[%s5260_s15 + $0xc] sm:$0x1] %vm2106_vm14, %v2873_v45 }
0x23b1   :  { %v2998_v50 = vpop.f32.mrf.mxu1 }
0x23b2   :  { %v2999_v46 = vadd.f32 %v2998_v50, %v2973_v49 }
0x23b4   :  { %v3001_v4 = vadd.f32 %v5151_v60, %v2999_v46 }
0x23b5   :  { %v3106_v5 = vpop.f32.mrf.mxu3 }
0x23b6   :  { %3853 = vtanh.f32 %v3001_v4  ;;  %v3109_v62 = vadd.f32 %v3106_v5, %v3083_v9  ;;  %v3543_v47 = vmul.f32 -1.442695, %v3001_v4 }
0x23b8   :  { %3855 = vtanh.f32 %v3109_v62  ;;  %v3546_v22 = vmul.f32 -1.442695, %v3109_v62 }
0x23b9   :  { %3857 = vpow2.f32 %v3543_v47 }
0x23bc   :  { %v3854_v19 = vpop.eup %3853 }
0x23bd   :  { %3024 = vrot.lane.b32.xlu2 %v3854_v19, %s4085_s7 }
0x23be   :  { %v3856_v52 = vpop.eup %3855 }
0x23bf   :  { %3132 = vrot.lane.b32.xlu1 %v3856_v52, %s4085_s7  ;;  %v3858_v54 = vpop.eup %3857 }
0x23c0   :  { %v3005_v56 = vadd.f32 1.0, %v3858_v54 }
0x23c2   :  { %3859 = vrcp.f32 %v3005_v56  ;;  %v3017_v8 = vand.u32 2147483648, %v3005_v56  ;;  %vm3011_vm2 = vweird.f32 %v3005_v56  ;;  %v3015_v1 = vand.u32 2147483647, %v3005_v56 }
0x23c3   :  { %3861 = vpow2.f32 %v3546_v22 }
0x23c4   :  { %v3018_v10 = vor.u32 1.1754944e-38, %v3017_v8  ;;  %vm3016_vm3 = vcmp.eq.f32.partialorder %v3015_v1, 8.507059e+37 }
0x23c8   :  { %v3860_v63 = vpop.eup %3859 }
0x23c9   :  { %v3007_v0 = vmul.f32 %v3860_v63, %v3005_v56  ;;  %v3862_v2 = vpop.eup %3861  ;;  %vm3012_vm7 = vweird.f32 %v3860_v63 }
0x23ca   :  { %v3113_v31 = vadd.f32 1.0, %v3862_v2  ;;  %vm3013_vm4 = vmor %vm3011_vm2, %vm3012_vm7 }
0x23cb   :  { %v3008_v17 = vsub.f32 1.0, %v3007_v0 }
0x23cc   :  { %3863 = vrcp.f32 %v3113_v31  ;;  %v3125_v15 = vand.u32 2147483648, %v3113_v31  ;;  %vm3119_vm9 = vweird.f32 %v3113_v31  ;;  %v3123_v59 = vand.u32 2147483647, %v3113_v31 }
0x23cd   :  { %v3009_v58 = vmul.f32 %v3860_v63, %v3008_v17 }
0x23ce   :  { %v3126_v42 = vor.u32 1.1754944e-38, %v3125_v15  ;;  %vm3124_vm6 = vcmp.eq.f32.partialorder %v3123_v59, 8.507059e+37 }
0x23cf   :  { %v3010_v9 = vadd.f32 %v3860_v63, %v3009_v58 }
0x23d1   :  { %v3014_v21 = vsel %vm3013_vm4, %v3860_v63, %v3010_v9 }
0x23d2   :  { %v3019_v35 = vsel %vm3016_vm3, %v3018_v10, %v3014_v21  ;;  %v3864_v20 = vpop.eup %3863 }
0x23d3   :  { %v3115_v7 = vmul.f32 %v3864_v20, %v3113_v31  ;;  %vm3120_vm5 = vweird.f32 %v3864_v20  ;;  %v3022_v30 = vmul.f32 %v3019_v35, %v5119_v36 }
0x23d4   :  { %vm3121_vm10 = vmor %vm3119_vm9, %vm3120_vm5 }
0x23d5   :  { %v3116_v37 = vsub.f32 1.0, %v3115_v7  ;;  %vm5315_vm9 = vmmov %vm5314_vm11 }
0x23d7   :  { %v3117_v44 = vmul.f32 %v3864_v20, %v3116_v37 }
0x23d9   :  { %v3118_v34 = vadd.f32 %v3864_v20, %v3117_v44 }
0x23db   :  { %v3122_v27 = vsel %vm3121_vm10, %v3864_v20, %v3118_v34  ;;  %vm5316_vm10 = vmmov %vm5315_vm9 }
0x23dc   :  { %v3127_v16 = vsel %vm3124_vm6, %v3126_v42, %v3122_v27  ;;  %vm5317_vm6 = vmmov %vm5315_vm9 }
0x23dd   :  { %v3130_v57 = vmul.f32 %v3127_v16, %v5124_v61 }
0x2417   :  { %v3025_v12 = vpop.permute.xlu2 %3024 }
0x2418   :  { %v3027_v40 = vmul.f32 %v3025_v12, %v3019_v35 }
0x241a   :  { %3029 = vrot.lane.b32.xlu1 %v3027_v40, %s4086_s3 }
0x2431   :  { %v3133_v13 = vpop.permute.xlu1 %3132 }
0x2432   :  { %v3135_v38 = vmul.f32 %v3133_v13, %v3127_v16 }
0x2434   :  { %3137 = vrot.lane.b32.xlu0 %v3135_v38, %s4086_s3 }
0x248c   :  { %v3030_v6 = vpop.permute.xlu1 %3029 }
0x248d   :  { %v5164_v32 = vadd.f32 %v3030_v6, %v3022_v30 }
0x248f   :  { %3865 = vtanh.f32 %v5164_v32 }
0x2495   :  { %v3866_v51 = vpop.eup %3865 }
0x2496   :  { %3035 = vrot.lane.b32.xlu0 %v3866_v51, %s4085_s7 }
0x24a6   :  { %v3138_v26 = vpop.permute.xlu0 %3137 }
0x24a7   :  { %v5169_v23 = vadd.f32 %v3138_v26, %v3130_v57 }
0x24a9   :  { %3867 = vtanh.f32 %v5169_v23 }
0x24af   :  { %v3868_v24 = vpop.eup %3867 }
0x24b0   :  { %3143 = vrot.lane.b32.xlu2 %v3868_v24, %s4085_s7 }
0x2508   :  { %v3036_v28 = vpop.permute.xlu0 %3035 }
0x2509   :  { %v3038_v36 = vmul.f32 %v3036_v28, %v3019_v35 }
0x250a   :  { %v3144_v29 = vpop.permute.xlu2 %3143 }
0x250b   :  { %3040 = vrot.lane.b32.xlu2 %v3038_v36, %s4086_s3  ;;  %v3146_v18 = vmul.f32 %v3144_v29, %v3127_v16 }
0x250d   :  { %v3147_v39 = vmax.f32 %v3146_v18, 0.0  ;;  %3277 = vrot.lane.b32.xlu1 %v3146_v18, %s4086_s3 }
0x250f   :  { %3169 = vrot.lane.b32.xlu0 %v3147_v39, %s4086_s3 }
0x2565   :  { %v3041_v61 = vpop.permute.xlu2 %3040 }
0x2566   :  { %3544 = vmatmul.msk.f32.vlgmr.msra.gmra.mxu2 %vm5311_vm12, %v3041_v61  ;;  %3547 = vmatmul.msk.f32.vlgmr.msra.gmra.mxu0 %vm5312_vm13, %v3041_v61 }
0x2567   :  { %3440 = vmatpush.msra.mxu2 %v3919_v43 }
0x2569   :  { %3441 = vmatpush.msra.mxu2 %v3920_v25 }
0x256b   :  { %3442 = vmatpush.msra.mxu2 %v3921_v14 }
0x256d   :  { %3443 = vmatpush.msra.mxu2 %v3922_v3 }
0x257f   :  { %v3278_v11 = vpop.permute.xlu1 %3277 }
0x2580   :  { %3551 = vmatmul.msk.f32.vlgmr.msrb.gmra.mxu3 %vm5313_vm15, %v3278_v11  ;;  %v3923_v11 = vld [vmem:[%s5259_s14] ss:$0 sm:$0xff] }
0x2581   :  { %v3170_v45 = vpop.permute.xlu0 %3169 }
0x2582   :  { %3548 = vmatmul.msk.f32.vlgmr.msrb.gmra.mxu1 %vm5314_vm11, %v3170_v45 }
0x25e3   :  { %v3165_v4 = vpop.f32.mrf.mxu0 }
0x25e9   :  { %v3061_v49 = vpop.f32.mrf.mxu2 }
0x25ea   :  { %v3062_v50 = vadd.f32 %v4933_v53, %v3061_v49 }
0x25ec   :  { %v3065_v46 = vrot.slane %v3062_v50, 1  ;;  %3067 = vst.msk [vmem:[%s5260_s15 + $0x5] sm:$0x1] %vm2106_vm14, %v3062_v50 }
0x25ee   :  { %3068 = vst.msk [vmem:[%s5260_s15 + $0xd] sm:$0x1] %vm2106_vm14, %v3065_v46 }
0x25ff   :  { %v3190_v5 = vpop.f32.mrf.mxu1 }
0x2600   :  { %v3191_v62 = vadd.f32 %v3190_v5, %v3165_v4 }
0x2602   :  { %v3193_v19 = vadd.f32 %v5151_v60, %v3191_v62 }
0x2603   :  { %v3298_v52 = vpop.f32.mrf.mxu3 }
0x2604   :  { %3869 = vtanh.f32 %v3193_v19  ;;  %v3301_v53 = vadd.f32 %v3298_v52, %v3275_v48  ;;  %v3549_v56 = vmul.f32 -1.442695, %v3193_v19 }
0x2606   :  { %3871 = vtanh.f32 %v3301_v53  ;;  %v3552_v58 = vmul.f32 -1.442695, %v3301_v53 }
0x2607   :  { %3873 = vpow2.f32 %v3549_v56 }
0x260a   :  { %v3870_v47 = vpop.eup %3869 }
0x260b   :  { %3216 = vrot.lane.b32.xlu2 %v3870_v47, %s4085_s7 }
0x260c   :  { %v3872_v54 = vpop.eup %3871 }
0x260d   :  { %3324 = vrot.lane.b32.xlu1 %v3872_v54, %s4085_s7  ;;  %v3874_v63 = vpop.eup %3873 }
0x260e   :  { %v3197_v0 = vadd.f32 1.0, %v3874_v63 }
0x2610   :  { %3875 = vrcp.f32 %v3197_v0  ;;  %v3209_v48 = vand.u32 2147483648, %v3197_v0  ;;  %vm3203_vm1 = vweird.f32 %v3197_v0  ;;  %v3207_v8 = vand.u32 2147483647, %v3197_v0 }
0x2611   :  { %3877 = vpow2.f32 %v3552_v58 }
0x2612   :  { %v3210_v1 = vor.u32 1.1754944e-38, %v3209_v48  ;;  %vm3208_vm7 = vcmp.eq.f32.partialorder %v3207_v8, 8.507059e+37 }
0x2616   :  { %v3876_v22 = vpop.eup %3875 }
0x2617   :  { %v3199_v17 = vmul.f32 %v3876_v22, %v3197_v0  ;;  %v3878_v33 = vpop.eup %3877  ;;  %vm3204_vm8 = vweird.f32 %v3876_v22 }
0x2618   :  { %v3305_v9 = vadd.f32 1.0, %v3878_v33  ;;  %vm3205_vm0 = vmor %vm3203_vm1, %vm3204_vm8 }
0x2619   :  { %v3200_v55 = vsub.f32 1.0, %v3199_v17  ;;  %vm5318_vm8 = vmmov %vm5317_vm6 }
0x261a   :  { %3879 = vrcp.f32 %v3305_v9  ;;  %v3317_v44 = vand.u32 2147483648, %v3305_v9  ;;  %vm3311_vm4 = vweird.f32 %v3305_v9  ;;  %v3315_v34 = vand.u32 2147483647, %v3305_v9 }
0x261b   :  { %v3201_v2 = vmul.f32 %v3876_v22, %v3200_v55 }
0x261c   :  { %v3318_v59 = vor.u32 1.1754944e-38, %v3317_v44  ;;  %vm3316_vm5 = vcmp.eq.f32.partialorder %v3315_v34, 8.507059e+37 }
0x261d   :  { %v3202_v41 = vadd.f32 %v3876_v22, %v3201_v2 }
0x261f   :  { %v3206_v31 = vsel %vm3205_vm0, %v3876_v22, %v3202_v41 }
0x2620   :  { %v3211_v10 = vsel %vm3208_vm7, %v3210_v1, %v3206_v31  ;;  %v3880_v35 = vpop.eup %3879 }
0x2621   :  { %v3307_v40 = vmul.f32 %v3880_v35, %v3305_v9  ;;  %vm3312_vm2 = vweird.f32 %v3880_v35  ;;  %v3214_v16 = vmul.f32 %v3211_v10, %v5164_v32 }
0x2622   :  { %vm3313_vm3 = vmor %vm3311_vm4, %vm3312_vm2 }
0x2623   :  { %v3308_v20 = vsub.f32 1.0, %v3307_v40 }
0x2625   :  { %v3309_v7 = vmul.f32 %v3880_v35, %v3308_v20 }
0x2627   :  { %v3310_v37 = vadd.f32 %v3880_v35, %v3309_v7 }
0x2629   :  { %v3314_v15 = vsel %vm3313_vm3, %v3880_v35, %v3310_v37 }
0x262a   :  { %v3319_v42 = vsel %vm3316_vm5, %v3318_v59, %v3314_v15 }
0x262b   :  { %v3322_v51 = vmul.f32 %v3319_v42, %v5169_v23 }
0x2665   :  { %v3217_v21 = vpop.permute.xlu2 %3216 }
0x2666   :  { %v3219_v12 = vmul.f32 %v3217_v21, %v3211_v10 }
0x2668   :  { %3221 = vrot.lane.b32.xlu1 %v3219_v12, %s4086_s3 }
0x267f   :  { %v3325_v27 = vpop.permute.xlu1 %3324 }
0x2680   :  { %v3327_v13 = vmul.f32 %v3325_v27, %v3319_v42 }
0x2682   :  { %3329 = vrot.lane.b32.xlu0 %v3327_v13, %s4086_s3 }
0x26da   :  { %v3222_v38 = vpop.permute.xlu1 %3221 }
0x26db   :  { %v3224_v30 = vadd.f32 %v3222_v38, %v3214_v16 }
0x26dd   :  { %3881 = vtanh.f32 %v3224_v30 }
0x26e3   :  { %v3882_v6 = vpop.eup %3881 }
0x26e4   :  { %3227 = vrot.lane.b32.xlu0 %v3882_v6, %s4085_s7 }
0x26f4   :  { %v3330_v57 = vpop.permute.xlu0 %3329 }
0x26f5   :  { %v3332_v26 = vadd.f32 %v3330_v57, %v3322_v51 }
0x26f7   :  { %3883 = vtanh.f32 %v3332_v26 }
0x26fd   :  { %v3884_v24 = vpop.eup %3883 }
0x26fe   :  { %3335 = vrot.lane.b32.xlu2 %v3884_v24, %s4085_s7 }
0x2756   :  { %v3228_v28 = vpop.permute.xlu0 %3227 }
0x2757   :  { %v3230_v36 = vmul.f32 %v3228_v28, %v3211_v10 }
0x2758   :  { %v3336_v29 = vpop.permute.xlu2 %3335 }
0x2759   :  { %3232 = vrot.lane.b32.xlu1 %v3230_v36, %s4086_s3  ;;  %v3338_v32 = vmul.f32 %v3336_v29, %v3319_v42 }
0x275b   :  { %v3339_v18 = vmax.f32 %v3338_v32, 0.0 }
0x275d   :  { %3361 = vrot.lane.b32.xlu2 %v3339_v18, %s4086_s3 }
0x27b7   :  { %v3362_v39 = vpop.permute.xlu2 %3361 }
0x27b8   :  { %3554 = vmatmul.msk.f32.vlgmr.msra.gmra.mxu1 %vm5315_vm9, %v3362_v39 }
0x27cb   :  { %v3233_v61 = vpop.permute.xlu1 %3232 }
0x27cc   :  { %3550 = vmatmul.msk.f32.vlgmr.msrb.gmra.mxu2 %vm5316_vm10, %v3233_v61  ;;  %3553 = vmatmul.msk.f32.vlgmr.msrb.gmra.mxu0 %vm5317_vm6, %v3233_v61 }
0x2835   :  { %v3382_v23 = vpop.f32.mrf.mxu1 }
0x2849   :  { %v3357_v43 = vpop.f32.mrf.mxu0 }
0x284a   :  { %v3383_v25 = vadd.f32 %v3382_v23, %v3357_v43 }
0x284c   :  { %v3385_v14 = vadd.f32 %v5151_v60, %v3383_v25 }
0x284e   :  { %3885 = vtanh.f32 %v3385_v14  ;;  %v3555_v60 = vmul.f32 -1.442695, %v3385_v14 }
0x284f   :  { %v3253_v3 = vpop.f32.mrf.mxu2 }
0x2850   :  { %v3254_v45 = vadd.f32 %v3923_v11, %v3253_v3  ;;  %3887 = vpow2.f32 %v3555_v60 }
0x2852   :  { %v3257_v49 = vrot.slane %v3254_v45, 1  ;;  %3259 = vst.msk [vmem:[%s5260_s15 + $0x6] sm:$0x1] %vm2106_vm14, %v3254_v45 }
0x2854   :  { %v3886_v50 = vpop.eup %3885  ;;  %3260 = vst.msk [vmem:[%s5260_s15 + $0xe] sm:$0x1] %vm2106_vm14, %v3257_v49 }
0x2855   :  { %3408 = vrot.lane.b32.xlu0 %v3886_v50, %s4085_s7 }
0x2856   :  { %v3888_v46 = vpop.eup %3887 }
0x2857   :  { %v3389_v4 = vadd.f32 1.0, %v3888_v46 }
0x2859   :  { %3889 = vrcp.f32 %v3389_v4  ;;  %v3401_v47 = vand.u32 2147483648, %v3389_v4  ;;  %vm3395_vm13 = vweird.f32 %v3389_v4  ;;  %v3399_v54 = vand.u32 2147483647, %v3389_v4 }
0x285b   :  { %v3402_v63 = vor.u32 1.1754944e-38, %v3401_v47  ;;  %vm3400_vm11 = vcmp.eq.f32.partialorder %v3399_v54, 8.507059e+37 }
0x285f   :  { %v3890_v5 = vpop.eup %3889 }
0x2860   :  { %v3391_v62 = vmul.f32 %v3890_v5, %v3389_v4  ;;  %vm3396_vm12 = vweird.f32 %v3890_v5 }
0x2861   :  { %vm3397_vm15 = vmor %vm3395_vm13, %vm3396_vm12 }
0x2862   :  { %v3392_v19 = vsub.f32 1.0, %v3391_v62 }
0x2864   :  { %v3393_v52 = vmul.f32 %v3890_v5, %v3392_v19 }
0x2866   :  { %v3394_v53 = vadd.f32 %v3890_v5, %v3393_v52 }
0x2868   :  { %v3398_v56 = vsel %vm3397_vm15, %v3890_v5, %v3394_v53 }
0x2869   :  { %v3403_v22 = vsel %vm3400_vm11, %v3402_v63, %v3398_v56 }
0x286a   :  { %v3406_v58 = vmul.f32 %v3403_v22, %v3224_v30 }
0x28c7   :  { %v3409_v0 = vpop.permute.xlu0 %3408 }
0x28c8   :  { %v3411_v17 = vmul.f32 %v3409_v0, %v3403_v22 }
0x28ca   :  { %3413 = vrot.lane.b32.xlu1 %v3411_v17, %s4086_s3 }
0x293c   :  { %v3414_v55 = vpop.permute.xlu1 %3413 }
0x293d   :  { %v3416_v2 = vadd.f32 %v3414_v55, %v3406_v58 }
0x293f   :  { %3891 = vtanh.f32 %v3416_v2 }
0x2945   :  { %v3892_v33 = vpop.eup %3891 }
0x2946   :  { %3419 = vrot.lane.b32.xlu2 %v3892_v33, %s4085_s7 }
0x29a0   :  { %v3420_v41 = vpop.permute.xlu2 %3419 }
0x29a1   :  { %v3422_v48 = vmul.f32 %v3420_v41, %v3403_v22 }
0x29a3   :  { %3424 = vrot.lane.b32.xlu0 %v3422_v48, %s4086_s3 }
0x2a15   :  { %v3425_v9 = vpop.permute.xlu0 %3424 }
0x2a16   :  { %3556 = vmatmul.msk.f32.vlgmr.msra.gmra.mxu2 %vm5318_vm8, %v3425_v9 }
0x2a99   :  { %v3445_v8 = vpop.f32.mrf.mxu2 }
0x2a9a   :  { %v3446_v31 = vadd.f32 %v3923_v11, %v3445_v8 }
0x2a9c   :  { %v3449_v1 = vrot.slane %v3446_v31, 1  ;;  %3451 = vst.msk [vmem:[%s5260_s15 + $0x7] sm:$0x1] %vm2106_vm14, %v3446_v31 }
0x2a9e   :  { %3452 = vst.msk [vmem:[%s5260_s15 + $0xf] sm:$0x1] %vm2106_vm14, %v3449_v1 }
0x2a9f   :  { %3457 = vsyncpa [#allocation3], 1 }
0x2aa0   :  { %3458 = vsyncpa [#allocation5], 1 }
0x2aa1   :  { %3459 = vsyncpa [#allocation8], 1 }
0x2aa2   :  { %3460 = vsyncpa [#allocation11], 1 }

</bundles_post_ra>
